<compile_context>
chip_gen: v6e
topology: v6e:2x2x1
jax: 0.10.0
libtpu: 0.0.40
codegen_flags: <defaults>
</compile_context>

<pallas_src>
import functools
import math

import jax
import jax.numpy as jnp
from jax.experimental import pallas as pl
from jax.experimental.pallas import tpu as pltpu

# ---------------- small config consistent with the module ----------------
DIM = 64
N_HEADS = 4
N_KV_HEADS = 2            # exercises repeat_kv (n_rep = 2)
HEAD_DIM = DIM // N_HEADS
N_REP = N_HEADS // N_KV_HEADS
N_LAYERS = 2
VOCAB = 32
SUBNODE = 16
POS_SIZE = 64
MULTIPLE_OF = 32
NORM_EPS = 1e-6


def _ffn_hidden(dim, multiple_of, ffn_dim_multiplier=None):
    hidden = 4 * dim
    hidden = int(2 * hidden / 3)
    if ffn_dim_multiplier is not None:
        hidden = int(ffn_dim_multiplier * hidden)
    return multiple_of * ((hidden + multiple_of - 1) // multiple_of)


FFN_HIDDEN = _ffn_hidden(DIM, MULTIPLE_OF)  # 192


# ============================ fused Pallas kernel ============================

def _rmsnorm_rows(x, w2d):
    # x: (R, D), w2d: (1, D)
    ms = jnp.mean(x * x, axis=-1, keepdims=True)
    return x * jax.lax.rsqrt(ms + NORM_EPS) * w2d


def fused_transformer_kernel(
    mask_len_ref,                                    # SMEM (B,) int32
    x_ref,                                           # VMEM (B*S_pad, D)
    attn_norm_ref, wqkv_ref, wo_ref,                 # stacked per-layer weights
    ffn_norm_ref, w13_ref, w2_ref,
    head_norm_ref, head_w1_ref, head_b1_ref, head_w2_ref, head_b2_ref,
    out_ref,                                         # VMEM (B, VOCAB)
    attn_ref,                                        # VMEM scratch (B*S_pad, D)
    *, batch, seqlen, seq_pad,
):
    B, S, SP, HD = batch, seqlen, seq_pad, HEAD_DIM
    Q_OFF = 0
    K_OFF = N_HEADS * HD
    V_OFF = K_OFF + N_KV_HEADS * HD

    x = x_ref[...]                                   # (B*SP, D) f32, stays resident

    # ---- additive mask, built once and reused by every layer -----------------
    # query-indexed mask (matches the reference: constant over keys) plus -inf
    # on padded key columns.  Padded *query* rows get a 0 query-mask so they
    # stay finite garbage (they are never selected nor used as keys).
    qpos = jax.lax.broadcasted_iota(jnp.int32, (SP, 1), 0)
    kpos = jax.lax.broadcasted_iota(jnp.int32, (1, SP), 1)
    kmask = jnp.where(kpos < S, 0.0, -jnp.inf).astype(jnp.float32)      # (1, SP)
    mask_blocks = []
    for b in range(B):
        q_ok = (qpos < mask_len_ref[b] + 1) | (qpos >= S)
        qm = jnp.where(q_ok, 0.0, -jnp.inf).astype(jnp.float32)          # (SP, 1)
        mb = qm + kmask                                                  # (SP, SP)
        mb_rep = jnp.concatenate([mb] * N_REP, axis=0)                   # (N_REP*SP, SP)
        mask_blocks.extend([mb_rep] * N_KV_HEADS)
    mask_all = jnp.concatenate(mask_blocks, axis=0)   # (B*KV*N_REP*SP, SP)

    blk = N_REP * SP                                  # rows per (batch, kv) block

    for l in range(N_LAYERS):                         # static unroll over layers
        # ---------------- attention ----------------
        xn = _rmsnorm_rows(x, attn_norm_ref[l])
        # single fused QKV projection, batch folded into M, 128-lane output.
        # (wq is pre-scaled by 1/sqrt(hd) at pack time.)
        qkv = jnp.dot(xn, wqkv_ref[l], preferred_element_type=jnp.float32)

        # --- scores: one matmul per (batch, kv head), rep heads stacked on rows
        score_blocks = []
        for b in range(B):                            # static unroll over batch
            r0 = b * SP
            kbt = qkv[r0:r0 + SP, K_OFF:V_OFF].T      # (KV*HD, SP): 1 transpose / batch
            for kv in range(N_KV_HEADS):
                q_stack = jnp.concatenate(
                    [qkv[r0:r0 + SP, (kv * N_REP + r) * HD:(kv * N_REP + r + 1) * HD]
                     for r in range(N_REP)], axis=0)  # (N_REP*SP, HD), 8-aligned concat
                score_blocks.append(
                    jnp.dot(q_stack, kbt[kv * HD:(kv + 1) * HD, :],
                            preferred_element_type=jnp.float32))
        # --- one batched softmax over all (batch, kv) blocks
        scores = jnp.concatenate(score_blocks, axis=0) + mask_all
        m = jnp.max(scores, axis=-1, keepdims=True)
        p = jnp.exp(scores - m)
        denom = jnp.sum(p, axis=-1, keepdims=True)
        p = p * pl.reciprocal(denom, approx=False)

        # --- P@V per (batch, kv) block; scatter per-head results into VMEM
        #     scratch at their lane offsets (keeps a single lane-dense wo matmul)
        idx = 0
        for b in range(B):
            r0 = b * SP
            for kv in range(N_KV_HEADS):
                p_blk = p[idx * blk:(idx + 1) * blk, :]                     # (N_REP*SP, SP)
                v_bkv = qkv[r0:r0 + SP, V_OFF + kv * HD:V_OFF + (kv + 1) * HD]
                o_stack = jnp.dot(p_blk, v_bkv, preferred_element_type=jnp.float32)
                for r in range(N_REP):
                    h = kv * N_REP + r                # repeat_kv head ordering
                    attn_ref[r0:r0 + SP, h * HD:(h + 1) * HD] = \
                        o_stack[r * SP:(r + 1) * SP, :]
                idx += 1

        h1 = x + jnp.dot(attn_ref[...], wo_ref[l], preferred_element_type=jnp.float32)

        # ---------------- SwiGLU feed-forward (fused w1|w3) ----------------
        hn = _rmsnorm_rows(h1, ffn_norm_ref[l])
        ag = jnp.dot(hn, w13_ref[l], preferred_element_type=jnp.float32)   # (B*SP, 2*F)
        a = ag[:, :FFN_HIDDEN]
        g = ag[:, FFN_HIDDEN:]
        x = h1 + jnp.dot(a * jax.nn.sigmoid(a) * g, w2_ref[l],
                         preferred_element_type=jnp.float32)

    # ---------------- output head: RMSNorm + Linear + exact GELU + Linear ----
    # select row index 1 of every batch (row-wise norm => selecting before the
    # norm is mathematically identical to the reference).
    sel = jnp.concatenate([x[b * SP + 1:b * SP + 2, :] for b in range(B)], axis=0)
    hn = _rmsnorm_rows(sel, head_norm_ref[...])
    a = jnp.dot(hn, head_w1_ref[...], preferred_element_type=jnp.float32) + head_b1_ref[...]
    g = 0.5 * a * (1.0 + jax.lax.erf(a * (1.0 / math.sqrt(2.0))))  # exact (erf) GELU
    out_ref[...] = (jnp.dot(g, head_w2_ref[...], preferred_element_type=jnp.float32)
                    + head_b2_ref[...])


# ============================ pallas_call wrapper ============================

def pack_params(params):
    """One-time packing: QKV fused (+ scale folded into wq) and w1|w3 fused."""
    L = params["layers"]
    scale = 1.0 / math.sqrt(HEAD_DIM)                 # exact power of two
    packed = dict(params)
    packed["wqkv"] = jnp.concatenate([L["wq"] * scale, L["wk"], L["wv"]], axis=-1)
    packed["w13"] = jnp.concatenate([L["w1"], L["w3"]], axis=-1)
    packed["wo"] = L["wo"]
    packed["w2"] = L["w2"]
    packed["attn_norm_w"] = L["attn_norm_w"]
    packed["ffn_norm_w"] = L["ffn_norm_w"]
    return packed


def fused_forward(packed, graph_features, tokens, subnode_ids, token_mask_len, start_pos=0):
    h, seqlen = embed(packed, graph_features, tokens, subnode_ids)
    B = h.shape[0]
    seq_pad = ((seqlen + 7) // 8) * 8                 # 8-aligned per-batch row stride
    if seq_pad != seqlen:
        h = jnp.pad(h, ((0, 0), (0, seq_pad - seqlen), (0, 0)))
    x_flat = h.reshape(B * seq_pad, DIM).astype(jnp.float32)

    vmem_inputs = (
        x_flat,
        packed["attn_norm_w"], packed["wqkv"], packed["wo"],
        packed["ffn_norm_w"], packed["w13"], packed["w2"],
        packed["norm_w"], packed["out_w1"], packed["out_b1"],
        packed["out_w2"], packed["out_b2"],
    )

    # NOTE(v7x): a grid=(B,) "parallel" batch axis would engage the second
    # TensorCore there; kept grid-less here since v5e/v6e have a single TC and
    # the batched-M matmuls are strictly better on one core.
    kernel = functools.partial(fused_transformer_kernel,
                               batch=B, seqlen=seqlen, seq_pad=seq_pad)
    out = pl.pallas_call(
        kernel,
        out_shape=jax.ShapeDtypeStruct((B, VOCAB), jnp.float32),
        in_specs=[pl.BlockSpec(memory_space=pltpu.MemorySpace.SMEM)]     # token_mask_len
                 + [pl.BlockSpec(memory_space=pltpu.MemorySpace.VMEM)] * len(vmem_inputs),
        out_specs=pl.BlockSpec(memory_space=pltpu.MemorySpace.VMEM),
        scratch_shapes=[pltpu.VMEM((B * seq_pad, DIM), jnp.float32)],    # attn output
    )(token_mask_len.astype(jnp.int32), *vmem_inputs)
    return out[:, None, :]                                               # (B, 1, VOCAB)


# ============================ model glue (plain JAX) ============================

def embed(params, graph_features, tokens, subnode_ids):
    bsz, tok_len = tokens.shape
    g_len = graph_features.shape[1]
    h_tokens = params["tok_emb"][tokens]                     # (bsz, tok_len, D)
    h_sub = params["node_emb"][subnode_ids]                  # (bsz, tok_len, D)
    h_tokens = h_tokens + params["type_emb"][0] + h_sub      # token_types == 0
    h_graph = graph_features + params["type_emb"][1]         # graph types == 1
    h = jnp.concatenate([h_graph, h_tokens], axis=1)
    seqlen = tok_len + g_len
    h = h + params["pos_emb"][None, :seqlen, :]
    return h, seqlen


def build_mask(token_mask_len, bsz, seqlen):
    positions = jnp.arange(seqlen, dtype=jnp.int32)[None, :]          # (1, S)
    valid = positions < (token_mask_len[:, None] + 1)                 # (bsz, S)
    return jnp.where(valid, 0.0, -jnp.inf).astype(jnp.float32)        # (bsz, S)


# ---------------------- pure-JAX reference (mirrors PyTorch ops) ----------------------

def reference_forward(params, graph_features, tokens, subnode_ids, token_mask_len, start_pos=0):
    bsz = tokens.shape[0]
    h, S = embed(params, graph_features, tokens, subnode_ids)
    mask4 = build_mask(token_mask_len, bsz, S)[:, None, :, None]      # (bsz, 1, Sq, 1)

    def rmsnorm(x, w):
        return x * jax.lax.rsqrt(jnp.mean(x * x, -1, keepdims=True) + NORM_EPS) * w[0]

    L = params["layers"]
    for l in range(N_LAYERS):
        xn = rmsnorm(h, L["attn_norm_w"][l])
        q = (xn @ L["wq"][l]).reshape(bsz, S, N_HEADS, HEAD_DIM)
        k = (xn @ L["wk"][l]).reshape(bsz, S, N_KV_HEADS, HEAD_DIM)
        v = (xn @ L["wv"][l]).reshape(bsz, S, N_KV_HEADS, HEAD_DIM)
        k = jnp.repeat(k, N_REP, axis=2)
        v = jnp.repeat(v, N_REP, axis=2)
        q, k, v = (t.transpose(0, 2, 1, 3) for t in (q, k, v))
        scores = q @ k.transpose(0, 1, 3, 2) / math.sqrt(HEAD_DIM) + mask4
        p = jax.nn.softmax(scores, axis=-1)
        o = (p @ v).transpose(0, 2, 1, 3).reshape(bsz, S, -1) @ L["wo"][l]
        h1 = h + o
        hn = rmsnorm(h1, L["ffn_norm_w"][l])
        h = h1 + (jax.nn.silu(hn @ L["w1"][l]) * (hn @ L["w3"][l])) @ L["w2"][l]
    h = rmsnorm(h, params["norm_w"])
    hs = h[:, 1:2, :]
    a = hs @ params["out_w1"] + params["out_b1"][0]
    g = jax.nn.gelu(a, approximate=False)
    return g @ params["out_w2"] + params["out_b2"][0]


# ---------------------- deterministic synthetic parameters ----------------------

def init_params(key):
    ks = jax.random.split(key, 8)

    def nrm(k, shape, scale):
        return jax.random.normal(k, shape, jnp.float32) * scale

    params = {}
    params["tok_emb"] = nrm(ks[0], (VOCAB, DIM), 0.02)
    # NodeIdEmbedding uses orthogonal init -> orthonormal rows via QR
    qmat, _ = jnp.linalg.qr(jax.random.normal(ks[1], (DIM, SUBNODE), jnp.float32))
    params["node_emb"] = qmat.T                                    # (SUBNODE, DIM)
    params["type_emb"] = nrm(ks[2], (2, DIM), 0.02)
    # sinusoidal positional embedding
    position = jnp.arange(POS_SIZE, dtype=jnp.float32)[:, None]
    div_term = jnp.exp(jnp.arange(0, DIM, 2, dtype=jnp.float32) * (-math.log(10000.0) / DIM))
    pe = jnp.zeros((POS_SIZE, DIM), jnp.float32)
    pe = pe.at[:, 0::2].set(jnp.sin(position * div_term))
    pe = pe.at[:, 1::2].set(jnp.cos(position * div_term))
    params["pos_emb"] = pe

    s_d, s_h = 1.0 / math.sqrt(DIM), 1.0 / math.sqrt(FFN_HIDDEN)
    per_layer = []
    for lk in jax.random.split(ks[3], N_LAYERS):
        w = jax.random.split(lk, 7)
        per_layer.append(dict(
            attn_norm_w=jnp.ones((1, DIM), jnp.float32),
            wq=nrm(w[0], (DIM, N_HEADS * HEAD_DIM), s_d),
            wk=nrm(w[1], (DIM, N_KV_HEADS * HEAD_DIM), s_d),
            wv=nrm(w[2], (DIM, N_KV_HEADS * HEAD_DIM), s_d),
            wo=nrm(w[3], (N_HEADS * HEAD_DIM, DIM), s_d),
            ffn_norm_w=jnp.ones((1, DIM), jnp.float32),
            w1=nrm(w[4], (DIM, FFN_HIDDEN), s_d),
            w2=nrm(w[5], (FFN_HIDDEN, DIM), s_h),
            w3=nrm(w[6], (DIM, FFN_HIDDEN), s_d),
        ))
    # stack per-layer weights into single (L, ...) arrays so the whole model
    # can be handed to one fused pallas_call.
    params["layers"] = {k: jnp.stack([p[k] for p in per_layer], axis=0)
                        for k in per_layer[0]}
    params["norm_w"] = jnp.ones((1, DIM), jnp.float32)
    params["out_w1"] = nrm(ks[4], (DIM, DIM), s_d)
    params["out_b1"] = jnp.zeros((1, DIM), jnp.float32)
    params["out_w2"] = nrm(ks[5], (DIM, VOCAB), s_d)
    params["out_b2"] = jnp.zeros((1, VOCAB), jnp.float32)
    return params


# ============================ demo ============================

if __name__ == "__main__":
    key = jax.random.PRNGKey(0)
    k_p, k_g, k_t, k_s = jax.random.split(key, 4)

    bsz, g_len, tok_len = 2, 4, 8
    seqlen = g_len + tok_len

    params = init_params(k_p)
    packed = pack_params(params)          # one-time weight packing (outside hot path)
    graph_features = jax.random.normal(k_g, (bsz, g_len, DIM), jnp.float32)
    tokens = jax.random.randint(k_t, (bsz, tok_len), 0, VOCAB)
    subnode_ids = jax.random.randint(k_s, (bsz, tok_len), 0, SUBNODE)
    # All positions valid (fully-masked query rows would yield NaN softmax rows,
    # exactly as in the PyTorch reference; we keep the demo finite).
    token_mask_len = jnp.array([seqlen - 1, seqlen - 1], dtype=jnp.int32)

    out = fused_forward(packed, graph_features, tokens, subnode_ids, token_mask_len, 0)
    out = jax.block_until_ready(out)

    ref = reference_forward(params, graph_features, tokens, subnode_ids, token_mask_len, 0)
    assert out.shape == (bsz, 1, VOCAB)
    assert jnp.allclose(out, ref, rtol=1e-4, atol=1e-4), (
        f"max abs err {float(jnp.max(jnp.abs(out - ref)))}")

    print("KERNEL_OK")
</pallas_src>

<mosaic_0001>
module attributes {stable_mosaic.version = 11 : i64} {
  func.func @fused_transformer_kernel(%arg0: memref<2xi32, #tpu.memory_space<smem>>, %arg1: memref<32x64xf32, #tpu.memory_space<vmem>>, %arg2: memref<2x1x64xf32, #tpu.memory_space<vmem>>, %arg3: memref<2x64x128xf32, #tpu.memory_space<vmem>>, %arg4: memref<2x64x64xf32, #tpu.memory_space<vmem>>, %arg5: memref<2x1x64xf32, #tpu.memory_space<vmem>>, %arg6: memref<2x64x384xf32, #tpu.memory_space<vmem>>, %arg7: memref<2x192x64xf32, #tpu.memory_space<vmem>>, %arg8: memref<1x64xf32, #tpu.memory_space<vmem>>, %arg9: memref<64x64xf32, #tpu.memory_space<vmem>>, %arg10: memref<1x64xf32, #tpu.memory_space<vmem>>, %arg11: memref<64x32xf32, #tpu.memory_space<vmem>>, %arg12: memref<1x32xf32, #tpu.memory_space<vmem>>, %arg13: memref<2x32xf32, #tpu.memory_space<vmem>>, %arg14: memref<32x64xf32, #tpu.memory_space<vmem>>) attributes {dimension_semantics = [], scalar_prefetch = 0 : i64, scratch_operands = 1 : i64, tpu.core_type = #tpu.core_type<tc>} {
    %c0 = arith.constant 0 : index
    %c0_0 = arith.constant 0 : index
    %0 = vector.load %arg1[%c0, %c0_0] : memref<32x64xf32, #tpu.memory_space<vmem>>, vector<32x64xf32>
    %1 = tpu.iota {dimensions = array<i32: 0>} : vector<16x1xi32>
    %2 = tpu.iota {dimensions = array<i32: 1>} : vector<1x16xi32>
    %c12_i32 = arith.constant 12 : i32
    %3 = vector.broadcast %c12_i32 : i32 to vector<1x16xi32>
    %4 = arith.cmpi slt, %2, %3 : vector<1x16xi32>
    %cst = arith.constant 0.000000e+00 : f32
    %cst_1 = arith.constant 0xFF800000 : f32
    %5 = vector.broadcast %cst : f32 to vector<1x16xf32>
    %6 = vector.broadcast %cst_1 : f32 to vector<1x16xf32>
    %7 = arith.select %4, %5, %6 : vector<1x16xi1>, vector<1x16xf32>
    %c0_2 = arith.constant 0 : index
    %8 = memref.load %arg0[%c0_2] : memref<2xi32, #tpu.memory_space<smem>>
    %c1_i32 = arith.constant 1 : i32
    %9 = arith.addi %8, %c1_i32 : i32
    %10 = vector.broadcast %9 : i32 to vector<16x1xi32>
    %11 = arith.cmpi slt, %1, %10 : vector<16x1xi32>
    %c12_i32_3 = arith.constant 12 : i32
    %12 = vector.broadcast %c12_i32_3 : i32 to vector<16x1xi32>
    %13 = arith.cmpi sge, %1, %12 : vector<16x1xi32>
    %14 = arith.ori %11, %13 : vector<16x1xi1>
    %cst_4 = arith.constant 0.000000e+00 : f32
    %cst_5 = arith.constant 0xFF800000 : f32
    %15 = vector.broadcast %cst_4 : f32 to vector<16x1xf32>
    %16 = vector.broadcast %cst_5 : f32 to vector<16x1xf32>
    %17 = arith.select %14, %15, %16 : vector<16x1xi1>, vector<16x1xf32>
    %18 = vector.broadcast %17 : vector<16x1xf32> to vector<16x16xf32>
    %19 = vector.broadcast %7 : vector<1x16xf32> to vector<16x16xf32>
    %20 = arith.addf %18, %19 : vector<16x16xf32>
    %21 = tpu.concatenate %20, %20 in 0 : vector<16x16xf32>, vector<16x16xf32> -> vector<32x16xf32>
    %c1 = arith.constant 1 : index
    %22 = memref.load %arg0[%c1] : memref<2xi32, #tpu.memory_space<smem>>
    %c1_i32_6 = arith.constant 1 : i32
    %23 = arith.addi %22, %c1_i32_6 : i32
    %24 = vector.broadcast %23 : i32 to vector<16x1xi32>
    %25 = arith.cmpi slt, %1, %24 : vector<16x1xi32>
    %c12_i32_7 = arith.constant 12 : i32
    %26 = vector.broadcast %c12_i32_7 : i32 to vector<16x1xi32>
    %27 = arith.cmpi sge, %1, %26 : vector<16x1xi32>
    %28 = arith.ori %25, %27 : vector<16x1xi1>
    %cst_8 = arith.constant 0.000000e+00 : f32
    %cst_9 = arith.constant 0xFF800000 : f32
    %29 = vector.broadcast %cst_8 : f32 to vector<16x1xf32>
    %30 = vector.broadcast %cst_9 : f32 to vector<16x1xf32>
    %31 = arith.select %28, %29, %30 : vector<16x1xi1>, vector<16x1xf32>
    %32 = vector.broadcast %31 : vector<16x1xf32> to vector<16x16xf32>
    %33 = vector.broadcast %7 : vector<1x16xf32> to vector<16x16xf32>
    %34 = arith.addf %32, %33 : vector<16x16xf32>
    %35 = tpu.concatenate %34, %34 in 0 : vector<16x16xf32>, vector<16x16xf32> -> vector<32x16xf32>
    %36 = tpu.concatenate %21, %21, %35, %35 in 0 : vector<32x16xf32>, vector<32x16xf32>, vector<32x16xf32>, vector<32x16xf32> -> vector<128x16xf32>
    %c0_10 = arith.constant 0 : index
    %c0_11 = arith.constant 0 : index
    %c0_12 = arith.constant 0 : index
    %37 = vector.load %arg2[%c0_10, %c0_11, %c0_12] : memref<2x1x64xf32, #tpu.memory_space<vmem>>, vector<1x1x64xf32>
    %38 = vector.shape_cast %37 : vector<1x1x64xf32> to vector<1x64xf32>
    %39 = arith.mulf %0, %0 : vector<32x64xf32>
    %cst_13 = arith.constant dense<0.000000e+00> : vector<32xf32>
    %40 = vector.multi_reduction <add>, %39, %cst_13 [1] : vector<32x64xf32> to vector<32xf32>
    %41 = vector.shape_cast %40 : vector<32xf32> to vector<32x1xf32>
    %cst_14 = arith.constant 6.400000e+01 : f32
    %42 = vector.broadcast %cst_14 : f32 to vector<32x1xf32>
    %43 = arith.divf %41, %42 : vector<32x1xf32>
    %cst_15 = arith.constant 9.99999997E-7 : f32
    %44 = vector.broadcast %cst_15 : f32 to vector<32x1xf32>
    %45 = arith.addf %43, %44 : vector<32x1xf32>
    %46 = math.rsqrt %45 : vector<32x1xf32>
    %47 = vector.broadcast %46 : vector<32x1xf32> to vector<32x64xf32>
    %48 = arith.mulf %0, %47 : vector<32x64xf32>
    %49 = vector.broadcast %38 : vector<1x64xf32> to vector<32x64xf32>
    %50 = arith.mulf %48, %49 : vector<32x64xf32>
    %c0_16 = arith.constant 0 : index
    %c0_17 = arith.constant 0 : index
    %c0_18 = arith.constant 0 : index
    %51 = vector.load %arg3[%c0_16, %c0_17, %c0_18] : memref<2x64x128xf32, #tpu.memory_space<vmem>>, vector<1x64x128xf32>
    %52 = vector.shape_cast %51 : vector<1x64x128xf32> to vector<64x128xf32>
    %cst_19 = arith.constant dense<0.000000e+00> : vector<32x128xf32>
    %53 = tpu.matmul %50, %52, %cst_19 {dimension_numbers = #tpu.dot_dimension_numbers<[1], [0], [0], [1], [0, 0, 1, 1], [], []>} : vector<32x64xf32>, vector<64x128xf32>, vector<32x128xf32> -> vector<32x128xf32>
    %54 = vector.extract_strided_slice %53 {offsets = [0, 64], sizes = [16, 32], strides = [1, 1]} : vector<32x128xf32> to vector<16x32xf32>
    %55 = tpu.transpose %54, [1, 0] : vector<16x32xf32> -> vector<32x16xf32>
    %56 = vector.extract_strided_slice %53 {offsets = [0, 0], sizes = [16, 16], strides = [1, 1]} : vector<32x128xf32> to vector<16x16xf32>
    %57 = vector.extract_strided_slice %53 {offsets = [0, 16], sizes = [16, 16], strides = [1, 1]} : vector<32x128xf32> to vector<16x16xf32>
    %58 = tpu.concatenate %56, %57 in 0 : vector<16x16xf32>, vector<16x16xf32> -> vector<32x16xf32>
    %59 = vector.extract_strided_slice %55 {offsets = [0, 0], sizes = [16, 16], strides = [1, 1]} : vector<32x16xf32> to vector<16x16xf32>
    %cst_20 = arith.constant dense<0.000000e+00> : vector<32x16xf32>
    %60 = tpu.matmul %58, %59, %cst_20 {dimension_numbers = #tpu.dot_dimension_numbers<[1], [0], [0], [1], [0, 0, 1, 1], [], []>} : vector<32x16xf32>, vector<16x16xf32>, vector<32x16xf32> -> vector<32x16xf32>
    %61 = vector.extract_strided_slice %53 {offsets = [0, 32], sizes = [16, 16], strides = [1, 1]} : vector<32x128xf32> to vector<16x16xf32>
    %62 = vector.extract_strided_slice %53 {offsets = [0, 48], sizes = [16, 16], strides = [1, 1]} : vector<32x128xf32> to vector<16x16xf32>
    %63 = tpu.concatenate %61, %62 in 0 : vector<16x16xf32>, vector<16x16xf32> -> vector<32x16xf32>
    %64 = vector.extract_strided_slice %55 {offsets = [16, 0], sizes = [16, 16], strides = [1, 1]} : vector<32x16xf32> to vector<16x16xf32>
    %cst_21 = arith.constant dense<0.000000e+00> : vector<32x16xf32>
    %65 = tpu.matmul %63, %64, %cst_21 {dimension_numbers = #tpu.dot_dimension_numbers<[1], [0], [0], [1], [0, 0, 1, 1], [], []>} : vector<32x16xf32>, vector<16x16xf32>, vector<32x16xf32> -> vector<32x16xf32>
    %66 = vector.extract_strided_slice %53 {offsets = [16, 64], sizes = [16, 32], strides = [1, 1]} : vector<32x128xf32> to vector<16x32xf32>
    %67 = tpu.transpose %66, [1, 0] : vector<16x32xf32> -> vector<32x16xf32>
    %68 = vector.extract_strided_slice %53 {offsets = [16, 0], sizes = [16, 16], strides = [1, 1]} : vector<32x128xf32> to vector<16x16xf32>
    %69 = vector.extract_strided_slice %53 {offsets = [16, 16], sizes = [16, 16], strides = [1, 1]} : vector<32x128xf32> to vector<16x16xf32>
    %70 = tpu.concatenate %68, %69 in 0 : vector<16x16xf32>, vector<16x16xf32> -> vector<32x16xf32>
    %71 = vector.extract_strided_slice %67 {offsets = [0, 0], sizes = [16, 16], strides = [1, 1]} : vector<32x16xf32> to vector<16x16xf32>
    %cst_22 = arith.constant dense<0.000000e+00> : vector<32x16xf32>
    %72 = tpu.matmul %70, %71, %cst_22 {dimension_numbers = #tpu.dot_dimension_numbers<[1], [0], [0], [1], [0, 0, 1, 1], [], []>} : vector<32x16xf32>, vector<16x16xf32>, vector<32x16xf32> -> vector<32x16xf32>
    %73 = vector.extract_strided_slice %53 {offsets = [16, 32], sizes = [16, 16], strides = [1, 1]} : vector<32x128xf32> to vector<16x16xf32>
    %74 = vector.extract_strided_slice %53 {offsets = [16, 48], sizes = [16, 16], strides = [1, 1]} : vector<32x128xf32> to vector<16x16xf32>
    %75 = tpu.concatenate %73, %74 in 0 : vector<16x16xf32>, vector<16x16xf32> -> vector<32x16xf32>
    %76 = vector.extract_strided_slice %67 {offsets = [16, 0], sizes = [16, 16], strides = [1, 1]} : vector<32x16xf32> to vector<16x16xf32>
    %cst_23 = arith.constant dense<0.000000e+00> : vector<32x16xf32>
    %77 = tpu.matmul %75, %76, %cst_23 {dimension_numbers = #tpu.dot_dimension_numbers<[1], [0], [0], [1], [0, 0, 1, 1], [], []>} : vector<32x16xf32>, vector<16x16xf32>, vector<32x16xf32> -> vector<32x16xf32>
    %78 = tpu.concatenate %60, %65, %72, %77 in 0 : vector<32x16xf32>, vector<32x16xf32>, vector<32x16xf32>, vector<32x16xf32> -> vector<128x16xf32>
    %79 = arith.addf %78, %36 : vector<128x16xf32>
    %cst_24 = arith.constant dense<0xFF800000> : vector<128xf32>
    %80 = vector.multi_reduction <maximumf>, %79, %cst_24 [1] : vector<128x16xf32> to vector<128xf32>
    %81 = vector.shape_cast %80 : vector<128xf32> to vector<128x1xf32>
    %82 = vector.broadcast %81 : vector<128x1xf32> to vector<128x16xf32>
    %83 = arith.subf %79, %82 : vector<128x16xf32>
    %84 = math.exp %83 : vector<128x16xf32>
    %cst_25 = arith.constant dense<0.000000e+00> : vector<128xf32>
    %85 = vector.multi_reduction <add>, %84, %cst_25 [1] : vector<128x16xf32> to vector<128xf32>
    %86 = vector.shape_cast %85 : vector<128xf32> to vector<128x1xf32>
    %87 = tpu.reciprocal %86 : vector<128x1xf32> -> vector<128x1xf32>
    %88 = vector.broadcast %87 : vector<128x1xf32> to vector<128x16xf32>
    %89 = arith.mulf %84, %88 : vector<128x16xf32>
    %90 = vector.extract_strided_slice %89 {offsets = [0, 0], sizes = [32, 16], strides = [1, 1]} : vector<128x16xf32> to vector<32x16xf32>
    %91 = vector.extract_strided_slice %53 {offsets = [0, 96], sizes = [16, 16], strides = [1, 1]} : vector<32x128xf32> to vector<16x16xf32>
    %cst_26 = arith.constant dense<0.000000e+00> : vector<32x16xf32>
    %92 = tpu.matmul %90, %91, %cst_26 {dimension_numbers = #tpu.dot_dimension_numbers<[1], [0], [0], [1], [0, 0, 1, 1], [], []>} : vector<32x16xf32>, vector<16x16xf32>, vector<32x16xf32> -> vector<32x16xf32>
    %93 = vector.extract_strided_slice %92 {offsets = [0, 0], sizes = [16, 16], strides = [1, 1]} : vector<32x16xf32> to vector<16x16xf32>
    %c0_27 = arith.constant 0 : index
    %c0_28 = arith.constant 0 : index
    %94 = vector.load %arg14[%c0_27, %c0_28] : memref<32x64xf32, #tpu.memory_space<vmem>>, vector<16x16xf32>
    tpu.vector_store %arg14[%c0_27, %c0_28], %93 {strides = array<i32>} : memref<32x64xf32, #tpu.memory_space<vmem>>, vector<16x16xf32>,
    %95 = vector.extract_strided_slice %92 {offsets = [16, 0], sizes = [16, 16], strides = [1, 1]} : vector<32x16xf32> to vector<16x16xf32>
    %c0_29 = arith.constant 0 : index
    %c16 = arith.constant 16 : index
    %96 = vector.load %arg14[%c0_29, %c16] : memref<32x64xf32, #tpu.memory_space<vmem>>, vector<16x16xf32>
    tpu.vector_store %arg14[%c0_29, %c16], %95 {strides = array<i32>} : memref<32x64xf32, #tpu.memory_space<vmem>>, vector<16x16xf32>,
    %97 = vector.extract_strided_slice %89 {offsets = [32, 0], sizes = [32, 16], strides = [1, 1]} : vector<128x16xf32> to vector<32x16xf32>
    %98 = vector.extract_strided_slice %53 {offsets = [0, 112], sizes = [16, 16], strides = [1, 1]} : vector<32x128xf32> to vector<16x16xf32>
    %cst_30 = arith.constant dense<0.000000e+00> : vector<32x16xf32>
    %99 = tpu.matmul %97, %98, %cst_30 {dimension_numbers = #tpu.dot_dimension_numbers<[1], [0], [0], [1], [0, 0, 1, 1], [], []>} : vector<32x16xf32>, vector<16x16xf32>, vector<32x16xf32> -> vector<32x16xf32>
    %100 = vector.extract_strided_slice %99 {offsets = [0, 0], sizes = [16, 16], strides = [1, 1]} : vector<32x16xf32> to vector<16x16xf32>
    %c0_31 = arith.constant 0 : index
    %c32 = arith.constant 32 : index
    %101 = vector.load %arg14[%c0_31, %c32] : memref<32x64xf32, #tpu.memory_space<vmem>>, vector<16x16xf32>
    tpu.vector_store %arg14[%c0_31, %c32], %100 {strides = array<i32>} : memref<32x64xf32, #tpu.memory_space<vmem>>, vector<16x16xf32>,
    %102 = vector.extract_strided_slice %99 {offsets = [16, 0], sizes = [16, 16], strides = [1, 1]} : vector<32x16xf32> to vector<16x16xf32>
    %c0_32 = arith.constant 0 : index
    %c48 = arith.constant 48 : index
    %103 = vector.load %arg14[%c0_32, %c48] : memref<32x64xf32, #tpu.memory_space<vmem>>, vector<16x16xf32>
    tpu.vector_store %arg14[%c0_32, %c48], %102 {strides = array<i32>} : memref<32x64xf32, #tpu.memory_space<vmem>>, vector<16x16xf32>,
    %104 = vector.extract_strided_slice %89 {offsets = [64, 0], sizes = [32, 16], strides = [1, 1]} : vector<128x16xf32> to vector<32x16xf32>
    %105 = vector.extract_strided_slice %53 {offsets = [16, 96], sizes = [16, 16], strides = [1, 1]} : vector<32x128xf32> to vector<16x16xf32>
    %cst_33 = arith.constant dense<0.000000e+00> : vector<32x16xf32>
    %106 = tpu.matmul %104, %105, %cst_33 {dimension_numbers = #tpu.dot_dimension_numbers<[1], [0], [0], [1], [0, 0, 1, 1], [], []>} : vector<32x16xf32>, vector<16x16xf32>, vector<32x16xf32> -> vector<32x16xf32>
    %107 = vector.extract_strided_slice %106 {offsets = [0, 0], sizes = [16, 16], strides = [1, 1]} : vector<32x16xf32> to vector<16x16xf32>
    %c16_34 = arith.constant 16 : index
    %c0_35 = arith.constant 0 : index
    %108 = vector.load %arg14[%c16_34, %c0_35] : memref<32x64xf32, #tpu.memory_space<vmem>>, vector<16x16xf32>
    tpu.vector_store %arg14[%c16_34, %c0_35], %107 {strides = array<i32>} : memref<32x64xf32, #tpu.memory_space<vmem>>, vector<16x16xf32>,
    %109 = vector.extract_strided_slice %106 {offsets = [16, 0], sizes = [16, 16], strides = [1, 1]} : vector<32x16xf32> to vector<16x16xf32>
    %c16_36 = arith.constant 16 : index
    %c16_37 = arith.constant 16 : index
    %110 = vector.load %arg14[%c16_36, %c16_37] : memref<32x64xf32, #tpu.memory_space<vmem>>, vector<16x16xf32>
    tpu.vector_store %arg14[%c16_36, %c16_37], %109 {strides = array<i32>} : memref<32x64xf32, #tpu.memory_space<vmem>>, vector<16x16xf32>,
    %111 = vector.extract_strided_slice %89 {offsets = [96, 0], sizes = [32, 16], strides = [1, 1]} : vector<128x16xf32> to vector<32x16xf32>
    %112 = vector.extract_strided_slice %53 {offsets = [16, 112], sizes = [16, 16], strides = [1, 1]} : vector<32x128xf32> to vector<16x16xf32>
    %cst_38 = arith.constant dense<0.000000e+00> : vector<32x16xf32>
    %113 = tpu.matmul %111, %112, %cst_38 {dimension_numbers = #tpu.dot_dimension_numbers<[1], [0], [0], [1], [0, 0, 1, 1], [], []>} : vector<32x16xf32>, vector<16x16xf32>, vector<32x16xf32> -> vector<32x16xf32>
    %114 = vector.extract_strided_slice %113 {offsets = [0, 0], sizes = [16, 16], strides = [1, 1]} : vector<32x16xf32> to vector<16x16xf32>
    %c16_39 = arith.constant 16 : index
    %c32_40 = arith.constant 32 : index
    %115 = vector.load %arg14[%c16_39, %c32_40] : memref<32x64xf32, #tpu.memory_space<vmem>>, vector<16x16xf32>
    tpu.vector_store %arg14[%c16_39, %c32_40], %114 {strides = array<i32>} : memref<32x64xf32, #tpu.memory_space<vmem>>, vector<16x16xf32>,
    %116 = vector.extract_strided_slice %113 {offsets = [16, 0], sizes = [16, 16], strides = [1, 1]} : vector<32x16xf32> to vector<16x16xf32>
    %c16_41 = arith.constant 16 : index
    %c48_42 = arith.constant 48 : index
    %117 = vector.load %arg14[%c16_41, %c48_42] : memref<32x64xf32, #tpu.memory_space<vmem>>, vector<16x16xf32>
    tpu.vector_store %arg14[%c16_41, %c48_42], %116 {strides = array<i32>} : memref<32x64xf32, #tpu.memory_space<vmem>>, vector<16x16xf32>,
    %c0_43 = arith.constant 0 : index
    %c0_44 = arith.constant 0 : index
    %118 = vector.load %arg14[%c0_43, %c0_44] : memref<32x64xf32, #tpu.memory_space<vmem>>, vector<32x64xf32>
    %c0_45 = arith.constant 0 : index
    %c0_46 = arith.constant 0 : index
    %c0_47 = arith.constant 0 : index
    %119 = vector.load %arg4[%c0_45, %c0_46, %c0_47] : memref<2x64x64xf32, #tpu.memory_space<vmem>>, vector<1x64x64xf32>
    %120 = vector.shape_cast %119 : vector<1x64x64xf32> to vector<64x64xf32>
    %cst_48 = arith.constant dense<0.000000e+00> : vector<32x64xf32>
    %121 = tpu.matmul %118, %120, %cst_48 {dimension_numbers = #tpu.dot_dimension_numbers<[1], [0], [0], [1], [0, 0, 1, 1], [], []>} : vector<32x64xf32>, vector<64x64xf32>, vector<32x64xf32> -> vector<32x64xf32>
    %122 = arith.addf %0, %121 : vector<32x64xf32>
    %c0_49 = arith.constant 0 : index
    %c0_50 = arith.constant 0 : index
    %c0_51 = arith.constant 0 : index
    %123 = vector.load %arg5[%c0_49, %c0_50, %c0_51] : memref<2x1x64xf32, #tpu.memory_space<vmem>>, vector<1x1x64xf32>
    %124 = vector.shape_cast %123 : vector<1x1x64xf32> to vector<1x64xf32>
    %125 = arith.mulf %122, %122 : vector<32x64xf32>
    %cst_52 = arith.constant dense<0.000000e+00> : vector<32xf32>
    %126 = vector.multi_reduction <add>, %125, %cst_52 [1] : vector<32x64xf32> to vector<32xf32>
    %127 = vector.shape_cast %126 : vector<32xf32> to vector<32x1xf32>
    %cst_53 = arith.constant 6.400000e+01 : f32
    %128 = vector.broadcast %cst_53 : f32 to vector<32x1xf32>
    %129 = arith.divf %127, %128 : vector<32x1xf32>
    %cst_54 = arith.constant 9.99999997E-7 : f32
    %130 = vector.broadcast %cst_54 : f32 to vector<32x1xf32>
    %131 = arith.addf %129, %130 : vector<32x1xf32>
    %132 = math.rsqrt %131 : vector<32x1xf32>
    %133 = vector.broadcast %132 : vector<32x1xf32> to vector<32x64xf32>
    %134 = arith.mulf %122, %133 : vector<32x64xf32>
    %135 = vector.broadcast %124 : vector<1x64xf32> to vector<32x64xf32>
    %136 = arith.mulf %134, %135 : vector<32x64xf32>
    %c0_55 = arith.constant 0 : index
    %c0_56 = arith.constant 0 : index
    %c0_57 = arith.constant 0 : index
    %137 = vector.load %arg6[%c0_55, %c0_56, %c0_57] : memref<2x64x384xf32, #tpu.memory_space<vmem>>, vector<1x64x384xf32>
    %138 = vector.shape_cast %137 : vector<1x64x384xf32> to vector<64x384xf32>
    %cst_58 = arith.constant dense<0.000000e+00> : vector<32x384xf32>
    %139 = tpu.matmul %136, %138, %cst_58 {dimension_numbers = #tpu.dot_dimension_numbers<[1], [0], [0], [1], [0, 0, 1, 1], [], []>} : vector<32x64xf32>, vector<64x384xf32>, vector<32x384xf32> -> vector<32x384xf32>
    %140 = vector.extract_strided_slice %139 {offsets = [0, 0], sizes = [32, 192], strides = [1, 1]} : vector<32x384xf32> to vector<32x192xf32>
    %141 = vector.extract_strided_slice %139 {offsets = [0, 192], sizes = [32, 192], strides = [1, 1]} : vector<32x384xf32> to vector<32x192xf32>
    %142 = arith.negf %140 : vector<32x192xf32>
    %143 = math.exp %142 : vector<32x192xf32>
    %cst_59 = arith.constant 1.000000e+00 : f32
    %144 = vector.broadcast %cst_59 : f32 to vector<32x192xf32>
    %145 = arith.addf %144, %143 : vector<32x192xf32>
    %146 = arith.divf %144, %145 : vector<32x192xf32>
    %147 = arith.mulf %140, %146 : vector<32x192xf32>
    %148 = arith.mulf %147, %141 : vector<32x192xf32>
    %c0_60 = arith.constant 0 : index
    %c0_61 = arith.constant 0 : index
    %c0_62 = arith.constant 0 : index
    %149 = vector.load %arg7[%c0_60, %c0_61, %c0_62] : memref<2x192x64xf32, #tpu.memory_space<vmem>>, vector<1x192x64xf32>
    %150 = vector.shape_cast %149 : vector<1x192x64xf32> to vector<192x64xf32>
    %cst_63 = arith.constant dense<0.000000e+00> : vector<32x64xf32>
    %151 = tpu.matmul %148, %150, %cst_63 {dimension_numbers = #tpu.dot_dimension_numbers<[1], [0], [0], [1], [0, 0, 1, 1], [], []>} : vector<32x192xf32>, vector<192x64xf32>, vector<32x64xf32> -> vector<32x64xf32>
    %152 = arith.addf %122, %151 : vector<32x64xf32>
    %c1_64 = arith.constant 1 : index
    %c0_65 = arith.constant 0 : index
    %c0_66 = arith.constant 0 : index
    %153 = vector.load %arg2[%c1_64, %c0_65, %c0_66] : memref<2x1x64xf32, #tpu.memory_space<vmem>>, vector<1x1x64xf32>
    %154 = vector.shape_cast %153 : vector<1x1x64xf32> to vector<1x64xf32>
    %155 = arith.mulf %152, %152 : vector<32x64xf32>
    %cst_67 = arith.constant dense<0.000000e+00> : vector<32xf32>
    %156 = vector.multi_reduction <add>, %155, %cst_67 [1] : vector<32x64xf32> to vector<32xf32>
    %157 = vector.shape_cast %156 : vector<32xf32> to vector<32x1xf32>
    %cst_68 = arith.constant 6.400000e+01 : f32
    %158 = vector.broadcast %cst_68 : f32 to vector<32x1xf32>
    %159 = arith.divf %157, %158 : vector<32x1xf32>
    %cst_69 = arith.constant 9.99999997E-7 : f32
    %160 = vector.broadcast %cst_69 : f32 to vector<32x1xf32>
    %161 = arith.addf %159, %160 : vector<32x1xf32>
    %162 = math.rsqrt %161 : vector<32x1xf32>
    %163 = vector.broadcast %162 : vector<32x1xf32> to vector<32x64xf32>
    %164 = arith.mulf %152, %163 : vector<32x64xf32>
    %165 = vector.broadcast %154 : vector<1x64xf32> to vector<32x64xf32>
    %166 = arith.mulf %164, %165 : vector<32x64xf32>
    %c1_70 = arith.constant 1 : index
    %c0_71 = arith.constant 0 : index
    %c0_72 = arith.constant 0 : index
    %167 = vector.load %arg3[%c1_70, %c0_71, %c0_72] : memref<2x64x128xf32, #tpu.memory_space<vmem>>, vector<1x64x128xf32>
    %168 = vector.shape_cast %167 : vector<1x64x128xf32> to vector<64x128xf32>
    %cst_73 = arith.constant dense<0.000000e+00> : vector<32x128xf32>
    %169 = tpu.matmul %166, %168, %cst_73 {dimension_numbers = #tpu.dot_dimension_numbers<[1], [0], [0], [1], [0, 0, 1, 1], [], []>} : vector<32x64xf32>, vector<64x128xf32>, vector<32x128xf32> -> vector<32x128xf32>
    %170 = vector.extract_strided_slice %169 {offsets = [0, 64], sizes = [16, 32], strides = [1, 1]} : vector<32x128xf32> to vector<16x32xf32>
    %171 = tpu.transpose %170, [1, 0] : vector<16x32xf32> -> vector<32x16xf32>
    %172 = vector.extract_strided_slice %169 {offsets = [0, 0], sizes = [16, 16], strides = [1, 1]} : vector<32x128xf32> to vector<16x16xf32>
    %173 = vector.extract_strided_slice %169 {offsets = [0, 16], sizes = [16, 16], strides = [1, 1]} : vector<32x128xf32> to vector<16x16xf32>
    %174 = tpu.concatenate %172, %173 in 0 : vector<16x16xf32>, vector<16x16xf32> -> vector<32x16xf32>
    %175 = vector.extract_strided_slice %171 {offsets = [0, 0], sizes = [16, 16], strides = [1, 1]} : vector<32x16xf32> to vector<16x16xf32>
    %cst_74 = arith.constant dense<0.000000e+00> : vector<32x16xf32>
    %176 = tpu.matmul %174, %175, %cst_74 {dimension_numbers = #tpu.dot_dimension_numbers<[1], [0], [0], [1], [0, 0, 1, 1], [], []>} : vector<32x16xf32>, vector<16x16xf32>, vector<32x16xf32> -> vector<32x16xf32>
    %177 = vector.extract_strided_slice %169 {offsets = [0, 32], sizes = [16, 16], strides = [1, 1]} : vector<32x128xf32> to vector<16x16xf32>
    %178 = vector.extract_strided_slice %169 {offsets = [0, 48], sizes = [16, 16], strides = [1, 1]} : vector<32x128xf32> to vector<16x16xf32>
    %179 = tpu.concatenate %177, %178 in 0 : vector<16x16xf32>, vector<16x16xf32> -> vector<32x16xf32>
    %180 = vector.extract_strided_slice %171 {offsets = [16, 0], sizes = [16, 16], strides = [1, 1]} : vector<32x16xf32> to vector<16x16xf32>
    %cst_75 = arith.constant dense<0.000000e+00> : vector<32x16xf32>
    %181 = tpu.matmul %179, %180, %cst_75 {dimension_numbers = #tpu.dot_dimension_numbers<[1], [0], [0], [1], [0, 0, 1, 1], [], []>} : vector<32x16xf32>, vector<16x16xf32>, vector<32x16xf32> -> vector<32x16xf32>
    %182 = vector.extract_strided_slice %169 {offsets = [16, 64], sizes = [16, 32], strides = [1, 1]} : vector<32x128xf32> to vector<16x32xf32>
    %183 = tpu.transpose %182, [1, 0] : vector<16x32xf32> -> vector<32x16xf32>
    %184 = vector.extract_strided_slice %169 {offsets = [16, 0], sizes = [16, 16], strides = [1, 1]} : vector<32x128xf32> to vector<16x16xf32>
    %185 = vector.extract_strided_slice %169 {offsets = [16, 16], sizes = [16, 16], strides = [1, 1]} : vector<32x128xf32> to vector<16x16xf32>
    %186 = tpu.concatenate %184, %185 in 0 : vector<16x16xf32>, vector<16x16xf32> -> vector<32x16xf32>
    %187 = vector.extract_strided_slice %183 {offsets = [0, 0], sizes = [16, 16], strides = [1, 1]} : vector<32x16xf32> to vector<16x16xf32>
    %cst_76 = arith.constant dense<0.000000e+00> : vector<32x16xf32>
    %188 = tpu.matmul %186, %187, %cst_76 {dimension_numbers = #tpu.dot_dimension_numbers<[1], [0], [0], [1], [0, 0, 1, 1], [], []>} : vector<32x16xf32>, vector<16x16xf32>, vector<32x16xf32> -> vector<32x16xf32>
    %189 = vector.extract_strided_slice %169 {offsets = [16, 32], sizes = [16, 16], strides = [1, 1]} : vector<32x128xf32> to vector<16x16xf32>
    %190 = vector.extract_strided_slice %169 {offsets = [16, 48], sizes = [16, 16], strides = [1, 1]} : vector<32x128xf32> to vector<16x16xf32>
    %191 = tpu.concatenate %189, %190 in 0 : vector<16x16xf32>, vector<16x16xf32> -> vector<32x16xf32>
    %192 = vector.extract_strided_slice %183 {offsets = [16, 0], sizes = [16, 16], strides = [1, 1]} : vector<32x16xf32> to vector<16x16xf32>
    %cst_77 = arith.constant dense<0.000000e+00> : vector<32x16xf32>
    %193 = tpu.matmul %191, %192, %cst_77 {dimension_numbers = #tpu.dot_dimension_numbers<[1], [0], [0], [1], [0, 0, 1, 1], [], []>} : vector<32x16xf32>, vector<16x16xf32>, vector<32x16xf32> -> vector<32x16xf32>
    %194 = tpu.concatenate %176, %181, %188, %193 in 0 : vector<32x16xf32>, vector<32x16xf32>, vector<32x16xf32>, vector<32x16xf32> -> vector<128x16xf32>
    %195 = arith.addf %194, %36 : vector<128x16xf32>
    %cst_78 = arith.constant dense<0xFF800000> : vector<128xf32>
    %196 = vector.multi_reduction <maximumf>, %195, %cst_78 [1] : vector<128x16xf32> to vector<128xf32>
    %197 = vector.shape_cast %196 : vector<128xf32> to vector<128x1xf32>
    %198 = vector.broadcast %197 : vector<128x1xf32> to vector<128x16xf32>
    %199 = arith.subf %195, %198 : vector<128x16xf32>
    %200 = math.exp %199 : vector<128x16xf32>
    %cst_79 = arith.constant dense<0.000000e+00> : vector<128xf32>
    %201 = vector.multi_reduction <add>, %200, %cst_79 [1] : vector<128x16xf32> to vector<128xf32>
    %202 = vector.shape_cast %201 : vector<128xf32> to vector<128x1xf32>
    %203 = tpu.reciprocal %202 : vector<128x1xf32> -> vector<128x1xf32>
    %204 = vector.broadcast %203 : vector<128x1xf32> to vector<128x16xf32>
    %205 = arith.mulf %200, %204 : vector<128x16xf32>
    %206 = vector.extract_strided_slice %205 {offsets = [0, 0], sizes = [32, 16], strides = [1, 1]} : vector<128x16xf32> to vector<32x16xf32>
    %207 = vector.extract_strided_slice %169 {offsets = [0, 96], sizes = [16, 16], strides = [1, 1]} : vector<32x128xf32> to vector<16x16xf32>
    %cst_80 = arith.constant dense<0.000000e+00> : vector<32x16xf32>
    %208 = tpu.matmul %206, %207, %cst_80 {dimension_numbers = #tpu.dot_dimension_numbers<[1], [0], [0], [1], [0, 0, 1, 1], [], []>} : vector<32x16xf32>, vector<16x16xf32>, vector<32x16xf32> -> vector<32x16xf32>
    %209 = vector.extract_strided_slice %208 {offsets = [0, 0], sizes = [16, 16], strides = [1, 1]} : vector<32x16xf32> to vector<16x16xf32>
    %c0_81 = arith.constant 0 : index
    %c0_82 = arith.constant 0 : index
    %210 = vector.load %arg14[%c0_81, %c0_82] : memref<32x64xf32, #tpu.memory_space<vmem>>, vector<16x16xf32>
    tpu.vector_store %arg14[%c0_81, %c0_82], %209 {strides = array<i32>} : memref<32x64xf32, #tpu.memory_space<vmem>>, vector<16x16xf32>,
    %211 = vector.extract_strided_slice %208 {offsets = [16, 0], sizes = [16, 16], strides = [1, 1]} : vector<32x16xf32> to vector<16x16xf32>
    %c0_83 = arith.constant 0 : index
    %c16_84 = arith.constant 16 : index
    %212 = vector.load %arg14[%c0_83, %c16_84] : memref<32x64xf32, #tpu.memory_space<vmem>>, vector<16x16xf32>
    tpu.vector_store %arg14[%c0_83, %c16_84], %211 {strides = array<i32>} : memref<32x64xf32, #tpu.memory_space<vmem>>, vector<16x16xf32>,
    %213 = vector.extract_strided_slice %205 {offsets = [32, 0], sizes = [32, 16], strides = [1, 1]} : vector<128x16xf32> to vector<32x16xf32>
    %214 = vector.extract_strided_slice %169 {offsets = [0, 112], sizes = [16, 16], strides = [1, 1]} : vector<32x128xf32> to vector<16x16xf32>
    %cst_85 = arith.constant dense<0.000000e+00> : vector<32x16xf32>
    %215 = tpu.matmul %213, %214, %cst_85 {dimension_numbers = #tpu.dot_dimension_numbers<[1], [0], [0], [1], [0, 0, 1, 1], [], []>} : vector<32x16xf32>, vector<16x16xf32>, vector<32x16xf32> -> vector<32x16xf32>
    %216 = vector.extract_strided_slice %215 {offsets = [0, 0], sizes = [16, 16], strides = [1, 1]} : vector<32x16xf32> to vector<16x16xf32>
    %c0_86 = arith.constant 0 : index
    %c32_87 = arith.constant 32 : index
    %217 = vector.load %arg14[%c0_86, %c32_87] : memref<32x64xf32, #tpu.memory_space<vmem>>, vector<16x16xf32>
    tpu.vector_store %arg14[%c0_86, %c32_87], %216 {strides = array<i32>} : memref<32x64xf32, #tpu.memory_space<vmem>>, vector<16x16xf32>,
    %218 = vector.extract_strided_slice %215 {offsets = [16, 0], sizes = [16, 16], strides = [1, 1]} : vector<32x16xf32> to vector<16x16xf32>
    %c0_88 = arith.constant 0 : index
    %c48_89 = arith.constant 48 : index
    %219 = vector.load %arg14[%c0_88, %c48_89] : memref<32x64xf32, #tpu.memory_space<vmem>>, vector<16x16xf32>
    tpu.vector_store %arg14[%c0_88, %c48_89], %218 {strides = array<i32>} : memref<32x64xf32, #tpu.memory_space<vmem>>, vector<16x16xf32>,
    %220 = vector.extract_strided_slice %205 {offsets = [64, 0], sizes = [32, 16], strides = [1, 1]} : vector<128x16xf32> to vector<32x16xf32>
    %221 = vector.extract_strided_slice %169 {offsets = [16, 96], sizes = [16, 16], strides = [1, 1]} : vector<32x128xf32> to vector<16x16xf32>
    %cst_90 = arith.constant dense<0.000000e+00> : vector<32x16xf32>
    %222 = tpu.matmul %220, %221, %cst_90 {dimension_numbers = #tpu.dot_dimension_numbers<[1], [0], [0], [1], [0, 0, 1, 1], [], []>} : vector<32x16xf32>, vector<16x16xf32>, vector<32x16xf32> -> vector<32x16xf32>
    %223 = vector.extract_strided_slice %222 {offsets = [0, 0], sizes = [16, 16], strides = [1, 1]} : vector<32x16xf32> to vector<16x16xf32>
    %c16_91 = arith.constant 16 : index
    %c0_92 = arith.constant 0 : index
    %224 = vector.load %arg14[%c16_91, %c0_92] : memref<32x64xf32, #tpu.memory_space<vmem>>, vector<16x16xf32>
    tpu.vector_store %arg14[%c16_91, %c0_92], %223 {strides = array<i32>} : memref<32x64xf32, #tpu.memory_space<vmem>>, vector<16x16xf32>,
    %225 = vector.extract_strided_slice %222 {offsets = [16, 0], sizes = [16, 16], strides = [1, 1]} : vector<32x16xf32> to vector<16x16xf32>
    %c16_93 = arith.constant 16 : index
    %c16_94 = arith.constant 16 : index
    %226 = vector.load %arg14[%c16_93, %c16_94] : memref<32x64xf32, #tpu.memory_space<vmem>>, vector<16x16xf32>
    tpu.vector_store %arg14[%c16_93, %c16_94], %225 {strides = array<i32>} : memref<32x64xf32, #tpu.memory_space<vmem>>, vector<16x16xf32>,
    %227 = vector.extract_strided_slice %205 {offsets = [96, 0], sizes = [32, 16], strides = [1, 1]} : vector<128x16xf32> to vector<32x16xf32>
    %228 = vector.extract_strided_slice %169 {offsets = [16, 112], sizes = [16, 16], strides = [1, 1]} : vector<32x128xf32> to vector<16x16xf32>
    %cst_95 = arith.constant dense<0.000000e+00> : vector<32x16xf32>
    %229 = tpu.matmul %227, %228, %cst_95 {dimension_numbers = #tpu.dot_dimension_numbers<[1], [0], [0], [1], [0, 0, 1, 1], [], []>} : vector<32x16xf32>, vector<16x16xf32>, vector<32x16xf32> -> vector<32x16xf32>
    %230 = vector.extract_strided_slice %229 {offsets = [0, 0], sizes = [16, 16], strides = [1, 1]} : vector<32x16xf32> to vector<16x16xf32>
    %c16_96 = arith.constant 16 : index
    %c32_97 = arith.constant 32 : index
    %231 = vector.load %arg14[%c16_96, %c32_97] : memref<32x64xf32, #tpu.memory_space<vmem>>, vector<16x16xf32>
    tpu.vector_store %arg14[%c16_96, %c32_97], %230 {strides = array<i32>} : memref<32x64xf32, #tpu.memory_space<vmem>>, vector<16x16xf32>,
    %232 = vector.extract_strided_slice %229 {offsets = [16, 0], sizes = [16, 16], strides = [1, 1]} : vector<32x16xf32> to vector<16x16xf32>
    %c16_98 = arith.constant 16 : index
    %c48_99 = arith.constant 48 : index
    %233 = vector.load %arg14[%c16_98, %c48_99] : memref<32x64xf32, #tpu.memory_space<vmem>>, vector<16x16xf32>
    tpu.vector_store %arg14[%c16_98, %c48_99], %232 {strides = array<i32>} : memref<32x64xf32, #tpu.memory_space<vmem>>, vector<16x16xf32>,
    %c0_100 = arith.constant 0 : index
    %c0_101 = arith.constant 0 : index
    %234 = vector.load %arg14[%c0_100, %c0_101] : memref<32x64xf32, #tpu.memory_space<vmem>>, vector<32x64xf32>
    %c1_102 = arith.constant 1 : index
    %c0_103 = arith.constant 0 : index
    %c0_104 = arith.constant 0 : index
    %235 = vector.load %arg4[%c1_102, %c0_103, %c0_104] : memref<2x64x64xf32, #tpu.memory_space<vmem>>, vector<1x64x64xf32>
    %236 = vector.shape_cast %235 : vector<1x64x64xf32> to vector<64x64xf32>
    %cst_105 = arith.constant dense<0.000000e+00> : vector<32x64xf32>
    %237 = tpu.matmul %234, %236, %cst_105 {dimension_numbers = #tpu.dot_dimension_numbers<[1], [0], [0], [1], [0, 0, 1, 1], [], []>} : vector<32x64xf32>, vector<64x64xf32>, vector<32x64xf32> -> vector<32x64xf32>
    %238 = arith.addf %152, %237 : vector<32x64xf32>
    %c1_106 = arith.constant 1 : index
    %c0_107 = arith.constant 0 : index
    %c0_108 = arith.constant 0 : index
    %239 = vector.load %arg5[%c1_106, %c0_107, %c0_108] : memref<2x1x64xf32, #tpu.memory_space<vmem>>, vector<1x1x64xf32>
    %240 = vector.shape_cast %239 : vector<1x1x64xf32> to vector<1x64xf32>
    %241 = arith.mulf %238, %238 : vector<32x64xf32>
    %cst_109 = arith.constant dense<0.000000e+00> : vector<32xf32>
    %242 = vector.multi_reduction <add>, %241, %cst_109 [1] : vector<32x64xf32> to vector<32xf32>
    %243 = vector.shape_cast %242 : vector<32xf32> to vector<32x1xf32>
    %cst_110 = arith.constant 6.400000e+01 : f32
    %244 = vector.broadcast %cst_110 : f32 to vector<32x1xf32>
    %245 = arith.divf %243, %244 : vector<32x1xf32>
    %cst_111 = arith.constant 9.99999997E-7 : f32
    %246 = vector.broadcast %cst_111 : f32 to vector<32x1xf32>
    %247 = arith.addf %245, %246 : vector<32x1xf32>
    %248 = math.rsqrt %247 : vector<32x1xf32>
    %249 = vector.broadcast %248 : vector<32x1xf32> to vector<32x64xf32>
    %250 = arith.mulf %238, %249 : vector<32x64xf32>
    %251 = vector.broadcast %240 : vector<1x64xf32> to vector<32x64xf32>
    %252 = arith.mulf %250, %251 : vector<32x64xf32>
    %c1_112 = arith.constant 1 : index
    %c0_113 = arith.constant 0 : index
    %c0_114 = arith.constant 0 : index
    %253 = vector.load %arg6[%c1_112, %c0_113, %c0_114] : memref<2x64x384xf32, #tpu.memory_space<vmem>>, vector<1x64x384xf32>
    %254 = vector.shape_cast %253 : vector<1x64x384xf32> to vector<64x384xf32>
    %cst_115 = arith.constant dense<0.000000e+00> : vector<32x384xf32>
    %255 = tpu.matmul %252, %254, %cst_115 {dimension_numbers = #tpu.dot_dimension_numbers<[1], [0], [0], [1], [0, 0, 1, 1], [], []>} : vector<32x64xf32>, vector<64x384xf32>, vector<32x384xf32> -> vector<32x384xf32>
    %256 = vector.extract_strided_slice %255 {offsets = [0, 0], sizes = [32, 192], strides = [1, 1]} : vector<32x384xf32> to vector<32x192xf32>
    %257 = vector.extract_strided_slice %255 {offsets = [0, 192], sizes = [32, 192], strides = [1, 1]} : vector<32x384xf32> to vector<32x192xf32>
    %258 = arith.negf %256 : vector<32x192xf32>
    %259 = math.exp %258 : vector<32x192xf32>
    %cst_116 = arith.constant 1.000000e+00 : f32
    %260 = vector.broadcast %cst_116 : f32 to vector<32x192xf32>
    %261 = arith.addf %260, %259 : vector<32x192xf32>
    %262 = arith.divf %260, %261 : vector<32x192xf32>
    %263 = arith.mulf %256, %262 : vector<32x192xf32>
    %264 = arith.mulf %263, %257 : vector<32x192xf32>
    %c1_117 = arith.constant 1 : index
    %c0_118 = arith.constant 0 : index
    %c0_119 = arith.constant 0 : index
    %265 = vector.load %arg7[%c1_117, %c0_118, %c0_119] : memref<2x192x64xf32, #tpu.memory_space<vmem>>, vector<1x192x64xf32>
    %266 = vector.shape_cast %265 : vector<1x192x64xf32> to vector<192x64xf32>
    %cst_120 = arith.constant dense<0.000000e+00> : vector<32x64xf32>
    %267 = tpu.matmul %264, %266, %cst_120 {dimension_numbers = #tpu.dot_dimension_numbers<[1], [0], [0], [1], [0, 0, 1, 1], [], []>} : vector<32x192xf32>, vector<192x64xf32>, vector<32x64xf32> -> vector<32x64xf32>
    %268 = arith.addf %238, %267 : vector<32x64xf32>
    %269 = vector.extract_strided_slice %268 {offsets = [1, 0], sizes = [1, 64], strides = [1, 1]} : vector<32x64xf32> to vector<1x64xf32>
    %270 = vector.extract_strided_slice %268 {offsets = [17, 0], sizes = [1, 64], strides = [1, 1]} : vector<32x64xf32> to vector<1x64xf32>
    %271 = tpu.concatenate %269, %270 in 0 : vector<1x64xf32>, vector<1x64xf32> -> vector<2x64xf32>
    %c0_121 = arith.constant 0 : index
    %c0_122 = arith.constant 0 : index
    %272 = vector.load %arg8[%c0_121, %c0_122] : memref<1x64xf32, #tpu.memory_space<vmem>>, vector<1x64xf32>
    %273 = arith.mulf %271, %271 : vector<2x64xf32>
    %cst_123 = arith.constant dense<0.000000e+00> : vector<2xf32>
    %274 = vector.multi_reduction <add>, %273, %cst_123 [1] : vector<2x64xf32> to vector<2xf32>
    %275 = vector.shape_cast %274 : vector<2xf32> to vector<2x1xf32>
    %cst_124 = arith.constant 6.400000e+01 : f32
    %276 = vector.broadcast %cst_124 : f32 to vector<2x1xf32>
    %277 = arith.divf %275, %276 : vector<2x1xf32>
    %cst_125 = arith.constant 9.99999997E-7 : f32
    %278 = vector.broadcast %cst_125 : f32 to vector<2x1xf32>
    %279 = arith.addf %277, %278 : vector<2x1xf32>
    %280 = math.rsqrt %279 : vector<2x1xf32>
    %281 = vector.broadcast %280 : vector<2x1xf32> to vector<2x64xf32>
    %282 = arith.mulf %271, %281 : vector<2x64xf32>
    %283 = vector.broadcast %272 : vector<1x64xf32> to vector<2x64xf32>
    %284 = arith.mulf %282, %283 : vector<2x64xf32>
    %c0_126 = arith.constant 0 : index
    %c0_127 = arith.constant 0 : index
    %285 = vector.load %arg9[%c0_126, %c0_127] : memref<64x64xf32, #tpu.memory_space<vmem>>, vector<64x64xf32>
    %cst_128 = arith.constant dense<0.000000e+00> : vector<2x64xf32>
    %286 = tpu.matmul %284, %285, %cst_128 {dimension_numbers = #tpu.dot_dimension_numbers<[1], [0], [0], [1], [0, 0, 1, 1], [], []>} : vector<2x64xf32>, vector<64x64xf32>, vector<2x64xf32> -> vector<2x64xf32>
    %c0_129 = arith.constant 0 : index
    %c0_130 = arith.constant 0 : index
    %287 = vector.load %arg10[%c0_129, %c0_130] : memref<1x64xf32, #tpu.memory_space<vmem>>, vector<1x64xf32>
    %288 = vector.broadcast %287 : vector<1x64xf32> to vector<2x64xf32>
    %289 = arith.addf %286, %288 : vector<2x64xf32>
    %cst_131 = arith.constant 5.000000e-01 : f32
    %290 = vector.broadcast %cst_131 : f32 to vector<2x64xf32>
    %291 = arith.mulf %290, %289 : vector<2x64xf32>
    %cst_132 = arith.constant 0.707106769 : f32
    %292 = vector.broadcast %cst_132 : f32 to vector<2x64xf32>
    %293 = arith.mulf %289, %292 : vector<2x64xf32>
    %294 = math.erf %293 : vector<2x64xf32>
    %cst_133 = arith.constant 1.000000e+00 : f32
    %295 = vector.broadcast %cst_133 : f32 to vector<2x64xf32>
    %296 = arith.addf %295, %294 : vector<2x64xf32>
    %297 = arith.mulf %291, %296 : vector<2x64xf32>
    %c0_134 = arith.constant 0 : index
    %c0_135 = arith.constant 0 : index
    %298 = vector.load %arg11[%c0_134, %c0_135] : memref<64x32xf32, #tpu.memory_space<vmem>>, vector<64x32xf32>
    %cst_136 = arith.constant dense<0.000000e+00> : vector<2x32xf32>
    %299 = tpu.matmul %297, %298, %cst_136 {dimension_numbers = #tpu.dot_dimension_numbers<[1], [0], [0], [1], [0, 0, 1, 1], [], []>} : vector<2x64xf32>, vector<64x32xf32>, vector<2x32xf32> -> vector<2x32xf32>
    %c0_137 = arith.constant 0 : index
    %c0_138 = arith.constant 0 : index
    %300 = vector.load %arg12[%c0_137, %c0_138] : memref<1x32xf32, #tpu.memory_space<vmem>>, vector<1x32xf32>
    %301 = vector.broadcast %300 : vector<1x32xf32> to vector<2x32xf32>
    %302 = arith.addf %299, %301 : vector<2x32xf32>
    %c0_139 = arith.constant 0 : index
    %c0_140 = arith.constant 0 : index
    %303 = vector.load %arg13[%c0_139, %c0_140] : memref<2x32xf32, #tpu.memory_space<vmem>>, vector<2x32xf32>
    tpu.vector_store %arg13[%c0_139, %c0_140], %302 {strides = array<i32>} : memref<2x32xf32, #tpu.memory_space<vmem>>, vector<2x32xf32>,
    return
  }
}

</mosaic_0001>

<bundles_post_ra>
// kernel: tpu_custom_call.1
= control target key start
LH: loop header
LB: loop body
LE: loop exit
PB: predicated region body
PF: predicated region fallthrough
CT: control target
= control target key end

     0   :  { %18 = vsyncpa [#allocation5], 0  ;;  %s6456_s0 = inlined_call_operand.vmem [shape: s32[2], index: 0, kind: input, shape index: {}]   ;;  %s6457_s1 = inlined_call_operand.vmem [shape: f32[32,64], index: 1, kind: input, shape index: {}]   ;;  %s6458_s2 = inlined_call_operand.vmem [shape: f32[2,1,64], index: 2, kind: input, shape index: {}]   ;;  %s6459_s3 = inlined_call_operand.vmem [shape: f32[2,64,128], index: 3, kind: input, shape index: {}]   ;;  %s6460_s4 = inlined_call_operand.vmem [shape: f32[2,64,64], index: 4, kind: input, shape index: {}]   ;;  %s6461_s5 = inlined_call_operand.vmem [shape: f32[2,1,64], index: 5, kind: input, shape index: {}]   ;;  %s6462_s6 = inlined_call_operand.vmem [shape: f32[2,64,384], index: 6, kind: input, shape index: {}]   ;;  %s6463_s7 = inlined_call_operand.vmem [shape: f32[2,192,64], index: 7, kind: input, shape index: {}]   ;;  %s6464_s8 = inlined_call_operand.vmem [shape: f32[1,64], index: 8, kind: input, shape index: {}]   ;;  %s6465_s9 = inlined_call_operand.vmem [shape: f32[64,64], index: 9, kind: input, shape index: {}]   ;;  %s6466_s10 = inlined_call_operand.vmem [shape: f32[1,64], index: 10, kind: input, shape index: {}]   ;;  %s6467_s11 = inlined_call_operand.vmem [shape: f32[64,32], index: 11, kind: input, shape index: {}]   ;;  %s6468_s12 = inlined_call_operand.vmem [shape: f32[1,32], index: 12, kind: input, shape index: {}]   ;;  %s6469_s13 = inlined_call_operand.hbm [shape: f32[2,32], index: 13, kind: output, shape index: {}]  }
   0x1   :  { %19 = vsyncpa [#allocation4], 0  ;;  %s26_s27 = sshll.u32 %s6456_s0, 4  ;;  %s27_s27 = int_to_ptr.vmem [resolvable:$true] %s26_s27 }
   0x2   :  { %s4970_s28 = scalar_lea.vmem %s27_s27, 16  ;;  %p4975_p1 = scmp.lt.s32.totalorder %s27_s27, %s27_s27 }
   0x3   :  { %p4971_p0 = scmp.ne.s32.totalorder %s27_s27, %s4970_s28  ;;  %p4976_p2 = scmp.lt.s32.totalorder %s4970_s28, %s4970_s28 }
   0x5   :  { %p4977_p3 = por %p4976_p2, %p4975_p1 }
   0x7   :  { %p4978_p4 = pnand %p4977_p3, %p4971_p0 }
   0x9   :  { %4981 = shalt.err (!%p4978_p4)
}
   0xa   :  { %s5006_s29 = smov [#allocation3]  }
   0xb   :  { %29 = dma.vmem_to_smem %s27_s27, 16, %s5006_s29, [#allocation5]  }
   0xc   :  { %5002 = dma.done.wait [#allocation5], 16  }
   0xd   :  { %5003 = vsyncadd [#allocation5], 4294967280 }
   0xe   :  { %57 = sfence }
   0xf   :  { %v58_v0 = vld [vmem:[%s6457_s1] sm:$0xff]  ;;  %vm98_vm0 = vcmask 523264   ;;  %v60_v1 = vld [vmem:[%s6457_s1 + $0x10] sm:$0xff]  ;;  %v5099_v2 = vld [vmem:[%s6457_s1 + $0x8] sm:$0xff]  ;;  %vm253_vm1 = vcmask 130048   ;;  %s5007_s20 = smov 112  }
  0x10   :  { %v94_v3 = vmul.f32 %v58_v0, %v58_v0  ;;  %v96_v4 = vmul.f32 %v60_v1, %v60_v1  ;;  %v95_v5 = vmul.f32 %v5099_v2, %v5099_v2  ;;  %v61_v6 = vld [vmem:[%s6457_s1 + $0x18] sm:$0xff]  ;;  %v144_v13 = vld [vmem:[%s6459_s3 + $0x30] sm:$0xff]  ;;  %v143_v14 = vld [vmem:[%s6459_s3 + $0x28] sm:$0xff]  ;;  %s5008_s21 = smov 64   ;;  %s5009_s22 = smov 48   ;;  %vm981_vm10 = vcmask 261248  }
  0x11   :  { %v97_v7 = vmul.f32 %v61_v6, %v61_v6  ;;  %v145_v12 = vld [vmem:[%s6459_s3 + $0x38] sm:$0xff]  ;;  %v142_v15 = vld [vmem:[%s6459_s3 + $0x20] sm:$0xff]  ;;  %v140_v17 = vld [vmem:[%s6459_s3 + $0x10] sm:$0xff]  ;;  %s5010_s23 = smov 96   ;;  %s69_s24 = sld [smem:[#allocation3]]  ;;  %vm1095_vm11 = vcmask 392448  }
  0x12   :  { %v99_v8 = vsel %vm98_vm0, %v94_v3, 0.0  ;;  %v105_v9 = vsel %vm98_vm0, %v96_v4, 0.0  ;;  %v102_v10 = vsel %vm98_vm0, %v95_v5, 0.0  ;;  %4397 = vmatprep.subr.mxu0 %v145_v12  ;;  %v141_v16 = vld [vmem:[%s6459_s3 + $0x18] sm:$0xff]  ;;  %v139_v18 = vld [vmem:[%s6459_s3 + $0x8] sm:$0xff]  ;;  %v138_v19 = vld [vmem:[%s6459_s3] sm:$0xff]  ;;  %v62_v5 = vlaneseq }
  0x13   :  { %100 = vadd.xlane.f32.xlu0 %v99_v8  ;;  %106 = vadd.xlane.f32.xlu1 %v105_v9  ;;  %v108_v11 = vsel %vm98_vm0, %v97_v7, 0.0  ;;  %v4000_v33 = vld [vmem:[%s6458_s2] ss:$0 sm:$0xff]  ;;  %s3999_s26 = sld [smem:[#allocation3 + $0x1]]  ;;  %s5012_s28 = smov 32   ;;  %vm1106_vm12 = vcmask 523648  }
  0x14   :  { %4398 = vmatpush3.msra.mxu0 %v145_v12  ;;  %v66_v9 = vand.u32 127, %v62_v5  ;;  %s5013_s29 = smov 16   ;;  %vm3782_vm13 = vcmask 1040384   ;;  %vm3786_vm14 = vcmask 517120   ;;  %vm5015_vm15 = vmmov 0  }
  0x15   :  { %4399 = vmatprep.subr.mxu0 %v144_v13 }
  0x16   :  { %4400 = vmatpush3.msra.mxu0 %v144_v13  ;;  %vm67_vm4 = vcmp.lt.s32.totalorder %v66_v9, 12 }
  0x17   :  { %103 = vadd.xlane.f32.xlu0 %v102_v10  ;;  %109 = vadd.xlane.f32.xlu1 %v108_v11  ;;  %s70_s25 = sadd.s32 1, %s69_s24  ;;  %v5011_v10 = vmov -inf  }
  0x18   :  { %4401 = vmatprep.subr.mxu0 %v143_v14  ;;  %v71_v8 = vstv %s70_s25  ;;  %v68_v11 = vsel %vm67_vm4, 0.0, %v5011_v10  ;;  %s5016_s25 = smov [#allocation6]  }
  0x19   :  { %4402 = vmatpush3.msra.mxu0 %v143_v14  ;;  %s83_s27 = sadd.s32 1, %s3999_s26  ;;  %s3990_s26 = sshll.u32 %s5016_s25, 4  ;;  %s3991_s26 = int_to_ptr.vmem [resolvable:$true] %s3990_s26 }
  0x1a   :  { %4403 = vmatprep.subr.mxu0 %v142_v15  ;;  %p4987_p6 = scmp.lt.s32.totalorder %s3991_s26, %s3991_s26 }
  0x1b   :  { %4404 = vmatpush3.msra.mxu0 %v142_v15 }
  0x1c   :  { %4405 = vmatprep.subr.mxu0 %v141_v16 }
  0x1d   :  { %4406 = vmatpush3.msra.mxu0 %v141_v16 }
  0x1e   :  { %4407 = vmatprep.subr.mxu0 %v140_v17 }
  0x1f   :  { %4408 = vmatpush3.msra.mxu0 %v140_v17 }
  0x20   :  { %4409 = vmatprep.subr.mxu0 %v139_v18 }
  0x21   :  { %4410 = vmatpush3.msra.mxu0 %v139_v18 }
  0x22   :  { %4411 = vmatprep.subr.mxu0 %v138_v19 }
  0x23   :  { %4412 = vmatpush3.msra.mxu0 %v138_v19 }
  0x9c   :  { %v101_v20 = vpop.xlane.xlu0 %100  ;;  %v107_v21 = vpop.xlane.xlu1 %106 }
  0x9d   :  { %v112_v22 = vmul.f32 0.015625, %v101_v20  ;;  %v114_v23 = vmul.f32 0.015625, %v107_v21 }
  0x9f   :  { %v116_v24 = vadd.f32 1e-06, %v112_v22  ;;  %v118_v25 = vadd.f32 1e-06, %v114_v23 }
  0xa0   :  { %v104_v26 = vpop.xlane.xlu0 %103  ;;  %v110_v27 = vpop.xlane.xlu1 %109 }
  0xa1   :  { %4738 = vrsqrt.f32 %v116_v24  ;;  %v113_v28 = vmul.f32 0.015625, %v104_v26  ;;  %v115_v29 = vmul.f32 0.015625, %v110_v27 }
  0xa2   :  { %4740 = vrsqrt.f32 %v118_v25 }
  0xa3   :  { %v117_v30 = vadd.f32 1e-06, %v113_v28  ;;  %v119_v31 = vadd.f32 1e-06, %v115_v29  ;;  %v84_v28 = vstv %s83_s27 }
  0xa5   :  { %4742 = vrsqrt.f32 %v117_v30 }
  0xa6   :  { %4744 = vrsqrt.f32 %v119_v31 }
  0xae   :  { %v4739_v32 = vpop.eup %4738 }
  0xaf   :  { %v4741_v34 = vpop.eup %4740  ;;  %v124_v35 = vmul.f32 %v4739_v32, %v58_v0 }
  0xb0   :  { %v126_v36 = vmul.f32 %v4741_v34, %v60_v1 }
  0xb1   :  { %v134_v37 = vmul.f32 %v4000_v33, %v124_v35 }
  0xb2   :  { %v4743_v38 = vpop.eup %4742  ;;  %v136_v41 = vmul.f32 %v4000_v33, %v126_v36 }
  0xb3   :  { %v4745_v39 = vpop.eup %4744  ;;  %4413 = vmatprep.mubr.msk.f32.mxu0 %vm98_vm0, %v134_v37  ;;  %v125_v40 = vmul.f32 %v4743_v38, %v5099_v2 }
  0xb4   :  { %v127_v42 = vmul.f32 %v4745_v39, %v61_v6  ;;  %v63_v6 = vshrl.u32 %v62_v5, 7 }
  0xb5   :  { %v135_v43 = vmul.f32 %v4000_v33, %v125_v40 }
  0xb6   :  { %v137_v44 = vmul.f32 %v4000_v33, %v127_v42  ;;  %v64_v7 = vadd.s32 8, %v63_v6  ;;  %vm72_vm6 = vcmp.lt.s32.totalorder %v63_v6, %v71_v8  ;;  %vm85_vm9 = vcmp.lt.s32.totalorder %v63_v6, %v84_v28 }
  0xb7   :  { %4414 = vmatmul.mubr.msk.f32.vlgmr.msra.gmra.mxu0 %vm98_vm0, %v135_v43  ;;  %v78_v13 = vsel %vm72_vm6, 0.0, %v5011_v10  ;;  %v89_v30 = vsel %vm85_vm9, 0.0, %v5011_v10 }
  0xb8   :  { %4416 = vmatprep.mubr.msk.f32.mxu0 %vm98_vm0, %v136_v41  ;;  %vm73_vm2 = vcmp.lt.s32.totalorder %v64_v7, %v71_v8  ;;  %vm75_vm3 = vcmp.ge.s32.totalorder %v64_v7, 12  ;;  %v5225_v15 = vadd.f32 %v78_v13, %v68_v11  ;;  %vm86_vm7 = vcmp.lt.s32.totalorder %v64_v7, %v84_v28 }
  0xb9   :  { %vm77_vm5 = vmor %vm73_vm2, %vm75_vm3  ;;  %v5250_v33 = vadd.f32 %v89_v30, %v68_v11 }
  0xba   :  { %v79_v12 = vsel %vm77_vm5, 0.0, %v5011_v10  ;;  %vm88_vm8 = vmor %vm86_vm7, %vm75_vm3 }
  0xbb   :  { %4417 = vmatmul.mubr.msk.f32.gmra.mxu0 %vm98_vm0, %v137_v44  ;;  %v5223_v14 = vadd.f32 %v79_v12, %v68_v11  ;;  %v90_v29 = vsel %vm88_vm8, 0.0, %v5011_v10 }
  0xbc   :  { %v5248_v31 = vadd.f32 %v90_v29, %v68_v11 }
 0x177   :  { %v5142_v45 = vpop.f32.mrf.mxu0 }
 0x178   :  { %247 = vrot.lane.b32.xlu1 %v5142_v45, %s5007_s20 }
 0x179   :  { %v5146_v46 = vpop.f32.mrf.mxu0 }
 0x17a   :  { %245 = vrot.lane.b32.xlu0 %v5146_v46, %s5007_s20  ;;  %4423 = vmatprep.mubr.msk.f32.mxu1 %vm253_vm1, %v5146_v46 }
 0x17b   :  { %v5152_v47 = vpop.f32.mrf.mxu0 }
 0x17d   :  { %v5154_v48 = vpop.f32.mrf.mxu0 }
 0x17e   :  { %251 = vrot.lane.b32.xlu0 %v5142_v45, %s5008_s21  ;;  %462 = vrot.lane.b32.xlu1 %v5154_v48, %s5007_s20 }
 0x17f   :  { %4443 = vmatprep.mubr.msk.f32.mxu0 %vm253_vm1, %v5154_v48 }
 0x182   :  { %361 = vrot.lane.b32.xlu0 %v5142_v45, %s5009_s22  ;;  %464 = vrot.lane.b32.xlu1 %v5152_v47, %s5007_s20 }
 0x186   :  { %351 = vrot.lane.b32.xlu0 %v5146_v46, %s5010_s23  ;;  %249 = vrot.lane.b32.xlu1 %v5146_v46, %s5008_s21 }
 0x18a   :  { %359 = vrot.lane.b32.xlu1 %v5146_v46, %s5009_s22 }
 0x18e   :  { %353 = vrot.lane.b32.xlu1 %v5142_v45, %s5010_s23 }
 0x1ea   :  { %v248_v49 = vpop.permute.xlu1 %247 }
 0x1eb   :  { %357 = vrot.lane.b32.xlu1 %v248_v49, %s5010_s23 }
 0x1ec   :  { %v246_v50 = vpop.permute.xlu0 %245 }
 0x1ed   :  { %355 = vrot.lane.b32.xlu0 %v246_v50, %s5010_s23 }
 0x1ef   :  { %577 = vrot.lane.b32.xlu1 %v5152_v47, %s5009_s22 }
 0x1f0   :  { %v252_v51 = vpop.permute.xlu0 %251  ;;  %v463_v52 = vpop.permute.xlu1 %462 }
 0x1f1   :  { %4419 = vmatprep.subr.msk.mxu1 %vm253_vm1, %v252_v51  ;;  %468 = vrot.lane.b32.xlu0 %v5152_v47, %s5008_s21 }
 0x1f2   :  { %4420 = vmatpush3.xpose.msk.msra.mxu1 %vm253_vm1, %v252_v51 }
 0x1f3   :  { %575 = vrot.lane.b32.xlu1 %v5154_v48, %s5009_s22 }
 0x1f4   :  { %v465_v53 = vpop.permute.xlu1 %464  ;;  %v362_v55 = vpop.permute.xlu0 %361 }
 0x1f5   :  { %466 = vrot.lane.b32.xlu0 %v5154_v48, %s5008_s21 }
 0x1f7   :  { %569 = vrot.lane.b32.xlu1 %v5152_v47, %s5010_s23 }
 0x1f8   :  { %v250_v54 = vpop.permute.xlu1 %249  ;;  %v352_v57 = vpop.permute.xlu0 %351 }
 0x1f9   :  { %567 = vrot.lane.b32.xlu0 %v5154_v48, %s5010_s23  ;;  %4421 = vmatprep.subr.msk.mxu1 %vm253_vm1, %v250_v54 }
 0x1fa   :  { %4422 = vmatpush3.xpose.msk.msra.mxu1 %vm253_vm1, %v250_v54 }
 0x1fb   :  { %4429 = vmatprep.subr.msk.mxu1 %vm253_vm1, %v362_v55  ;;  %573 = vrot.lane.b32.xlu1 %v465_v53, %s5010_s23 }
 0x1fc   :  { %v360_v56 = vpop.permute.xlu1 %359 }
 0x1fd   :  { %4424 = vmatmul.mubr.msk.f32.vlgmr.msra.gmra.mxu1 %vm253_vm1, %v5142_v45  ;;  %571 = vrot.lane.b32.xlu0 %v463_v52, %s5010_s23 }
 0x1fe   :  { %4426 = vmatprep.mubr.msk.f32.mxu1 %vm253_vm1, %v246_v50  ;;  %4430 = vmatpush3.xpose.msk.msra.mxu1 %vm253_vm1, %v362_v55 }
 0x1ff   :  { %4431 = vmatprep.subr.msk.mxu1 %vm253_vm1, %v360_v56 }
 0x200   :  { %v354_v58 = vpop.permute.xlu1 %353 }
 0x201   :  { %4427 = vmatmul.mubr.msk.f32.gmra.mxu1 %vm253_vm1, %v248_v49 }
 0x202   :  { %4432 = vmatpush3.xpose.msk.msra.mxu1 %vm253_vm1, %v360_v56  ;;  %4433 = vmatprep.mubr.msk.f32.mxu1 %vm253_vm1, %v352_v57 }
 0x205   :  { %4434 = vmatmul.mubr.msk.f32.vlgmr.msra.gmra.mxu1 %vm253_vm1, %v354_v58 }
 0x25d   :  { %v358_v59 = vpop.permute.xlu1 %357 }
 0x25f   :  { %v356_v60 = vpop.permute.xlu0 %355 }
 0x260   :  { %4436 = vmatprep.mubr.msk.f32.mxu1 %vm253_vm1, %v356_v60 }
 0x261   :  { %4437 = vmatmul.mubr.msk.f32.gmra.mxu1 %vm253_vm1, %v358_v59  ;;  %v578_v61 = vpop.permute.xlu1 %577 }
 0x262   :  { %4449 = vmatprep.subr.msk.mxu1 %vm253_vm1, %v578_v61 }
 0x263   :  { %v469_v62 = vpop.permute.xlu0 %468  ;;  %4450 = vmatpush3.xpose.msk.msra.mxu1 %vm253_vm1, %v578_v61 }
 0x264   :  { %4439 = vmatprep.subr.msk.mxu0 %vm253_vm1, %v469_v62 }
 0x265   :  { %4440 = vmatpush3.xpose.msk.msra.mxu0 %vm253_vm1, %v469_v62  ;;  %v576_v63 = vpop.permute.xlu1 %575 }
 0x266   :  { %4451 = vmatprep.subr.msk.mxu1 %vm253_vm1, %v576_v63 }
 0x267   :  { %v467_v0 = vpop.permute.xlu0 %466  ;;  %4452 = vmatpush3.xpose.msk.msra.mxu1 %vm253_vm1, %v576_v63 }
 0x268   :  { %4441 = vmatprep.subr.msk.mxu0 %vm253_vm1, %v467_v0 }
 0x269   :  { %4442 = vmatpush3.xpose.msk.msra.mxu0 %vm253_vm1, %v467_v0  ;;  %v570_v1 = vpop.permute.xlu1 %569 }
 0x26b   :  { %v568_v2 = vpop.permute.xlu0 %567 }
 0x26c   :  { %4444 = vmatmul.mubr.msk.f32.vlgmr.msra.gmra.mxu0 %vm253_vm1, %v5152_v47  ;;  %4453 = vmatprep.mubr.msk.f32.mxu1 %vm253_vm1, %v568_v2 }
 0x26d   :  { %4446 = vmatprep.mubr.msk.f32.mxu0 %vm253_vm1, %v463_v52  ;;  %4454 = vmatmul.mubr.msk.f32.vlgmr.msra.gmra.mxu1 %vm253_vm1, %v570_v1  ;;  %v574_v3 = vpop.permute.xlu1 %573 }
 0x26f   :  { %v572_v4 = vpop.permute.xlu0 %571 }
 0x270   :  { %4447 = vmatmul.mubr.msk.f32.gmra.mxu0 %vm253_vm1, %v465_v53  ;;  %4456 = vmatprep.mubr.msk.f32.mxu1 %vm253_vm1, %v572_v4 }
 0x271   :  { %4457 = vmatmul.mubr.msk.f32.gmra.mxu1 %vm253_vm1, %v574_v3 }
 0x2bd   :  { %v4425_v16 = vpop.f32.mrf.mxu1 }
 0x2be   :  { %v5228_v17 = vadd.f32 %v4425_v16, %v5223_v14 }
 0x2bf   :  { %v332_v18 = vpop.f32.mrf.mxu1 }
 0x2c0   :  { %v5231_v19 = vadd.f32 %v332_v18, %v5225_v15  ;;  %v695_v20 = vsel %vm253_vm1, %v5228_v17, -inf }
 0x2c1   :  { %696 = vmax.xlane.f32.xlu1 %v695_v20  ;;  %v4428_v21 = vpop.f32.mrf.mxu1 }
 0x2c2   :  { %v5236_v22 = vadd.f32 %v4428_v21, %v5223_v14  ;;  %v692_v23 = vsel %vm253_vm1, %v5231_v19, -inf }
 0x2c3   :  { %693 = vmax.xlane.f32.xlu0 %v692_v23  ;;  %v342_v24 = vpop.f32.mrf.mxu1 }
 0x2c4   :  { %v5241_v25 = vadd.f32 %v342_v24, %v5225_v15  ;;  %v701_v26 = vsel %vm253_vm1, %v5236_v22, -inf }
 0x2c5   :  { %702 = vmax.xlane.f32.xlu1 %v701_v26  ;;  %v4435_v32 = vpop.f32.mrf.mxu1 }
 0x2c6   :  { %v698_v27 = vsel %vm253_vm1, %v5241_v25, -inf  ;;  %v5261_v42 = vadd.f32 %v4435_v32, %v5223_v14 }
 0x2c7   :  { %699 = vmax.xlane.f32.xlu0 %v698_v27  ;;  %v441_v36 = vpop.f32.mrf.mxu1 }
 0x2c8   :  { %v5274_v51 = vadd.f32 %v441_v36, %v5225_v15  ;;  %v707_v52 = vsel %vm253_vm1, %v5261_v42, -inf }
 0x2ca   :  { %v704_v56 = vsel %vm253_vm1, %v5274_v51, -inf }
 0x321   :  { %v4438_v40 = vpop.f32.mrf.mxu1 }
 0x322   :  { %v5269_v49 = vadd.f32 %v4438_v40, %v5223_v14 }
 0x323   :  { %v451_v57 = vpop.f32.mrf.mxu1 }
 0x324   :  { %v713_v54 = vsel %vm253_vm1, %v5269_v49, -inf  ;;  %v5286_v58 = vadd.f32 %v451_v57, %v5225_v15 }
 0x326   :  { %v710_v60 = vsel %vm253_vm1, %v5286_v58, -inf }
 0x32c   :  { %v4445_v34 = vpop.f32.mrf.mxu0 }
 0x32d   :  { %v5253_v35 = vadd.f32 %v4445_v34, %v5248_v31  ;;  %v4455_v61 = vpop.f32.mrf.mxu1 }
 0x32e   :  { %v548_v37 = vpop.f32.mrf.mxu0  ;;  %v5301_v0 = vadd.f32 %v4455_v61, %v5248_v31 }
 0x32f   :  { %v5256_v38 = vadd.f32 %v548_v37, %v5250_v33  ;;  %v719_v39 = vsel %vm253_vm1, %v5253_v35, -inf  ;;  %v657_v62 = vpop.f32.mrf.mxu1 }
 0x330   :  { %720 = vmax.xlane.f32.xlu1 %v719_v39  ;;  %v4448_v41 = vpop.f32.mrf.mxu0  ;;  %v5304_v1 = vadd.f32 %v657_v62, %v5250_v33  ;;  %v731_v4 = vsel %vm253_vm1, %v5301_v0, -inf }
 0x331   :  { %v5264_v43 = vadd.f32 %v4448_v41, %v5248_v31  ;;  %v716_v44 = vsel %vm253_vm1, %v5256_v38, -inf  ;;  %v4458_v63 = vpop.f32.mrf.mxu1 }
 0x332   :  { %717 = vmax.xlane.f32.xlu0 %v716_v44  ;;  %v558_v53 = vpop.f32.mrf.mxu0  ;;  %v5307_v3 = vadd.f32 %v4458_v63, %v5248_v31 }
 0x333   :  { %v725_v50 = vsel %vm253_vm1, %v5264_v43, -inf  ;;  %v5281_v55 = vadd.f32 %v558_v53, %v5250_v33  ;;  %v667_v2 = vpop.f32.mrf.mxu1 }
 0x334   :  { %726 = vmax.xlane.f32.xlu1 %v725_v50  ;;  %v737_v5 = vsel %vm253_vm1, %v5307_v3, -inf }
 0x335   :  { %v722_v59 = vsel %vm253_vm1, %v5281_v55, -inf }
 0x336   :  { %708 = vmax.xlane.f32.xlu0 %v707_v52 }
 0x338   :  { %714 = vmax.xlane.f32.xlu1 %v713_v54 }
 0x33a   :  { %705 = vmax.xlane.f32.xlu0 %v704_v56 }
 0x33e   :  { %723 = vmax.xlane.f32.xlu0 %v722_v59 }
 0x342   :  { %711 = vmax.xlane.f32.xlu0 %v710_v60 }
 0x349   :  { %868 = vrot.lane.b32.xlu1 %v5146_v46, %s5012_s28 }
 0x34a   :  { %v697_v7 = vpop.xlane.xlu1 %696 }
 0x34b   :  { %v741_v9 = vsub.f32 %v5228_v17, %v697_v7 }
 0x34c   :  { %v694_v8 = vpop.xlane.xlu0 %693 }
 0x34d   :  { %986 = vrot.lane.b32.xlu1 %v5142_v45, %s5013_s29  ;;  %v740_v11 = vsub.f32 %v5231_v19, %v694_v8  ;;  %v758_v13 = vmul.f32 1.442695, %v741_v9 }
 0x34e   :  { %v703_v10 = vpop.xlane.xlu1 %702 }
 0x34f   :  { %v743_v16 = vsub.f32 %v5236_v22, %v703_v10  ;;  %v756_v18 = vmul.f32 1.442695, %v740_v11  ;;  %4746 = vpow2.f32 %v758_v13 }
 0x350   :  { %v700_v12 = vpop.xlane.xlu0 %699 }
 0x351   :  { %984 = vrot.lane.b32.xlu1 %v5146_v46, %s5013_s29  ;;  %v5312_v46 = vadd.f32 %v667_v2, %v5250_v33  ;;  %v742_v20 = vsub.f32 %v5241_v25, %v700_v12  ;;  %v762_v21 = vmul.f32 1.442695, %v743_v16  ;;  %4748 = vpow2.f32 %v756_v18 }
 0x353   :  { %v734_v6 = vsel %vm253_vm1, %v5312_v46, -inf  ;;  %v760_v23 = vmul.f32 1.442695, %v742_v20  ;;  %4750 = vpow2.f32 %v762_v21 }
 0x355   :  { %4752 = vpow2.f32 %v760_v23 }
 0x358   :  { %870 = vrot.lane.b32.xlu0 %v5142_v45, %s5012_s28  ;;  %v728_v45 = vsel %vm253_vm1, %v5304_v1, -inf }
 0x35c   :  { %v5328_v24 = vpop.eup %4746 }
 0x35d   :  { %v791_v17 = vsel %vm253_vm1, %v5328_v24, 0.0 }
 0x35e   :  { %v5330_v26 = vpop.eup %4748 }
 0x35f   :  { %v788_v22 = vsel %vm253_vm1, %v5330_v26, 0.0 }
 0x360   :  { %v5334_v19 = vpop.eup %4750 }
 0x361   :  { %v797_v27 = vsel %vm253_vm1, %v5334_v19, 0.0 }
 0x362   :  { %v5338_v25 = vpop.eup %4752 }
 0x363   :  { %v794_v28 = vsel %vm253_vm1, %v5338_v25, 0.0 }
 0x375   :  { %732 = vmax.xlane.f32.xlu1 %v731_v4 }
 0x377   :  { %729 = vmax.xlane.f32.xlu0 %v728_v45 }
 0x379   :  { %738 = vmax.xlane.f32.xlu1 %v737_v5 }
 0x37b   :  { %735 = vmax.xlane.f32.xlu0 %v734_v6 }
 0x38a   :  { %1109 = vrot.lane.b32.xlu1 %v5154_v48, %s5012_s28 }
 0x391   :  { %1111 = vrot.lane.b32.xlu0 %v5152_v47, %s5012_s28 }
 0x3ae   :  { %792 = vadd.xlane.f32.xlu1 %v791_v17 }
 0x3b0   :  { %789 = vadd.xlane.f32.xlu0 %v788_v22 }
 0x3b2   :  { %798 = vadd.xlane.f32.xlu1 %v797_v27 }
 0x3b4   :  { %795 = vadd.xlane.f32.xlu0 %v794_v28 }
 0x3b9   :  { %v721_v29 = vpop.xlane.xlu1 %720 }
 0x3ba   :  { %v749_v30 = vsub.f32 %v5253_v35, %v721_v29 }
 0x3bb   :  { %v718_v32 = vpop.xlane.xlu0 %717 }
 0x3bc   :  { %v774_v34 = vmul.f32 1.442695, %v749_v30  ;;  %v748_v36 = vsub.f32 %v5256_v38, %v718_v32 }
 0x3bd   :  { %v727_v37 = vpop.xlane.xlu1 %726 }
 0x3be   :  { %4754 = vpow2.f32 %v774_v34  ;;  %v772_v39 = vmul.f32 1.442695, %v748_v36  ;;  %v751_v40 = vsub.f32 %v5264_v43, %v727_v37 }
 0x3bf   :  { %v709_v41 = vpop.xlane.xlu0 %708 }
 0x3c0   :  { %4756 = vpow2.f32 %v772_v39  ;;  %v745_v44 = vsub.f32 %v5261_v42, %v709_v41  ;;  %v778_v52 = vmul.f32 1.442695, %v751_v40 }
 0x3c1   :  { %v715_v50 = vpop.xlane.xlu1 %714 }
 0x3c2   :  { %v766_v53 = vmul.f32 1.442695, %v745_v44  ;;  %v747_v54 = vsub.f32 %v5269_v49, %v715_v50 }
 0x3c3   :  { %v706_v56 = vpop.xlane.xlu0 %705 }
 0x3c4   :  { %4758 = vpow2.f32 %v766_v53  ;;  %v744_v35 = vsub.f32 %v5274_v51, %v706_v56  ;;  %v770_v38 = vmul.f32 1.442695, %v747_v54 }
 0x3c5   :  { %v869_v57 = vpop.permute.xlu1 %868  ;;  %4760 = vpow2.f32 %v778_v52 }
 0x3c6   :  { %v764_v59 = vmul.f32 1.442695, %v744_v35 }
 0x3c7   :  { %v724_v60 = vpop.xlane.xlu0 %723 }
 0x3c8   :  { %4762 = vpow2.f32 %v764_v59  ;;  %v750_v43 = vsub.f32 %v5281_v55, %v724_v60 }
 0x3c9   :  { %v987_v61 = vpop.permute.xlu1 %986  ;;  %4764 = vpow2.f32 %v770_v38 }
 0x3ca   :  { %v776_v42 = vmul.f32 1.442695, %v750_v43  ;;  %4469 = vmatprep.subr.mxu1 %v987_v61 }
 0x3cb   :  { %v5351_v62 = vpop.eup %4754  ;;  %4470 = vmatpush3.msra.mxu1 %v987_v61  ;;  %v712_v49 = vpop.xlane.xlu0 %711 }
 0x3cc   :  { %4766 = vpow2.f32 %v776_v42  ;;  %v746_v63 = vsub.f32 %v5286_v58, %v712_v49  ;;  %v815_v51 = vsel %vm253_vm1, %v5351_v62, 0.0 }
 0x3cd   :  { %v5356_v2 = vpop.eup %4756  ;;  %816 = vadd.xlane.f32.xlu1 %v815_v51  ;;  %v985_v4 = vpop.permute.xlu1 %984 }
 0x3ce   :  { %v768_v45 = vmul.f32 1.442695, %v746_v63  ;;  %4471 = vmatprep.subr.mxu1 %v985_v4  ;;  %v812_v55 = vsel %vm253_vm1, %v5356_v2, 0.0 }
 0x3cf   :  { %4472 = vmatpush3.msra.mxu1 %v985_v4  ;;  %813 = vadd.xlane.f32.xlu0 %v812_v55  ;;  %v871_v5 = vpop.permute.xlu0 %870 }
 0x3d0   :  { %4768 = vpow2.f32 %v768_v45  ;;  %4459 = vmatprep.subr.mxu0 %v871_v5 }
 0x3d1   :  { %v5360_v6 = vpop.eup %4758  ;;  %4460 = vmatpush3.msra.mxu0 %v871_v5 }
 0x3d2   :  { %4461 = vmatprep.subr.mxu0 %v869_v57  ;;  %v803_v58 = vsel %vm253_vm1, %v5360_v6, 0.0  ;;  %v5364_v7 = vpop.eup %4760 }
 0x3d3   :  { %804 = vadd.xlane.f32.xlu1 %v803_v58  ;;  %4462 = vmatpush3.msra.mxu0 %v869_v57  ;;  %v821_v9 = vsel %vm253_vm1, %v5364_v7, 0.0 }
 0x3d5   :  { %v5366_v8 = vpop.eup %4762 }
 0x3d6   :  { %v800_v10 = vsel %vm253_vm1, %v5366_v8, 0.0  ;;  %v5372_v11 = vpop.eup %4764 }
 0x3d7   :  { %822 = vadd.xlane.f32.xlu1 %v821_v9  ;;  %801 = vadd.xlane.f32.xlu0 %v800_v10  ;;  %v809_v13 = vsel %vm253_vm1, %v5372_v11, 0.0 }
 0x3d9   :  { %v5374_v12 = vpop.eup %4766 }
 0x3da   :  { %v818_v16 = vsel %vm253_vm1, %v5374_v12, 0.0 }
 0x3db   :  { %810 = vadd.xlane.f32.xlu1 %v809_v13  ;;  %819 = vadd.xlane.f32.xlu0 %v818_v16 }
 0x3dd   :  { %v5380_v18 = vpop.eup %4768 }
 0x3de   :  { %v806_v20 = vsel %vm253_vm1, %v5380_v18, 0.0 }
 0x3df   :  { %807 = vadd.xlane.f32.xlu0 %v806_v20 }
 0x3fe   :  { %v733_v21 = vpop.xlane.xlu1 %732 }
 0x3ff   :  { %v753_v23 = vsub.f32 %v5301_v0, %v733_v21 }
 0x400   :  { %v730_v17 = vpop.xlane.xlu0 %729 }
 0x401   :  { %v782_v22 = vmul.f32 1.442695, %v753_v23  ;;  %v752_v27 = vsub.f32 %v5304_v1, %v730_v17 }
 0x402   :  { %v739_v28 = vpop.xlane.xlu1 %738 }
 0x403   :  { %4770 = vpow2.f32 %v782_v22  ;;  %v780_v29 = vmul.f32 1.442695, %v752_v27  ;;  %v755_v30 = vsub.f32 %v5307_v3, %v739_v28 }
 0x404   :  { %v736_v32 = vpop.xlane.xlu0 %735 }
 0x405   :  { %4772 = vpow2.f32 %v780_v29  ;;  %v786_v34 = vmul.f32 1.442695, %v755_v30  ;;  %v754_v36 = vsub.f32 %v5312_v46, %v736_v32 }
 0x406   :  { %v1110_v52 = vpop.permute.xlu1 %1109 }
 0x407   :  { %4774 = vpow2.f32 %v786_v34  ;;  %v784_v37 = vmul.f32 1.442695, %v754_v36 }
 0x408   :  { %v1112_v39 = vpop.permute.xlu0 %1111 }
 0x409   :  { %4776 = vpow2.f32 %v784_v37  ;;  %4479 = vmatprep.subr.mxu0 %v1112_v39 }
 0x410   :  { %v5388_v0 = vpop.eup %4770 }
 0x411   :  { %v827_v1 = vsel %vm253_vm1, %v5388_v0, 0.0 }
 0x412   :  { %v5392_v40 = vpop.eup %4772  ;;  %828 = vadd.xlane.f32.xlu1 %v827_v1 }
 0x413   :  { %v824_v3 = vsel %vm253_vm1, %v5392_v40, 0.0 }
 0x414   :  { %v5396_v41 = vpop.eup %4774  ;;  %825 = vadd.xlane.f32.xlu0 %v824_v3  ;;  %v1358_v3 = vld [vmem:[%s6460_s4 + $0x38] sm:$0xff] }
 0x415   :  { %v833_v46 = vsel %vm253_vm1, %v5396_v41, 0.0 }
 0x416   :  { %v5400_v44 = vpop.eup %4776  ;;  %834 = vadd.xlane.f32.xlu1 %v833_v46 }
 0x417   :  { %v830_v50 = vsel %vm253_vm1, %v5400_v44, 0.0 }
 0x418   :  { %831 = vadd.xlane.f32.xlu0 %v830_v50 }
 0x427   :  { %1224 = vrot.lane.b32.xlu1 %v5154_v48, %s5013_s29 }
 0x42e   :  { %1226 = vrot.lane.b32.xlu0 %v5152_v47, %s5013_s29 }
 0x437   :  { %v793_v53 = vpop.xlane.xlu1 %792 }
 0x438   :  { %4778 = vrcp.f32 %v793_v53  ;;  %v1354_v53 = vld [vmem:[%s6460_s4 + $0x18] sm:$0xff] }
 0x439   :  { %v790_v54 = vpop.xlane.xlu0 %789 }
 0x43a   :  { %4780 = vrcp.f32 %v790_v54  ;;  %v1353_v54 = vld [vmem:[%s6460_s4 + $0x10] sm:$0xff] }
 0x43b   :  { %v799_v56 = vpop.xlane.xlu1 %798 }
 0x43c   :  { %4782 = vrcp.f32 %v799_v56 }
 0x43d   :  { %v796_v35 = vpop.xlane.xlu0 %795 }
 0x43e   :  { %4784 = vrcp.f32 %v796_v35  ;;  %v1352_v35 = vld [vmem:[%s6460_s4 + $0x8] sm:$0xff] }
 0x445   :  { %v4779_v57 = vpop.eup %4778 }
 0x446   :  { %v853_v60 = vmul.f32 %v4779_v57, %v5328_v24 }
 0x447   :  { %v4781_v38 = vpop.eup %4780 }
 0x448   :  { %v852_v59 = vmul.f32 %v4781_v38, %v5330_v26  ;;  %v1351_v38 = vld [vmem:[%s6460_s4] sm:$0xff] }
 0x449   :  { %v4783_v43 = vpop.eup %4782 }
 0x44a   :  { %4463 = vmatprep.mubr.msk.f32.mxu0 %vm253_vm1, %v852_v59  ;;  %v855_v61 = vmul.f32 %v4783_v43, %v5334_v19 }
 0x44b   :  { %v4785_v48 = vpop.eup %4784  ;;  %4464 = vmatmul.mubr.msk.f32.vlgmr.msra.gmra.mxu0 %vm253_vm1, %v853_v60 }
 0x44c   :  { %4480 = vmatpush3.msra.mxu0 %v1112_v39  ;;  %v854_v47 = vmul.f32 %v4785_v48, %v5338_v25 }
 0x44d   :  { %4481 = vmatprep.subr.mxu0 %v1110_v52 }
 0x44e   :  { %4482 = vmatpush3.msra.mxu0 %v1110_v52  ;;  %4466 = vmatprep.mubr.msk.f32.mxu0 %vm253_vm1, %v854_v47  ;;  %v1355_v52 = vld [vmem:[%s6460_s4 + $0x20] sm:$0xff] }
 0x44f   :  { %4467 = vmatmul.mubr.msk.f32.gmra.mxu0 %vm253_vm1, %v855_v61  ;;  %4499 = vmatprep.subr.mxu0 %v1358_v3 }
 0x456   :  { %v817_v26 = vpop.xlane.xlu1 %816 }
 0x457   :  { %4786 = vrcp.f32 %v817_v26 }
 0x458   :  { %v814_v24 = vpop.xlane.xlu0 %813 }
 0x459   :  { %4788 = vrcp.f32 %v814_v24 }
 0x45c   :  { %v805_v42 = vpop.xlane.xlu1 %804 }
 0x45d   :  { %4790 = vrcp.f32 %v805_v42 }
 0x460   :  { %v823_v49 = vpop.xlane.xlu1 %822  ;;  %v802_v63 = vpop.xlane.xlu0 %801 }
 0x461   :  { %4792 = vrcp.f32 %v802_v63 }
 0x462   :  { %4794 = vrcp.f32 %v823_v49 }
 0x464   :  { %v820_v51 = vpop.xlane.xlu0 %819  ;;  %v4787_v4 = vpop.eup %4786 }
 0x465   :  { %v811_v25 = vpop.xlane.xlu1 %810  ;;  %4796 = vrcp.f32 %v820_v51  ;;  %v861_v55 = vmul.f32 %v4787_v4, %v5351_v62 }
 0x466   :  { %v4789_v45 = vpop.eup %4788  ;;  %4798 = vrcp.f32 %v811_v25 }
 0x467   :  { %v860_v19 = vmul.f32 %v4789_v45, %v5356_v2 }
 0x468   :  { %v808_v5 = vpop.xlane.xlu0 %807 }
 0x469   :  { %4800 = vrcp.f32 %v808_v5  ;;  %4483 = vmatprep.mubr.msk.f32.mxu0 %vm253_vm1, %v860_v19 }
 0x46a   :  { %4484 = vmatmul.mubr.msk.f32.vlgmr.msra.gmra.mxu0 %vm253_vm1, %v861_v55  ;;  %v4791_v58 = vpop.eup %4790 }
 0x46b   :  { %v857_v13 = vmul.f32 %v4791_v58, %v5360_v6  ;;  %4500 = vmatpush3.msra.mxu0 %v1358_v3  ;;  %v1514_v3 = vld [vmem:[%s6462_s6 + $0x58] sm:$0xff] }
 0x46e   :  { %v4793_v9 = vpop.eup %4792 }
 0x46f   :  { %v856_v10 = vmul.f32 %v4793_v9, %v5366_v8  ;;  %v4795_v16 = vpop.eup %4794 }
 0x470   :  { %v863_v21 = vmul.f32 %v4795_v16, %v5364_v7 }
 0x471   :  { %4473 = vmatprep.mubr.msk.f32.mxu1 %vm253_vm1, %v856_v10 }
 0x472   :  { %v4797_v20 = vpop.eup %4796  ;;  %4474 = vmatmul.mubr.msk.f32.vlgmr.msra.gmra.mxu1 %vm253_vm1, %v857_v13 }
 0x473   :  { %v862_v62 = vmul.f32 %v4797_v20, %v5374_v12  ;;  %v4799_v2 = vpop.eup %4798 }
 0x474   :  { %v859_v6 = vmul.f32 %v4799_v2, %v5372_v11  ;;  %v4966_v2 = vld [vmem:[%s6457_s1 + $0x8] sm:$0xff] }
 0x475   :  { %4486 = vmatprep.mubr.msk.f32.mxu0 %vm253_vm1, %v862_v62 }
 0x476   :  { %v4801_v23 = vpop.eup %4800  ;;  %4487 = vmatmul.mubr.msk.f32.gmra.mxu0 %vm253_vm1, %v863_v21 }
 0x477   :  { %v858_v8 = vmul.f32 %v4801_v23, %v5380_v18 }
 0x479   :  { %4476 = vmatprep.mubr.msk.f32.mxu1 %vm253_vm1, %v858_v8  ;;  %v4967_v8 = vld [vmem:[%s6457_s1] sm:$0xff] }
 0x47a   :  { %4477 = vmatmul.mubr.msk.f32.gmra.mxu1 %vm253_vm1, %v859_v6 }
 0x49b   :  { %v829_v17 = vpop.xlane.xlu1 %828 }
 0x49c   :  { %4802 = vrcp.f32 %v829_v17 }
 0x49d   :  { %v826_v22 = vpop.xlane.xlu0 %825 }
 0x49e   :  { %4804 = vrcp.f32 %v826_v22 }
 0x49f   :  { %v835_v12 = vpop.xlane.xlu1 %834 }
 0x4a0   :  { %4806 = vrcp.f32 %v835_v12 }
 0x4a1   :  { %v832_v7 = vpop.xlane.xlu0 %831 }
 0x4a2   :  { %4808 = vrcp.f32 %v832_v7 }
 0x4a3   :  { %v1225_v28 = vpop.permute.xlu1 %1224 }
 0x4a5   :  { %v1227_v27 = vpop.permute.xlu0 %1226 }
 0x4a6   :  { %4489 = vmatprep.subr.mxu1 %v1227_v27 }
 0x4a7   :  { %4490 = vmatpush3.msra.mxu1 %v1227_v27  ;;  %v1525_v27 = vld [vmem:[%s6462_s6 + $0xb0] sm:$0xff] }
 0x4a8   :  { %4491 = vmatprep.subr.mxu1 %v1225_v28 }
 0x4a9   :  { %4492 = vmatpush3.msra.mxu1 %v1225_v28  ;;  %v4803_v18 = vpop.eup %4802  ;;  %v1524_v28 = vld [vmem:[%s6462_s6 + $0xa8] sm:$0xff] }
 0x4aa   :  { %v865_v30 = vmul.f32 %v4803_v18, %v5388_v0  ;;  %1555 = vmatprep.subr.mxu1 %v1525_v27  ;;  %v1526_v18 = vld [vmem:[%s6462_s6 + $0xb8] sm:$0xff] }
 0x4ab   :  { %v4805_v11 = vpop.eup %4804 }
 0x4ac   :  { %v864_v29 = vmul.f32 %v4805_v11, %v5392_v40  ;;  %v1522_v11 = vld [vmem:[%s6462_s6 + $0x98] sm:$0xff] }
 0x4ad   :  { %v4807_v32 = vpop.eup %4806 }
 0x4ae   :  { %4493 = vmatprep.mubr.msk.f32.mxu1 %vm253_vm1, %v864_v29  ;;  %v867_v37 = vmul.f32 %v4807_v32, %v5396_v41  ;;  %v1357_v41 = vld [vmem:[%s6460_s4 + $0x30] sm:$0xff]  ;;  %v1519_v32 = vld [vmem:[%s6462_s6 + $0x80] sm:$0xff] }
 0x4af   :  { %v4809_v34 = vpop.eup %4808  ;;  %4494 = vmatmul.mubr.msk.f32.vlgmr.msra.gmra.mxu1 %vm253_vm1, %v865_v30  ;;  %4501 = vmatprep.subr.mxu0 %v1357_v41  ;;  %v1521_v29 = vld [vmem:[%s6462_s6 + $0x90] sm:$0xff]  ;;  %v1523_v30 = vld [vmem:[%s6462_s6 + $0xa0] sm:$0xff] }
 0x4b0   :  { %v866_v36 = vmul.f32 %v4809_v34, %v5400_v44  ;;  %v1356_v44 = vld [vmem:[%s6460_s4 + $0x28] sm:$0xff]  ;;  %4502 = vmatpush3.msra.mxu0 %v1357_v41  ;;  %1556 = vmatpush1.msra.mxu1 %v1524_v28  ;;  %v1518_v34 = vld [vmem:[%s6462_s6 + $0x78] sm:$0xff] }
 0x4b1   :  { %4503 = vmatprep.subr.mxu0 %v1356_v44  ;;  %1557 = vmatprep.subr.mxu1 %v1522_v11  ;;  %v1510_v41 = vld [vmem:[%s6462_s6 + $0x38] sm:$0xff]  ;;  %v1827_v11 = vld [vmem:[%s6463_s7 + $0x70] sm:$0xff] }
 0x4b2   :  { %4496 = vmatprep.mubr.msk.f32.mxu1 %vm253_vm1, %v866_v36  ;;  %4504 = vmatpush3.msra.mxu0 %v1356_v44  ;;  %v1520_v36 = vld [vmem:[%s6462_s6 + $0x88] sm:$0xff]  ;;  %v1511_v44 = vld [vmem:[%s6462_s6 + $0x40] sm:$0xff] }
 0x4b3   :  { %4497 = vmatmul.mubr.msk.f32.gmra.mxu1 %vm253_vm1, %v867_v37  ;;  %4505 = vmatprep.subr.mxu0 %v1355_v52  ;;  %v1516_v37 = vld [vmem:[%s6462_s6 + $0x68] sm:$0xff] }
 0x4b4   :  { %4506 = vmatpush3.msra.mxu0 %v1355_v52  ;;  %1558 = vmatpush1.msra.mxu1 %v1521_v29  ;;  %v1506_v52 = vld [vmem:[%s6462_s6 + $0x18] sm:$0xff]  ;;  %v1826_v29 = vld [vmem:[%s6463_s7 + $0x68] sm:$0xff] }
 0x4b5   :  { %4507 = vmatprep.subr.mxu0 %v1354_v53  ;;  %1559 = vmatprep.subr.mxu1 %v1519_v32  ;;  %v1824_v32 = vld [vmem:[%s6463_s7 + $0x58] sm:$0xff] }
 0x4b6   :  { %4508 = vmatpush3.msra.mxu0 %v1354_v53  ;;  %1560 = vmatpush1.msra.mxu1 %v1518_v34  ;;  %v1508_v53 = vld [vmem:[%s6462_s6 + $0x28] sm:$0xff]  ;;  %v1823_v34 = vld [vmem:[%s6463_s7 + $0x50] sm:$0xff] }
 0x4b7   :  { %4509 = vmatprep.subr.mxu0 %v1353_v54  ;;  %1561 = vmatprep.subr.mxu1 %v1516_v37  ;;  %v1821_v37 = vld [vmem:[%s6463_s7 + $0x40] sm:$0xff] }
 0x4b8   :  { %4510 = vmatpush3.msra.mxu0 %v1353_v54  ;;  %v1504_v54 = vld [vmem:[%s6462_s6 + $0x8] sm:$0xff] }
 0x4b9   :  { %4511 = vmatprep.subr.mxu0 %v1352_v35 }
 0x4ba   :  { %4512 = vmatpush3.msra.mxu0 %v1352_v35  ;;  %v1505_v35 = vld [vmem:[%s6462_s6 + $0x10] sm:$0xff] }
 0x4bb   :  { %4513 = vmatprep.subr.mxu0 %v1351_v38 }
 0x4bc   :  { %4514 = vmatpush3.msra.mxu0 %v1351_v38 }
 0x4bd   :  { %4521 = vmatprep.subr.mxu0 %v1526_v18 }
 0x50b   :  { %v4465_v39 = vpop.f32.mrf.mxu0 }
 0x50c   :  { %972 = vst.msk [vmem:[#allocation2 + $0x8] sm:$0xff] %vm253_vm1, %v4465_v39  ;;  %v1515_v39 = vld [vmem:[%s6462_s6 + $0x60] sm:$0xff] }
 0x50d   :  { %v952_v1 = vpop.f32.mrf.mxu0  ;;  %1562 = vmatpush1.msra.mxu1 %v1515_v39  ;;  %v1820_v39 = vld [vmem:[%s6463_s7 + $0x38] sm:$0xff] }
 0x50e   :  { %971 = vst.msk [vmem:[#allocation2] sm:$0xff] %vm253_vm1, %v952_v1  ;;  %v1517_v1 = vld [vmem:[%s6462_s6 + $0x70] sm:$0xff] }
 0x50f   :  { %v4468_v0 = vpop.f32.mrf.mxu0 }
 0x510   :  { %977 = vrot.lane.b32.xlu1 %v4468_v0, %s5013_s29  ;;  %v1513_v0 = vld [vmem:[%s6462_s6 + $0x50] sm:$0xff] }
 0x511   :  { %v962_v40 = vpop.f32.mrf.mxu0  ;;  %1563 = vmatprep.subr.mxu1 %v1513_v0  ;;  %v1818_v0 = vld [vmem:[%s6463_s7 + $0x28] sm:$0xff] }
 0x512   :  { %975 = vrot.lane.b32.xlu0 %v962_v40, %s5013_s29  ;;  %v1512_v40 = vld [vmem:[%s6462_s6 + $0x48] sm:$0xff] }
 0x513   :  { %1564 = vmatpush1.msra.mxu1 %v1512_v40  ;;  %v1817_v40 = vld [vmem:[%s6463_s7 + $0x20] sm:$0xff] }
 0x514   :  { %1565 = vmatprep.subr.mxu1 %v1510_v41  ;;  %v1815_v41 = vld [vmem:[%s6463_s7 + $0x10] sm:$0xff] }
 0x52a   :  { %v4485_v46 = vpop.f32.mrf.mxu0 }
 0x52b   :  { %1213 = vst.msk [vmem:[#allocation2 + $0x18] sm:$0xff] %vm253_vm1, %v4485_v46  ;;  %v1509_v46 = vld [vmem:[%s6462_s6 + $0x30] sm:$0xff] }
 0x52c   :  { %v1193_v50 = vpop.f32.mrf.mxu0  ;;  %1566 = vmatpush1.msra.mxu1 %v1509_v46  ;;  %v1814_v46 = vld [vmem:[%s6463_s7 + $0x8] sm:$0xff] }
 0x52d   :  { %1212 = vst.msk [vmem:[#allocation2 + $0x10] sm:$0xff] %vm253_vm1, %v1193_v50  ;;  %v1507_v50 = vld [vmem:[%s6462_s6 + $0x20] sm:$0xff] }
 0x52e   :  { %1567 = vmatprep.subr.mxu1 %v1507_v50  ;;  %v1836_v50 = vld [vmem:[%s6463_s7 + $0xb8] sm:$0xff] }
 0x52f   :  { %1568 = vmatpush1.msra.mxu1 %v1506_v52  ;;  %v1835_v52 = vld [vmem:[%s6463_s7 + $0xb0] sm:$0xff] }
 0x530   :  { %1569 = vmatprep.subr.mxu1 %v1504_v54  ;;  %v1833_v54 = vld [vmem:[%s6463_s7 + $0xa0] sm:$0xff] }
 0x532   :  { %v4475_v56 = vpop.f32.mrf.mxu1 }
 0x533   :  { %1091 = vrot.lane.b32.xlu1 %v4475_v56, %s5012_s28  ;;  %v1503_v56 = vld [vmem:[%s6462_s6] sm:$0xff] }
 0x534   :  { %v1068_v57 = vpop.f32.mrf.mxu1  ;;  %1570 = vmatpush1.msra.mxu1 %v1503_v56  ;;  %v1832_v56 = vld [vmem:[%s6463_s7 + $0x98] sm:$0xff] }
 0x535   :  { %1089 = vrot.lane.b32.xlu0 %v1068_v57, %s5012_s28  ;;  %v5014_v57 = vmov 0.0  }
 0x536   :  { %v4488_v60 = vpop.f32.mrf.mxu0  ;;  %1603 = vmatprep.mubr.f32.mxu1 %v5014_v57  ;;  %1849 = vmatprep.subr.mxu1 %v5014_v57 }
 0x538   :  { %v1203_v48 = vpop.f32.mrf.mxu0 }
 0x53a   :  { %v4478_v59 = vpop.f32.mrf.mxu1 }
 0x53b   :  { %1102 = vrot.lane.b32.xlu1 %v4478_v59, %s5009_s22 }
 0x53c   :  { %v1078_v43 = vpop.f32.mrf.mxu1 }
 0x53d   :  { %1100 = vrot.lane.b32.xlu0 %v1078_v43, %s5009_s22 }
 0x53f   :  { %1218 = vrot.lane.b32.xlu1 %v4488_v60, %s5013_s29  ;;  %v4968_v60 = vld [vmem:[%s6457_s1 + $0x18] sm:$0xff] }
 0x541   :  { %1216 = vrot.lane.b32.xlu0 %v1203_v48, %s5013_s29  ;;  %v4969_v48 = vld [vmem:[%s6457_s1 + $0x10] sm:$0xff] }
 0x56f   :  { %v4495_v47 = vpop.f32.mrf.mxu1 }
 0x570   :  { %1331 = vrot.lane.b32.xlu1 %v4495_v47, %s5012_s28 }
 0x571   :  { %v1308_v61 = vpop.f32.mrf.mxu1 }
 0x572   :  { %1329 = vrot.lane.b32.xlu0 %v1308_v61, %s5012_s28 }
 0x573   :  { %v4498_v26 = vpop.f32.mrf.mxu1 }
 0x574   :  { %1341 = vrot.lane.b32.xlu1 %v4498_v26, %s5009_s22 }
 0x575   :  { %v1318_v24 = vpop.f32.mrf.mxu1 }
 0x576   :  { %1339 = vrot.lane.b32.xlu0 %v1318_v24, %s5009_s22 }
 0x582   :  { %v978_v42 = vpop.permute.xlu1 %977 }
 0x583   :  { %983 = vst.msk [vmem:[#allocation2 + $0x8] sm:$0xff] %vm981_vm10, %v978_v42 }
 0x584   :  { %v976_v49 = vpop.permute.xlu0 %975 }
 0x585   :  { %982 = vst.msk [vmem:[#allocation2] sm:$0xff] %vm981_vm10, %v976_v49 }
 0x5a5   :  { %v1092_v63 = vpop.permute.xlu1 %1091 }
 0x5a6   :  { %1097 = vst.msk [vmem:[#allocation2 + $0x8] sm:$0xff] %vm1095_vm11, %v1092_v63 }
 0x5a7   :  { %v1090_v51 = vpop.permute.xlu0 %1089 }
 0x5a8   :  { %1096 = vst.msk [vmem:[#allocation2] sm:$0xff] %vm1095_vm11, %v1090_v51 }
 0x5ad   :  { %v1103_v4 = vpop.permute.xlu1 %1102 }
 0x5ae   :  { %1108 = vst.msk [vmem:[#allocation2 + $0x8] sm:$0xff] %vm1106_vm12, %v1103_v4 }
 0x5af   :  { %v1101_v25 = vpop.permute.xlu0 %1100 }
 0x5b0   :  { %1107 = vst.msk [vmem:[#allocation2] sm:$0xff] %vm1106_vm12, %v1101_v25 }
 0x5b1   :  { %v1219_v45 = vpop.permute.xlu1 %1218 }
 0x5b2   :  { %1223 = vst.msk [vmem:[#allocation2 + $0x18] sm:$0xff] %vm981_vm10, %v1219_v45 }
 0x5b3   :  { %v1217_v19 = vpop.permute.xlu0 %1216 }
 0x5b4   :  { %1222 = vst.msk [vmem:[#allocation2 + $0x10] sm:$0xff] %vm981_vm10, %v1217_v19 }
 0x5b5   :  { %v1348_v5 = vld [vmem:[#allocation2 + $0x8] sm:$0xff] }
 0x5b7   :  { %v1347_v55 = vld [vmem:[#allocation2] sm:$0xff] }
 0x5b8   :  { %4515 = vmatprep.mubr.msk.f32.mxu0 %vm98_vm0, %v1347_v55 }
 0x5b9   :  { %4516 = vmatmul.mubr.msk.f32.vlgmr.msra.gmra.mxu0 %vm98_vm0, %v1348_v5 }
 0x5ba   :  { %4522 = vmatpush3.msra.mxu0 %v1526_v18  ;;  %v1828_v18 = vld [vmem:[%s6463_s7 + $0x78] sm:$0xff] }
 0x5bb   :  { %4523 = vmatprep.subr.mxu0 %v1523_v30 }
 0x5bc   :  { %4524 = vmatpush3.msra.mxu0 %v1523_v30  ;;  %v1825_v30 = vld [vmem:[%s6463_s7 + $0x60] sm:$0xff] }
 0x5bd   :  { %4525 = vmatprep.subr.mxu0 %v1520_v36 }
 0x5be   :  { %4526 = vmatpush3.msra.mxu0 %v1520_v36  ;;  %v1822_v36 = vld [vmem:[%s6463_s7 + $0x48] sm:$0xff] }
 0x5bf   :  { %4527 = vmatprep.subr.mxu0 %v1517_v1 }
 0x5c0   :  { %4528 = vmatpush3.msra.mxu0 %v1517_v1  ;;  %v1819_v1 = vld [vmem:[%s6463_s7 + $0x30] sm:$0xff] }
 0x5c1   :  { %4529 = vmatprep.subr.mxu0 %v1514_v3 }
 0x5c2   :  { %4530 = vmatpush3.msra.mxu0 %v1514_v3  ;;  %v1816_v3 = vld [vmem:[%s6463_s7 + $0x18] sm:$0xff] }
 0x5c3   :  { %4531 = vmatprep.subr.mxu0 %v1511_v44 }
 0x5c4   :  { %4532 = vmatpush3.msra.mxu0 %v1511_v44  ;;  %v1813_v44 = vld [vmem:[%s6463_s7] sm:$0xff] }
 0x5c5   :  { %4533 = vmatprep.subr.mxu0 %v1508_v53 }
 0x5c6   :  { %4534 = vmatpush3.msra.mxu0 %v1508_v53  ;;  %v1834_v53 = vld [vmem:[%s6463_s7 + $0xa8] sm:$0xff] }
 0x5c7   :  { %4535 = vmatprep.subr.mxu0 %v1505_v35 }
 0x5c8   :  { %4536 = vmatpush3.msra.mxu0 %v1505_v35  ;;  %v1831_v35 = vld [vmem:[%s6463_s7 + $0x90] sm:$0xff] }
 0x5e2   :  { %v1332_v58 = vpop.permute.xlu1 %1331 }
 0x5e3   :  { %1336 = vst.msk [vmem:[#allocation2 + $0x18] sm:$0xff] %vm1095_vm11, %v1332_v58 }
 0x5e4   :  { %v1330_v9 = vpop.permute.xlu0 %1329 }
 0x5e5   :  { %1335 = vst.msk [vmem:[#allocation2 + $0x10] sm:$0xff] %vm1095_vm11, %v1330_v9  ;;  %v4049_v9 = vld [vmem:[%s6461_s5] ss:$0 sm:$0xff] }
 0x5e6   :  { %v1342_v10 = vpop.permute.xlu1 %1341 }
 0x5e7   :  { %1346 = vst.msk [vmem:[#allocation2 + $0x18] sm:$0xff] %vm1106_vm12, %v1342_v10 }
 0x5e8   :  { %v1340_v13 = vpop.permute.xlu0 %1339 }
 0x5e9   :  { %1345 = vst.msk [vmem:[#allocation2 + $0x10] sm:$0xff] %vm1106_vm12, %v1340_v13 }
 0x5ee   :  { %v1350_v20 = vld [vmem:[#allocation2 + $0x18] sm:$0xff] }
 0x5f0   :  { %v1349_v16 = vld [vmem:[#allocation2 + $0x10] sm:$0xff] }
 0x5f1   :  { %4518 = vmatprep.mubr.msk.f32.mxu0 %vm98_vm0, %v1349_v16 }
 0x5f2   :  { %4519 = vmatmul.mubr.msk.f32.gmra.mxu0 %vm98_vm0, %v1350_v20 }
 0x679   :  { %v4517_v62 = vpop.f32.mrf.mxu0 }
 0x67a   :  { %v5499_v21 = vadd.f32 %v4966_v2, %v4517_v62 }
 0x67b   :  { %v1437_v23 = vpop.f32.mrf.mxu0 }
 0x67c   :  { %v5504_v6 = vadd.f32 %v4967_v8, %v1437_v23  ;;  %v1462_v17 = vmul.f32 %v5499_v21, %v5499_v21 }
 0x67e   :  { %v1468_v22 = vsel %vm98_vm0, %v1462_v17, 0.0  ;;  %v1461_v12 = vmul.f32 %v5504_v6, %v5504_v6 }
 0x67f   :  { %1469 = vadd.xlane.f32.xlu1 %v1468_v22 }
 0x680   :  { %v1465_v7 = vsel %vm98_vm0, %v1461_v12, 0.0 }
 0x681   :  { %1466 = vadd.xlane.f32.xlu0 %v1465_v7 }
 0x6b2   :  { %v4520_v38 = vpop.f32.mrf.mxu0 }
 0x6b3   :  { %v5589_v43 = vadd.f32 %v4968_v60, %v4520_v38  ;;  %v1830_v38 = vld [vmem:[%s6463_s7 + $0x88] sm:$0xff] }
 0x6b4   :  { %v1447_v59 = vpop.f32.mrf.mxu0 }
 0x6b5   :  { %v5594_v47 = vadd.f32 %v4969_v48, %v1447_v59  ;;  %v1464_v24 = vmul.f32 %v5589_v43, %v5589_v43  ;;  %v1829_v59 = vld [vmem:[%s6463_s7 + $0x80] sm:$0xff] }
 0x6b7   :  { %v1463_v61 = vmul.f32 %v5594_v47, %v5594_v47  ;;  %v1474_v42 = vsel %vm98_vm0, %v1464_v24, 0.0 }
 0x6b9   :  { %v1471_v26 = vsel %vm98_vm0, %v1463_v61, 0.0 }
 0x6ba   :  { %1472 = vadd.xlane.f32.xlu0 %v1471_v26 }
 0x6be   :  { %1475 = vadd.xlane.f32.xlu0 %v1474_v42 }
 0x708   :  { %v1470_v49 = vpop.xlane.xlu1 %1469 }
 0x709   :  { %v1478_v63 = vmul.f32 0.015625, %v1470_v49 }
 0x70a   :  { %v1467_v51 = vpop.xlane.xlu0 %1466 }
 0x70b   :  { %v1482_v4 = vadd.f32 1e-06, %v1478_v63  ;;  %v1477_v25 = vmul.f32 0.015625, %v1467_v51 }
 0x70d   :  { %4810 = vrsqrt.f32 %v1482_v4  ;;  %v1481_v45 = vadd.f32 1e-06, %v1477_v25 }
 0x70f   :  { %4812 = vrsqrt.f32 %v1481_v45 }
 0x71a   :  { %v4811_v19 = vpop.eup %4810 }
 0x71b   :  { %v1490_v5 = vmul.f32 %v4811_v19, %v5499_v21 }
 0x71c   :  { %v4813_v55 = vpop.eup %4812 }
 0x71d   :  { %v1489_v58 = vmul.f32 %v4813_v55, %v5504_v6  ;;  %v1500_v13 = vmul.f32 %v4049_v9, %v1490_v5 }
 0x71f   :  { %v1499_v10 = vmul.f32 %v4049_v9, %v1489_v58 }
 0x721   :  { %4050 = vmatmul.mubr.msk.f32.vlgmr.msra.gmra.mxu1 %vm98_vm0, %v1499_v10  ;;  %4537 = vmatprep.mubr.msk.f32.mxu0 %vm98_vm0, %v1499_v10 }
 0x722   :  { %4538 = vmatmul.mubr.msk.f32.vlgmr.msra.gmra.mxu0 %vm98_vm0, %v1500_v13  ;;  %1609 = vmatprep.mubr.f32.mxu1 %v5014_v57 }
 0x723   :  { %1850 = vmatpush1.msra.mxu1 %v1828_v18 }
 0x724   :  { %1851 = vmatprep.subr.mxu1 %v5014_v57 }
 0x725   :  { %4051 = vmatmul.mubr.msk.f32.gmra.mxu1 %vm98_vm0, %v1500_v13 }
 0x726   :  { %1615 = vmatprep.mubr.f32.mxu1 %v5014_v57  ;;  %1852 = vmatpush1.msra.mxu1 %v1827_v11 }
 0x727   :  { %1853 = vmatprep.subr.mxu1 %v5014_v57 }
 0x728   :  { %1854 = vmatpush1.msra.mxu1 %v1826_v29 }
 0x729   :  { %1855 = vmatprep.subr.mxu1 %v5014_v57 }
 0x72a   :  { %1856 = vmatpush1.msra.mxu1 %v1825_v30 }
 0x72b   :  { %1857 = vmatprep.subr.mxu1 %v5014_v57 }
 0x72c   :  { %1858 = vmatpush1.msra.mxu1 %v1824_v32 }
 0x72d   :  { %1859 = vmatprep.subr.mxu1 %v5014_v57 }
 0x72e   :  { %1860 = vmatpush1.msra.mxu1 %v1823_v34 }
 0x72f   :  { %1861 = vmatprep.subr.mxu1 %v5014_v57 }
 0x730   :  { %1862 = vmatpush1.msra.mxu1 %v1822_v36 }
 0x731   :  { %1863 = vmatprep.subr.mxu1 %v5014_v57 }
 0x732   :  { %1864 = vmatpush1.msra.mxu1 %v1821_v37 }
 0x733   :  { %1865 = vmatprep.subr.mxu1 %v5014_v57 }
 0x734   :  { %1866 = vmatpush1.msra.mxu1 %v1820_v39 }
 0x735   :  { %1867 = vmatprep.subr.mxu1 %v5014_v57 }
 0x736   :  { %1868 = vmatpush1.msra.mxu1 %v1819_v1 }
 0x737   :  { %1869 = vmatprep.subr.mxu1 %v5014_v57 }
 0x738   :  { %1870 = vmatpush1.msra.mxu1 %v1818_v0 }
 0x739   :  { %1871 = vmatprep.subr.mxu1 %v5014_v57 }
 0x73a   :  { %1872 = vmatpush1.msra.mxu1 %v1817_v40 }
 0x73b   :  { %1873 = vmatprep.subr.mxu1 %v5014_v57 }
 0x73c   :  { %1874 = vmatpush1.msra.mxu1 %v1816_v3 }
 0x73d   :  { %1875 = vmatprep.subr.mxu1 %v5014_v57 }
 0x73e   :  { %1876 = vmatpush1.msra.mxu1 %v1815_v41 }
 0x73f   :  { %1877 = vmatprep.subr.mxu1 %v5014_v57 }
 0x740   :  { %1878 = vmatpush1.msra.mxu1 %v1814_v46 }
 0x741   :  { %1879 = vmatprep.subr.mxu1 %v5014_v57 }
 0x742   :  { %1880 = vmatpush1.msra.mxu1 %v1813_v44 }
 0x743   :  { %v1473_v16 = vpop.xlane.xlu0 %1472  ;;  %1897 = vmatprep.subr.mxu1 %v5014_v57 }
 0x744   :  { %v1479_v20 = vmul.f32 0.015625, %v1473_v16  ;;  %1898 = vmatpush2.msra.mxu1 %v1836_v50 }
 0x745   :  { %1899 = vmatprep.subr.mxu1 %v5014_v57 }
 0x746   :  { %v1483_v62 = vadd.f32 1e-06, %v1479_v20  ;;  %1900 = vmatpush2.msra.mxu1 %v1835_v52 }
 0x747   :  { %v1476_v2 = vpop.xlane.xlu0 %1475  ;;  %1901 = vmatprep.subr.mxu1 %v5014_v57 }
 0x748   :  { %4814 = vrsqrt.f32 %v1483_v62  ;;  %v1480_v23 = vmul.f32 0.015625, %v1476_v2  ;;  %1902 = vmatpush2.msra.mxu1 %v1834_v53 }
 0x749   :  { %1903 = vmatprep.subr.mxu1 %v5014_v57 }
 0x74a   :  { %v1484_v8 = vadd.f32 1e-06, %v1480_v23  ;;  %1904 = vmatpush2.msra.mxu1 %v1833_v54 }
 0x74b   :  { %1905 = vmatprep.subr.mxu1 %v5014_v57 }
 0x74c   :  { %4816 = vrsqrt.f32 %v1484_v8  ;;  %1906 = vmatpush2.msra.mxu1 %v1832_v56 }
 0x74d   :  { %1907 = vmatprep.subr.mxu1 %v5014_v57 }
 0x74e   :  { %1908 = vmatpush2.msra.mxu1 %v1831_v35 }
 0x74f   :  { %1909 = vmatprep.subr.mxu1 %v5014_v57 }
 0x750   :  { %1910 = vmatpush2.msra.mxu1 %v1830_v38 }
 0x751   :  { %1911 = vmatprep.subr.mxu1 %v5014_v57 }
 0x752   :  { %1912 = vmatpush2.msra.mxu1 %v1829_v59 }
 0x755   :  { %v4815_v17 = vpop.eup %4814 }
 0x756   :  { %v1491_v22 = vmul.f32 %v4815_v17, %v5594_v47 }
 0x758   :  { %v1501_v12 = vmul.f32 %v4049_v9, %v1491_v22 }
 0x759   :  { %v4817_v7 = vpop.eup %4816 }
 0x75a   :  { %4052 = vmatmul.mubr.msk.f32.gmra.mxu1 %vm98_vm0, %v1501_v12  ;;  %4540 = vmatprep.mubr.msk.f32.mxu0 %vm98_vm0, %v1501_v12  ;;  %v1492_v27 = vmul.f32 %v4817_v7, %v5589_v43 }
 0x75b   :  { %1621 = vmatprep.mubr.f32.mxu1 %v5014_v57 }
 0x75c   :  { %v1502_v28 = vmul.f32 %v4049_v9, %v1492_v27 }
 0x75e   :  { %4053 = vmatmul.mubr.msk.f32.gmra.mxu1 %vm98_vm0, %v1502_v28  ;;  %4541 = vmatmul.mubr.msk.f32.gmra.mxu0 %vm98_vm0, %v1502_v28 }
 0x7e1   :  { %v1605_v60 = vpop.f32.mrf.mxu1 }
 0x7e2   :  { %v4539_v48 = vpop.f32.mrf.mxu0  ;;  %v4058_v55 = vmul.f32 -1.442695, %v1605_v60 }
 0x7e3   :  { %v1607_v61 = vpop.f32.mrf.mxu1 }
 0x7e4   :  { %v1694_v26 = vpop.f32.mrf.mxu0  ;;  %1777 = vrot.lane.b32.xlu0 %v1607_v61, %s5008_s21  ;;  %v4059_v19 = vmul.f32 -1.442695, %v1607_v61 }
 0x7e5   :  { %1779 = vrot.lane.b32.xlu1 %v1694_v26, %s5008_s21  ;;  %v1611_v24 = vpop.f32.mrf.mxu1 }
 0x7e6   :  { %4818 = vpow2.f32 %v4059_v19  ;;  %v4060_v58 = vmul.f32 -1.442695, %v1611_v24 }
 0x7e7   :  { %v1613_v42 = vpop.f32.mrf.mxu1  ;;  %4820 = vpow2.f32 %v4058_v55 }
 0x7e8   :  { %v4061_v5 = vmul.f32 -1.442695, %v1613_v42 }
 0x7e9   :  { %1781 = vrot.lane.b32.xlu1 %v1613_v42, %s5008_s21 }
 0x7ea   :  { %4822 = vpow2.f32 %v4061_v5 }
 0x7eb   :  { %4824 = vpow2.f32 %v4060_v58 }
 0x7ed   :  { %1783 = vrot.lane.b32.xlu1 %v4539_v48, %s5008_s21 }
 0x7f3   :  { %v4819_v9 = vpop.eup %4818 }
 0x7f4   :  { %v4821_v10 = vpop.eup %4820  ;;  %v1738_v13 = vadd.f32 1.0, %v4819_v9 }
 0x7f5   :  { %v1737_v16 = vadd.f32 1.0, %v4821_v10 }
 0x7f6   :  { %4826 = vrcp.f32 %v1738_v13 }
 0x7f7   :  { %v4823_v20 = vpop.eup %4822  ;;  %4828 = vrcp.f32 %v1737_v16 }
 0x7f8   :  { %v4825_v62 = vpop.eup %4824  ;;  %v1740_v2 = vadd.f32 1.0, %v4823_v20 }
 0x7f9   :  { %v1739_v23 = vadd.f32 1.0, %v4825_v62 }
 0x7fa   :  { %4830 = vrcp.f32 %v1740_v2 }
 0x7fb   :  { %4832 = vrcp.f32 %v1739_v23 }
 0x803   :  { %v4827_v8 = vpop.eup %4826 }
 0x804   :  { %v4829_v17 = vpop.eup %4828  ;;  %v1762_v22 = vmul.f32 %v4827_v8, %v1607_v61 }
 0x805   :  { %v1761_v7 = vmul.f32 %v4829_v17, %v1605_v60 }
 0x807   :  { %v4831_v29 = vpop.eup %4830 }
 0x808   :  { %v4833_v32 = vpop.eup %4832  ;;  %v1764_v34 = vmul.f32 %v4831_v29, %v1613_v42 }
 0x809   :  { %v1763_v36 = vmul.f32 %v4833_v32, %v1611_v24 }
 0x81a   :  { %v5719_v49 = vpop.f32.mrf.mxu1 }
 0x81b   :  { %v4062_v3 = vmul.f32 -1.442695, %v5719_v49 }
 0x81c   :  { %v5721_v63 = vpop.f32.mrf.mxu1 }
 0x81d   :  { %1785 = vrot.lane.b32.xlu0 %v5721_v63, %s5008_s21  ;;  %v4063_v40 = vmul.f32 -1.442695, %v5721_v63 }
 0x81e   :  { %v5725_v51 = vpop.f32.mrf.mxu1  ;;  %v4542_v4 = vpop.f32.mrf.mxu0 }
 0x81f   :  { %4834 = vpow2.f32 %v4063_v40  ;;  %v4064_v46 = vmul.f32 -1.442695, %v5725_v51 }
 0x820   :  { %v5727_v25 = vpop.f32.mrf.mxu1  ;;  %v1704_v45 = vpop.f32.mrf.mxu0  ;;  %4836 = vpow2.f32 %v4062_v3 }
 0x821   :  { %1787 = vrot.lane.b32.xlu1 %v1704_v45, %s5008_s21  ;;  %1789 = vrot.lane.b32.xlu0 %v5727_v25, %s5008_s21  ;;  %v4065_v41 = vmul.f32 -1.442695, %v5727_v25 }
 0x823   :  { %4838 = vpow2.f32 %v4065_v41 }
 0x824   :  { %4840 = vpow2.f32 %v4064_v46 }
 0x825   :  { %1791 = vrot.lane.b32.xlu1 %v4542_v4, %s5008_s21 }
 0x82c   :  { %v4835_v44 = vpop.eup %4834 }
 0x82d   :  { %v4837_v50 = vpop.eup %4836  ;;  %v1742_v52 = vadd.f32 1.0, %v4835_v44 }
 0x82e   :  { %v1741_v54 = vadd.f32 1.0, %v4837_v50 }
 0x82f   :  { %4842 = vrcp.f32 %v1742_v52  ;;  %v4071_v52 = vld [vmem:[%s6458_s2 + $0x1] ss:$0 sm:$0xff] }
 0x830   :  { %v4839_v53 = vpop.eup %4838  ;;  %4844 = vrcp.f32 %v1741_v54 }
 0x831   :  { %v4841_v56 = vpop.eup %4840  ;;  %v1744_v35 = vadd.f32 1.0, %v4839_v53 }
 0x832   :  { %v1743_v38 = vadd.f32 1.0, %v4841_v56 }
 0x833   :  { %4846 = vrcp.f32 %v1744_v35 }
 0x834   :  { %4848 = vrcp.f32 %v1743_v38 }
 0x83c   :  { %v4843_v59 = vpop.eup %4842 }
 0x83d   :  { %v4845_v60 = vpop.eup %4844  ;;  %v1766_v61 = vmul.f32 %v4843_v59, %v5721_v63 }
 0x83e   :  { %v1765_v24 = vmul.f32 %v4845_v60, %v5719_v49 }
 0x840   :  { %v4847_v26 = vpop.eup %4846 }
 0x841   :  { %v4849_v4 = vpop.eup %4848  ;;  %v1768_v5 = vmul.f32 %v4847_v26, %v5727_v25 }
 0x842   :  { %v1767_v58 = vmul.f32 %v4849_v4, %v5725_v51 }
 0x856   :  { %v1778_v12 = vpop.permute.xlu0 %1777 }
 0x857   :  { %v1780_v27 = vpop.permute.xlu1 %1779 }
 0x858   :  { %v1793_v28 = vsel %vm98_vm0, %v1778_v12, %v1780_v27  ;;  %v1806_v18 = vmul.f32 %v1780_v27, %v1762_v22  ;;  %v4078_v12 = vld [vmem:[%s6459_s3 + $0x70] sm:$0xff]  ;;  %v4075_v27 = vld [vmem:[%s6459_s3 + $0x58] sm:$0xff] }
 0x859   :  { %v1805_v11 = vmul.f32 %v1793_v28, %v1761_v7  ;;  %v4076_v7 = vld [vmem:[%s6459_s3 + $0x60] sm:$0xff]  ;;  %v4074_v28 = vld [vmem:[%s6459_s3 + $0x50] sm:$0xff] }
 0x85a   :  { %4066 = vmatprep.mubr.msk.f32.mxu1 %vm98_vm0, %v1806_v18  ;;  %v4073_v18 = vld [vmem:[%s6459_s3 + $0x48] sm:$0xff] }
 0x85b   :  { %v1782_v30 = vpop.permute.xlu1 %1781  ;;  %1914 = vmatmul.mubr.f32.vlgmr.msra.gmra.mxu1 %v1805_v11  ;;  %v4072_v11 = vld [vmem:[%s6459_s3 + $0x40] sm:$0xff] }
 0x85f   :  { %v1784_v37 = vpop.permute.xlu1 %1783 }
 0x860   :  { %v1794_v39 = vsel %vm98_vm0, %v1782_v30, %v1784_v37  ;;  %v1808_v1 = vmul.f32 %v1784_v37, %v1764_v34 }
 0x861   :  { %v1807_v0 = vmul.f32 %v1794_v39, %v1763_v36 }
 0x862   :  { %4067 = vmatprep.mubr.msk.f32.mxu1 %vm98_vm0, %v1808_v1 }
 0x863   :  { %1919 = vmatmul.mubr.f32.gmra.mxu1 %v1807_v0 }
 0x88f   :  { %v1786_v48 = vpop.permute.xlu0 %1785 }
 0x893   :  { %v1788_v42 = vpop.permute.xlu1 %1787  ;;  %v1790_v9 = vpop.permute.xlu0 %1789 }
 0x894   :  { %v1795_v45 = vsel %vm98_vm0, %v1786_v48, %v1788_v42  ;;  %v1810_v19 = vmul.f32 %v1788_v42, %v1766_v61 }
 0x895   :  { %v1809_v55 = vmul.f32 %v1795_v45, %v1765_v24 }
 0x896   :  { %4068 = vmatprep.mubr.msk.f32.mxu1 %vm98_vm0, %v1810_v19 }
 0x897   :  { %v1792_v10 = vpop.permute.xlu1 %1791  ;;  %1924 = vmatmul.mubr.f32.gmra.mxu1 %v1809_v55 }
 0x898   :  { %v1796_v63 = vsel %vm98_vm0, %v1790_v9, %v1792_v10  ;;  %v1812_v13 = vmul.f32 %v1792_v10, %v1768_v5 }
 0x899   :  { %v1811_v16 = vmul.f32 %v1796_v63, %v1767_v58 }
 0x89a   :  { %4069 = vmatprep.mubr.msk.f32.mxu1 %vm98_vm0, %v1812_v13 }
 0x89b   :  { %1929 = vmatmul.mubr.f32.gmra.mxu1 %v1811_v16 }
 0x91b   :  { %v1915_v49 = vpop.f32.mrf.mxu1 }
 0x91c   :  { %v5750_v20 = vadd.f32 %v1915_v49, %v5504_v6  ;;  %v4079_v6 = vld [vmem:[%s6459_s3 + $0x78] sm:$0xff] }
 0x91d   :  { %v1917_v62 = vpop.f32.mrf.mxu1  ;;  %4543 = vmatprep.subr.mxu1 %v4079_v6 }
 0x91e   :  { %v1940_v25 = vmul.f32 %v5750_v20, %v5750_v20  ;;  %4544 = vmatpush3.msra.mxu1 %v4079_v6 }
 0x91f   :  { %4545 = vmatprep.subr.mxu1 %v4078_v12 }
 0x920   :  { %v1944_v51 = vsel %vm98_vm0, %v1940_v25, 0.0  ;;  %4546 = vmatpush3.msra.mxu1 %v4078_v12 }
 0x921   :  { %1945 = vadd.xlane.f32.xlu0 %v1944_v51 }
 0x923   :  { %v1920_v2 = vpop.f32.mrf.mxu1 }
 0x924   :  { %v5756_v23 = vadd.f32 %v1920_v2, %v5499_v21  ;;  %v4077_v21 = vld [vmem:[%s6459_s3 + $0x68] sm:$0xff] }
 0x925   :  { %v1922_v8 = vpop.f32.mrf.mxu1  ;;  %4547 = vmatprep.subr.mxu1 %v4077_v21 }
 0x926   :  { %v1941_v17 = vmul.f32 %v5756_v23, %v5756_v23  ;;  %4548 = vmatpush3.msra.mxu1 %v4077_v21 }
 0x927   :  { %4549 = vmatprep.subr.mxu1 %v4076_v7 }
 0x928   :  { %v1947_v22 = vsel %vm98_vm0, %v1941_v17, 0.0  ;;  %4550 = vmatpush3.msra.mxu1 %v4076_v7 }
 0x929   :  { %1948 = vadd.xlane.f32.xlu1 %v1947_v22  ;;  %4551 = vmatprep.subr.mxu1 %v4075_v27 }
 0x92a   :  { %4552 = vmatpush3.msra.mxu1 %v4075_v27 }
 0x92b   :  { %4553 = vmatprep.subr.mxu1 %v4074_v28 }
 0x92c   :  { %4554 = vmatpush3.msra.mxu1 %v4074_v28 }
 0x92d   :  { %4555 = vmatprep.subr.mxu1 %v4073_v18 }
 0x92e   :  { %4556 = vmatpush3.msra.mxu1 %v4073_v18 }
 0x92f   :  { %4557 = vmatprep.subr.mxu1 %v4072_v11 }
 0x930   :  { %4558 = vmatpush3.msra.mxu1 %v4072_v11 }
 0x957   :  { %v1925_v29 = vpop.f32.mrf.mxu1 }
 0x958   :  { %v5786_v30 = vadd.f32 %v1925_v29, %v5594_v47 }
 0x959   :  { %v1927_v32 = vpop.f32.mrf.mxu1 }
 0x95a   :  { %v1942_v34 = vmul.f32 %v5786_v30, %v5786_v30 }
 0x95b   :  { %v1930_v36 = vpop.f32.mrf.mxu1 }
 0x95c   :  { %v5791_v37 = vadd.f32 %v1930_v36, %v5589_v43  ;;  %v1950_v39 = vsel %vm98_vm0, %v1942_v34, 0.0 }
 0x95d   :  { %1951 = vadd.xlane.f32.xlu0 %v1950_v39  ;;  %v1932_v1 = vpop.f32.mrf.mxu1 }
 0x95e   :  { %v1943_v0 = vmul.f32 %v5791_v37, %v5791_v37 }
 0x960   :  { %v1953_v40 = vsel %vm98_vm0, %v1943_v0, 0.0 }
 0x961   :  { %1954 = vadd.xlane.f32.xlu0 %v1953_v40 }
 0x9aa   :  { %v1946_v47 = vpop.xlane.xlu0 %1945 }
 0x9ab   :  { %v1956_v3 = vmul.f32 0.015625, %v1946_v47 }
 0x9ad   :  { %v1960_v41 = vadd.f32 1e-06, %v1956_v3 }
 0x9af   :  { %4850 = vrsqrt.f32 %v1960_v41 }
 0x9b2   :  { %v1949_v46 = vpop.xlane.xlu1 %1948 }
 0x9b3   :  { %v1957_v44 = vmul.f32 0.015625, %v1949_v46 }
 0x9b5   :  { %v1961_v50 = vadd.f32 1e-06, %v1957_v44 }
 0x9b7   :  { %4852 = vrsqrt.f32 %v1961_v50 }
 0x9bc   :  { %v4851_v43 = vpop.eup %4850 }
 0x9bd   :  { %v1968_v53 = vmul.f32 %v4851_v43, %v5750_v20 }
 0x9bf   :  { %v1978_v54 = vmul.f32 %v4071_v52, %v1968_v53 }
 0x9c1   :  { %4559 = vmatprep.mubr.msk.f32.mxu1 %vm98_vm0, %v1978_v54 }
 0x9c4   :  { %v4853_v56 = vpop.eup %4852 }
 0x9c5   :  { %v1969_v35 = vmul.f32 %v4853_v56, %v5756_v23 }
 0x9c7   :  { %v1979_v38 = vmul.f32 %v4071_v52, %v1969_v35 }
 0x9c9   :  { %4560 = vmatmul.mubr.msk.f32.vlgmr.msra.gmra.mxu1 %vm98_vm0, %v1979_v38 }
 0x9e6   :  { %v1952_v59 = vpop.xlane.xlu0 %1951 }
 0x9e7   :  { %v1958_v60 = vmul.f32 0.015625, %v1952_v59 }
 0x9e9   :  { %v1962_v48 = vadd.f32 1e-06, %v1958_v60 }
 0x9ea   :  { %v1955_v61 = vpop.xlane.xlu0 %1954 }
 0x9eb   :  { %4854 = vrsqrt.f32 %v1962_v48  ;;  %v1959_v26 = vmul.f32 0.015625, %v1955_v61 }
 0x9ed   :  { %v1963_v24 = vadd.f32 1e-06, %v1959_v26 }
 0x9ef   :  { %4856 = vrsqrt.f32 %v1963_v24 }
 0x9f8   :  { %v4855_v42 = vpop.eup %4854 }
 0x9f9   :  { %v1970_v4 = vmul.f32 %v4855_v42, %v5786_v30 }
 0x9fb   :  { %v1980_v45 = vmul.f32 %v4071_v52, %v1970_v4 }
 0x9fc   :  { %v4857_v19 = vpop.eup %4856 }
 0x9fd   :  { %4562 = vmatprep.mubr.msk.f32.mxu1 %vm98_vm0, %v1980_v45  ;;  %v1971_v55 = vmul.f32 %v4857_v19, %v5791_v37 }
 0x9ff   :  { %v1981_v5 = vmul.f32 %v4071_v52, %v1971_v55 }
 0xa01   :  { %4563 = vmatmul.mubr.msk.f32.gmra.mxu1 %vm98_vm0, %v1981_v5 }
 0xa89   :  { %v4561_v58 = vpop.f32.mrf.mxu1 }
 0xa8a   :  { %2092 = vrot.lane.b32.xlu1 %v4561_v58, %s5007_s20 }
 0xa8b   :  { %v2069_v9 = vpop.f32.mrf.mxu1 }
 0xa8c   :  { %2090 = vrot.lane.b32.xlu0 %v2069_v9, %s5007_s20  ;;  %4569 = vmatprep.mubr.msk.f32.mxu0 %vm253_vm1, %v2069_v9 }
 0xa90   :  { %2096 = vrot.lane.b32.xlu0 %v4561_v58, %s5008_s21 }
 0xa94   :  { %2205 = vrot.lane.b32.xlu0 %v4561_v58, %s5009_s22 }
 0xa98   :  { %2195 = vrot.lane.b32.xlu0 %v2069_v9, %s5010_s23 }
 0xac1   :  { %v5814_v10 = vpop.f32.mrf.mxu1 }
 0xac2   :  { %2312 = vrot.lane.b32.xlu0 %v5814_v10, %s5008_s21 }
 0xac3   :  { %v5818_v63 = vpop.f32.mrf.mxu1 }
 0xac4   :  { %2306 = vrot.lane.b32.xlu1 %v5818_v63, %s5007_s20 }
 0xac8   :  { %2308 = vrot.lane.b32.xlu1 %v5814_v10, %s5007_s20 }
 0xacc   :  { %2094 = vrot.lane.b32.xlu1 %v2069_v9, %s5008_s21 }
 0xad0   :  { %2203 = vrot.lane.b32.xlu1 %v2069_v9, %s5009_s22 }
 0xad4   :  { %2197 = vrot.lane.b32.xlu1 %v4561_v58, %s5010_s23 }
 0xafc   :  { %v2093_v13 = vpop.permute.xlu1 %2092 }
 0xafd   :  { %2201 = vrot.lane.b32.xlu0 %v2093_v13, %s5010_s23 }
 0xafe   :  { %v2091_v16 = vpop.permute.xlu0 %2090 }
 0xaff   :  { %2199 = vrot.lane.b32.xlu1 %v2091_v16, %s5010_s23 }
 0xb01   :  { %2421 = vrot.lane.b32.xlu0 %v5814_v10, %s5009_s22 }
 0xb02   :  { %v2097_v49 = vpop.permute.xlu0 %2096 }
 0xb03   :  { %2310 = vrot.lane.b32.xlu1 %v5818_v63, %s5008_s21  ;;  %4565 = vmatprep.subr.msk.mxu0 %vm253_vm1, %v2097_v49 }
 0xb04   :  { %4566 = vmatpush3.xpose.msk.msra.mxu0 %vm253_vm1, %v2097_v49 }
 0xb05   :  { %2411 = vrot.lane.b32.xlu0 %v5818_v63, %s5010_s23 }
 0xb06   :  { %v2206_v51 = vpop.permute.xlu0 %2205 }
 0xb07   :  { %2419 = vrot.lane.b32.xlu1 %v5818_v63, %s5009_s22 }
 0xb0a   :  { %v2196_v8 = vpop.permute.xlu0 %2195 }
 0xb0b   :  { %2413 = vrot.lane.b32.xlu1 %v5814_v10, %s5010_s23 }
 0xb34   :  { %v2313_v22 = vpop.permute.xlu0 %2312 }
 0xb36   :  { %v2307_v62 = vpop.permute.xlu1 %2306 }
 0xb37   :  { %2415 = vrot.lane.b32.xlu0 %v2307_v62, %s5010_s23 }
 0xb3a   :  { %v2309_v25 = vpop.permute.xlu1 %2308 }
 0xb3b   :  { %2714 = vrot.lane.b32.xlu0 %v4561_v58, %s5012_s28  ;;  %2417 = vrot.lane.b32.xlu1 %v2309_v25, %s5010_s23 }
 0xb3e   :  { %v2095_v2 = vpop.permute.xlu1 %2094 }
 0xb3f   :  { %2712 = vrot.lane.b32.xlu1 %v2069_v9, %s5012_s28  ;;  %4567 = vmatprep.subr.msk.mxu0 %vm253_vm1, %v2095_v2 }
 0xb40   :  { %4568 = vmatpush3.xpose.msk.msra.mxu0 %vm253_vm1, %v2095_v2 }
 0xb41   :  { %4575 = vmatprep.subr.msk.mxu0 %vm253_vm1, %v2206_v51 }
 0xb42   :  { %v2204_v17 = vpop.permute.xlu1 %2203 }
 0xb43   :  { %2829 = vrot.lane.b32.xlu1 %v4561_v58, %s5013_s29  ;;  %4570 = vmatmul.mubr.msk.f32.vlgmr.msra.gmra.mxu0 %vm253_vm1, %v4561_v58 }
 0xb44   :  { %4572 = vmatprep.mubr.msk.f32.mxu0 %vm253_vm1, %v2091_v16  ;;  %4576 = vmatpush3.xpose.msk.msra.mxu0 %vm253_vm1, %v2206_v51 }
 0xb45   :  { %4577 = vmatprep.subr.msk.mxu0 %vm253_vm1, %v2204_v17 }
 0xb46   :  { %v2198_v6 = vpop.permute.xlu1 %2197 }
 0xb47   :  { %2827 = vrot.lane.b32.xlu1 %v2069_v9, %s5013_s29  ;;  %4573 = vmatmul.mubr.msk.f32.gmra.mxu0 %vm253_vm1, %v2093_v13 }
 0xb48   :  { %4578 = vmatpush3.xpose.msk.msra.mxu0 %vm253_vm1, %v2204_v17  ;;  %4579 = vmatprep.mubr.msk.f32.mxu0 %vm253_vm1, %v2196_v8 }
 0xb49   :  { %4585 = vmatprep.subr.msk.mxu0 %vm253_vm1, %v2313_v22 }
 0xb4b   :  { %4580 = vmatmul.mubr.msk.f32.vlgmr.msra.gmra.mxu0 %vm253_vm1, %v2198_v6 }
 0xb4c   :  { %4586 = vmatpush3.xpose.msk.msra.mxu0 %vm253_vm1, %v2313_v22 }
 0xb6f   :  { %v2202_v12 = vpop.permute.xlu0 %2201 }
 0xb71   :  { %v2200_v21 = vpop.permute.xlu1 %2199 }
 0xb72   :  { %4582 = vmatprep.mubr.msk.f32.mxu0 %vm253_vm1, %v2200_v21 }
 0xb73   :  { %4583 = vmatmul.mubr.msk.f32.gmra.mxu0 %vm253_vm1, %v2202_v12  ;;  %v2422_v27 = vpop.permute.xlu0 %2421 }
 0xb74   :  { %4589 = vmatprep.mubr.msk.f32.mxu0 %vm253_vm1, %v5818_v63 }
 0xb75   :  { %v2311_v7 = vpop.permute.xlu1 %2310 }
 0xb76   :  { %4587 = vmatprep.subr.msk.mxu0 %vm253_vm1, %v2311_v7 }
 0xb77   :  { %4588 = vmatpush3.xpose.msk.msra.mxu0 %vm253_vm1, %v2311_v7  ;;  %v2412_v18 = vpop.permute.xlu0 %2411 }
 0xb78   :  { %4595 = vmatprep.subr.msk.mxu0 %vm253_vm1, %v2422_v27 }
 0xb79   :  { %v2420_v28 = vpop.permute.xlu1 %2419 }
 0xb7a   :  { %4590 = vmatmul.mubr.msk.f32.vlgmr.msra.gmra.mxu0 %vm253_vm1, %v5814_v10 }
 0xb7b   :  { %4592 = vmatprep.mubr.msk.f32.mxu0 %vm253_vm1, %v2307_v62  ;;  %4596 = vmatpush3.xpose.msk.msra.mxu0 %vm253_vm1, %v2422_v27 }
 0xb7c   :  { %4597 = vmatprep.subr.msk.mxu0 %vm253_vm1, %v2420_v28 }
 0xb7d   :  { %v2414_v11 = vpop.permute.xlu1 %2413 }
 0xb7e   :  { %4593 = vmatmul.mubr.msk.f32.gmra.mxu0 %vm253_vm1, %v2309_v25 }
 0xb7f   :  { %4598 = vmatpush3.xpose.msk.msra.mxu0 %vm253_vm1, %v2420_v28  ;;  %4599 = vmatprep.mubr.msk.f32.mxu0 %vm253_vm1, %v2412_v18 }
 0xb82   :  { %4600 = vmatmul.mubr.msk.f32.vlgmr.msra.gmra.mxu0 %vm253_vm1, %v2414_v11 }
 0xba9   :  { %v2416_v29 = vpop.permute.xlu0 %2415 }
 0xbaa   :  { %4602 = vmatprep.mubr.msk.f32.mxu0 %vm253_vm1, %v2416_v29 }
 0xbad   :  { %v2418_v32 = vpop.permute.xlu1 %2417  ;;  %v2715_v34 = vpop.permute.xlu0 %2714 }
 0xbae   :  { %4603 = vmatmul.mubr.msk.f32.gmra.mxu0 %vm253_vm1, %v2418_v32  ;;  %4605 = vmatprep.subr.mxu1 %v2715_v34 }
 0xbaf   :  { %4606 = vmatpush3.msra.mxu1 %v2715_v34 }
 0xbb1   :  { %v2713_v36 = vpop.permute.xlu1 %2712 }
 0xbb2   :  { %4607 = vmatprep.subr.mxu1 %v2713_v36 }
 0xbb3   :  { %4608 = vmatpush3.msra.mxu1 %v2713_v36 }
 0xbb5   :  { %v2830_v39 = vpop.permute.xlu1 %2829 }
 0xbb6   :  { %4615 = vmatprep.subr.mxu0 %v2830_v39 }
 0xbb7   :  { %4616 = vmatpush3.msra.mxu0 %v2830_v39 }
 0xbb9   :  { %v2828_v1 = vpop.permute.xlu1 %2827 }
 0xbba   :  { %4617 = vmatprep.subr.mxu0 %v2828_v1 }
 0xbbb   :  { %4618 = vmatpush3.msra.mxu0 %v2828_v1 }
 0xc03   :  { %v4571_v0 = vpop.f32.mrf.mxu0 }
 0xc04   :  { %v5879_v40 = vadd.f32 %v4571_v0, %v5223_v14 }
 0xc05   :  { %v2176_v47 = vpop.f32.mrf.mxu0 }
 0xc06   :  { %v5882_v3 = vadd.f32 %v2176_v47, %v5225_v15  ;;  %v2539_v41 = vsel %vm253_vm1, %v5879_v40, -inf }
 0xc07   :  { %2540 = vmax.xlane.f32.xlu1 %v2539_v41  ;;  %v4574_v46 = vpop.f32.mrf.mxu0 }
 0xc08   :  { %v5887_v44 = vadd.f32 %v4574_v46, %v5223_v14  ;;  %v2536_v50 = vsel %vm253_vm1, %v5882_v3, -inf }
 0xc09   :  { %2537 = vmax.xlane.f32.xlu0 %v2536_v50  ;;  %v2186_v43 = vpop.f32.mrf.mxu0 }
 0xc0a   :  { %v5892_v52 = vadd.f32 %v2186_v43, %v5225_v15  ;;  %v2545_v53 = vsel %vm253_vm1, %v5887_v44, -inf }
 0xc0b   :  { %2546 = vmax.xlane.f32.xlu1 %v2545_v53  ;;  %v4581_v54 = vpop.f32.mrf.mxu0 }
 0xc0c   :  { %v5897_v56 = vadd.f32 %v4581_v54, %v5223_v14  ;;  %v2542_v35 = vsel %vm253_vm1, %v5892_v52, -inf }
 0xc0d   :  { %2543 = vmax.xlane.f32.xlu0 %v2542_v35  ;;  %v2285_v38 = vpop.f32.mrf.mxu0 }
 0xc0e   :  { %v5902_v59 = vadd.f32 %v2285_v38, %v5225_v15  ;;  %v2551_v60 = vsel %vm253_vm1, %v5897_v56, -inf }
 0xc10   :  { %v2548_v48 = vsel %vm253_vm1, %v5902_v59, -inf }
 0xc11   :  { %2552 = vmax.xlane.f32.xlu0 %v2551_v60 }
 0xc15   :  { %2549 = vmax.xlane.f32.xlu0 %v2548_v48 }
 0xc33   :  { %v4584_v61 = vpop.f32.mrf.mxu0 }
 0xc34   :  { %v5909_v26 = vadd.f32 %v4584_v61, %v5223_v14 }
 0xc35   :  { %v2295_v24 = vpop.f32.mrf.mxu0 }
 0xc36   :  { %v5912_v42 = vadd.f32 %v2295_v24, %v5225_v15  ;;  %v2557_v4 = vsel %vm253_vm1, %v5909_v26, -inf }
 0xc37   :  { %2558 = vmax.xlane.f32.xlu1 %v2557_v4 }
 0xc38   :  { %v2554_v45 = vsel %vm253_vm1, %v5912_v42, -inf }
 0xc39   :  { %2555 = vmax.xlane.f32.xlu0 %v2554_v45 }
 0xc3a   :  { %v4591_v19 = vpop.f32.mrf.mxu0 }
 0xc3b   :  { %v5919_v55 = vadd.f32 %v4591_v19, %v5248_v31 }
 0xc3c   :  { %v2392_v5 = vpop.f32.mrf.mxu0 }
 0xc3d   :  { %v5922_v14 = vadd.f32 %v2392_v5, %v5250_v33  ;;  %v2563_v15 = vsel %vm253_vm1, %v5919_v55, -inf }
 0xc3e   :  { %2564 = vmax.xlane.f32.xlu1 %v2563_v15  ;;  %v4594_v58 = vpop.f32.mrf.mxu0 }
 0xc3f   :  { %v5927_v9 = vadd.f32 %v4594_v58, %v5248_v31  ;;  %v2560_v13 = vsel %vm253_vm1, %v5922_v14, -inf }
 0xc40   :  { %2561 = vmax.xlane.f32.xlu0 %v2560_v13  ;;  %v2402_v16 = vpop.f32.mrf.mxu0 }
 0xc41   :  { %v5932_v49 = vadd.f32 %v2402_v16, %v5250_v33  ;;  %v2569_v62 = vsel %vm253_vm1, %v5927_v9, -inf }
 0xc42   :  { %2570 = vmax.xlane.f32.xlu1 %v2569_v62  ;;  %v4601_v25 = vpop.f32.mrf.mxu0 }
 0xc43   :  { %v5937_v51 = vadd.f32 %v4601_v25, %v5248_v31  ;;  %v2566_v2 = vsel %vm253_vm1, %v5932_v49, -inf }
 0xc44   :  { %2567 = vmax.xlane.f32.xlu0 %v2566_v2  ;;  %v2501_v8 = vpop.f32.mrf.mxu0 }
 0xc45   :  { %v5942_v17 = vadd.f32 %v2501_v8, %v5250_v33  ;;  %v2575_v22 = vsel %vm253_vm1, %v5937_v51, -inf }
 0xc46   :  { %2576 = vmax.xlane.f32.xlu1 %v2575_v22 }
 0xc47   :  { %v2572_v6 = vsel %vm253_vm1, %v5942_v17, -inf }
 0xc48   :  { %2573 = vmax.xlane.f32.xlu0 %v2572_v6 }
 0xc6e   :  { %v4604_v12 = vpop.f32.mrf.mxu0 }
 0xc6f   :  { %v5949_v21 = vadd.f32 %v4604_v12, %v5248_v31 }
 0xc70   :  { %v2511_v7 = vpop.f32.mrf.mxu0 }
 0xc71   :  { %v5952_v27 = vadd.f32 %v2511_v7, %v5250_v33  ;;  %v2581_v28 = vsel %vm253_vm1, %v5949_v21, -inf }
 0xc72   :  { %2582 = vmax.xlane.f32.xlu1 %v2581_v28 }
 0xc73   :  { %v2578_v18 = vsel %vm253_vm1, %v5952_v27, -inf }
 0xc74   :  { %2579 = vmax.xlane.f32.xlu0 %v2578_v18 }
 0xc83   :  { %2950 = vrot.lane.b32.xlu1 %v5818_v63, %s5012_s28 }
 0xc8a   :  { %2952 = vrot.lane.b32.xlu0 %v5814_v10, %s5012_s28 }
 0xc90   :  { %v2541_v31 = vpop.xlane.xlu1 %2540 }
 0xc91   :  { %v2585_v11 = vsub.f32 %v5879_v40, %v2541_v31 }
 0xc92   :  { %v2538_v29 = vpop.xlane.xlu0 %2537 }
 0xc93   :  { %v2602_v33 = vmul.f32 1.442695, %v2585_v11  ;;  %v2584_v32 = vsub.f32 %v5882_v3, %v2538_v29 }
 0xc94   :  { %v2547_v34 = vpop.xlane.xlu1 %2546 }
 0xc95   :  { %v2600_v36 = vmul.f32 1.442695, %v2584_v32  ;;  %v2587_v39 = vsub.f32 %v5887_v44, %v2547_v34  ;;  %4858 = vpow2.f32 %v2602_v33 }
 0xc96   :  { %v2544_v1 = vpop.xlane.xlu0 %2543 }
 0xc97   :  { %v2606_v0 = vmul.f32 1.442695, %v2587_v39  ;;  %v2586_v47 = vsub.f32 %v5892_v52, %v2544_v1  ;;  %4860 = vpow2.f32 %v2600_v36 }
 0xc99   :  { %v2604_v41 = vmul.f32 1.442695, %v2586_v47  ;;  %4862 = vpow2.f32 %v2606_v0 }
 0xc9a   :  { %v2553_v46 = vpop.xlane.xlu0 %2552 }
 0xc9b   :  { %v2589_v50 = vsub.f32 %v5897_v56, %v2553_v46  ;;  %4864 = vpow2.f32 %v2604_v41 }
 0xc9d   :  { %v2610_v40 = vmul.f32 1.442695, %v2589_v50 }
 0xc9e   :  { %v2550_v43 = vpop.xlane.xlu0 %2549 }
 0xc9f   :  { %4866 = vpow2.f32 %v2610_v40  ;;  %v2588_v3 = vsub.f32 %v5902_v59, %v2550_v43 }
 0xca1   :  { %v2608_v53 = vmul.f32 1.442695, %v2588_v3 }
 0xca2   :  { %v5968_v54 = vpop.eup %4858 }
 0xca3   :  { %4868 = vpow2.f32 %v2608_v53  ;;  %v2635_v52 = vsel %vm253_vm1, %v5968_v54, 0.0 }
 0xca4   :  { %v5970_v44 = vpop.eup %4860 }
 0xca5   :  { %v2632_v56 = vsel %vm253_vm1, %v5970_v44, 0.0 }
 0xca6   :  { %v5974_v35 = vpop.eup %4862 }
 0xca7   :  { %2636 = vadd.xlane.f32.xlu1 %v2635_v52  ;;  %v2641_v59 = vsel %vm253_vm1, %v5974_v35, 0.0 }
 0xca8   :  { %v5978_v38 = vpop.eup %4864 }
 0xca9   :  { %2633 = vadd.xlane.f32.xlu0 %v2632_v56  ;;  %v2638_v48 = vsel %vm253_vm1, %v5978_v38, 0.0 }
 0xcab   :  { %2642 = vadd.xlane.f32.xlu1 %v2641_v59 }
 0xcac   :  { %v5982_v60 = vpop.eup %4866 }
 0xcad   :  { %2639 = vadd.xlane.f32.xlu0 %v2638_v48  ;;  %v2647_v61 = vsel %vm253_vm1, %v5982_v60, 0.0 }
 0xcaf   :  { %2648 = vadd.xlane.f32.xlu1 %v2647_v61 }
 0xcb0   :  { %v5988_v24 = vpop.eup %4868 }
 0xcb1   :  { %v2644_v4 = vsel %vm253_vm1, %v5988_v24, 0.0 }
 0xcb2   :  { %2645 = vadd.xlane.f32.xlu0 %v2644_v4 }
 0xcc0   :  { %v2559_v45 = vpop.xlane.xlu1 %2558 }
 0xcc1   :  { %v2591_v19 = vsub.f32 %v5909_v26, %v2559_v45 }
 0xcc2   :  { %v2556_v5 = vpop.xlane.xlu0 %2555 }
 0xcc3   :  { %v2614_v15 = vmul.f32 1.442695, %v2591_v19  ;;  %v2590_v58 = vsub.f32 %v5912_v42, %v2556_v5 }
 0xcc5   :  { %4870 = vpow2.f32 %v2614_v15  ;;  %v2612_v13 = vmul.f32 1.442695, %v2590_v58 }
 0xcc7   :  { %4872 = vpow2.f32 %v2612_v13  ;;  %v2565_v16 = vpop.xlane.xlu1 %2564 }
 0xcc8   :  { %v2593_v62 = vsub.f32 %v5919_v55, %v2565_v16 }
 0xcc9   :  { %v2562_v25 = vpop.xlane.xlu0 %2561 }
 0xcca   :  { %v2618_v2 = vmul.f32 1.442695, %v2593_v62  ;;  %v2592_v8 = vsub.f32 %v5922_v14, %v2562_v25 }
 0xccb   :  { %v2571_v22 = vpop.xlane.xlu1 %2570 }
 0xccc   :  { %4874 = vpow2.f32 %v2618_v2  ;;  %v2616_v6 = vmul.f32 1.442695, %v2592_v8  ;;  %v2595_v12 = vsub.f32 %v5927_v9, %v2571_v22 }
 0xccd   :  { %v2568_v26 = vpop.xlane.xlu0 %2567 }
 0xcce   :  { %4876 = vpow2.f32 %v2616_v6  ;;  %v2622_v7 = vmul.f32 1.442695, %v2595_v12  ;;  %v2594_v42 = vsub.f32 %v5932_v49, %v2568_v26 }
 0xccf   :  { %v2577_v28 = vpop.xlane.xlu1 %2576 }
 0xcd0   :  { %4878 = vpow2.f32 %v2622_v7  ;;  %v2620_v18 = vmul.f32 1.442695, %v2594_v42  ;;  %v2597_v31 = vsub.f32 %v5937_v51, %v2577_v28 }
 0xcd1   :  { %v2574_v55 = vpop.xlane.xlu0 %2573 }
 0xcd2   :  { %v5999_v11 = vpop.eup %4870  ;;  %4880 = vpow2.f32 %v2620_v18  ;;  %v2626_v14 = vmul.f32 1.442695, %v2597_v31  ;;  %v2596_v29 = vsub.f32 %v5942_v17, %v2574_v55 }
 0xcd3   :  { %v2653_v9 = vsel %vm253_vm1, %v5999_v11, 0.0 }
 0xcd4   :  { %v6004_v33 = vpop.eup %4872  ;;  %4882 = vpow2.f32 %v2626_v14  ;;  %v2624_v32 = vmul.f32 1.442695, %v2596_v29  ;;  %2654 = vadd.xlane.f32.xlu1 %v2653_v9 }
 0xcd5   :  { %v2650_v49 = vsel %vm253_vm1, %v6004_v33, 0.0 }
 0xcd6   :  { %4884 = vpow2.f32 %v2624_v32  ;;  %2651 = vadd.xlane.f32.xlu0 %v2650_v49 }
 0xcd9   :  { %v6008_v51 = vpop.eup %4874 }
 0xcda   :  { %v2659_v34 = vsel %vm253_vm1, %v6008_v51, 0.0 }
 0xcdb   :  { %v6012_v36 = vpop.eup %4876  ;;  %2660 = vadd.xlane.f32.xlu1 %v2659_v34 }
 0xcdc   :  { %v2656_v17 = vsel %vm253_vm1, %v6012_v36, 0.0 }
 0xcdd   :  { %v6016_v39 = vpop.eup %4878  ;;  %2657 = vadd.xlane.f32.xlu0 %v2656_v17 }
 0xcde   :  { %v2665_v1 = vsel %vm253_vm1, %v6016_v39, 0.0 }
 0xcdf   :  { %v6020_v0 = vpop.eup %4880  ;;  %2666 = vadd.xlane.f32.xlu1 %v2665_v1 }
 0xce0   :  { %v2662_v47 = vsel %vm253_vm1, %v6020_v0, 0.0 }
 0xce1   :  { %v6024_v41 = vpop.eup %4882  ;;  %2663 = vadd.xlane.f32.xlu0 %v2662_v47 }
 0xce2   :  { %v2671_v46 = vsel %vm253_vm1, %v6024_v41, 0.0 }
 0xce3   :  { %v6028_v50 = vpop.eup %4884  ;;  %2672 = vadd.xlane.f32.xlu1 %v2671_v46 }
 0xce4   :  { %v2668_v40 = vsel %vm253_vm1, %v6028_v50, 0.0 }
 0xce5   :  { %2669 = vadd.xlane.f32.xlu0 %v2668_v40 }
 0xcfb   :  { %v2583_v43 = vpop.xlane.xlu1 %2582 }
 0xcfc   :  { %v2599_v3 = vsub.f32 %v5949_v21, %v2583_v43 }
 0xcfd   :  { %v2580_v53 = vpop.xlane.xlu0 %2579 }
 0xcfe   :  { %v2630_v52 = vmul.f32 1.442695, %v2599_v3  ;;  %v2598_v56 = vsub.f32 %v5952_v27, %v2580_v53 }
 0xcff   :  { %v2951_v27 = vpop.permute.xlu1 %2950 }
 0xd00   :  { %4886 = vpow2.f32 %v2630_v52  ;;  %v2628_v59 = vmul.f32 1.442695, %v2598_v56  ;;  %v4130_v56 = vld [vmem:[%s6460_s4 + $0x70] sm:$0xff] }
 0xd01   :  { %v2953_v48 = vpop.permute.xlu0 %2952 }
 0xd02   :  { %4888 = vpow2.f32 %v2628_v59  ;;  %4625 = vmatprep.subr.mxu1 %v2953_v48 }
 0xd0d   :  { %v6034_v61 = vpop.eup %4886 }
 0xd0e   :  { %v2677_v4 = vsel %vm253_vm1, %v6034_v61, 0.0 }
 0xd0f   :  { %v6038_v45 = vpop.eup %4888  ;;  %2678 = vadd.xlane.f32.xlu1 %v2677_v4 }
 0xd10   :  { %v2674_v21 = vsel %vm253_vm1, %v6038_v45, 0.0 }
 0xd11   :  { %2675 = vadd.xlane.f32.xlu0 %v2674_v21 }
 0xd20   :  { %3065 = vrot.lane.b32.xlu1 %v5818_v63, %s5013_s29 }
 0xd27   :  { %3067 = vrot.lane.b32.xlu0 %v5814_v10, %s5013_s29 }
 0xd30   :  { %v2637_v19 = vpop.xlane.xlu1 %2636 }
 0xd31   :  { %4890 = vrcp.f32 %v2637_v19  ;;  %v4128_v19 = vld [vmem:[%s6460_s4 + $0x60] sm:$0xff] }
 0xd32   :  { %v2634_v5 = vpop.xlane.xlu0 %2633 }
 0xd33   :  { %4892 = vrcp.f32 %v2634_v5  ;;  %v4127_v5 = vld [vmem:[%s6460_s4 + $0x58] sm:$0xff] }
 0xd34   :  { %v2643_v15 = vpop.xlane.xlu1 %2642 }
 0xd35   :  { %4894 = vrcp.f32 %v2643_v15  ;;  %v4126_v15 = vld [vmem:[%s6460_s4 + $0x50] sm:$0xff] }
 0xd36   :  { %v2640_v58 = vpop.xlane.xlu0 %2639 }
 0xd37   :  { %4896 = vrcp.f32 %v2640_v58  ;;  %v4125_v58 = vld [vmem:[%s6460_s4 + $0x48] sm:$0xff] }
 0xd38   :  { %v2649_v13 = vpop.xlane.xlu1 %2648 }
 0xd39   :  { %4898 = vrcp.f32 %v2649_v13  ;;  %v4124_v13 = vld [vmem:[%s6460_s4 + $0x40] sm:$0xff] }
 0xd3b   :  { %v2646_v16 = vpop.xlane.xlu0 %2645 }
 0xd3c   :  { %4900 = vrcp.f32 %v2646_v16 }
 0xd3e   :  { %v4891_v62 = vpop.eup %4890 }
 0xd3f   :  { %v2697_v2 = vmul.f32 %v4891_v62, %v5968_v54 }
 0xd40   :  { %v4893_v25 = vpop.eup %4892 }
 0xd41   :  { %v2696_v63 = vmul.f32 %v4893_v25, %v5970_v44 }
 0xd42   :  { %v4895_v10 = vpop.eup %4894 }
 0xd43   :  { %4609 = vmatprep.mubr.msk.f32.mxu1 %vm253_vm1, %v2696_v63  ;;  %v2699_v6 = vmul.f32 %v4895_v10, %v5974_v35 }
 0xd44   :  { %v4897_v8 = vpop.eup %4896  ;;  %4610 = vmatmul.mubr.msk.f32.vlgmr.msra.gmra.mxu1 %vm253_vm1, %v2697_v2 }
 0xd45   :  { %4626 = vmatpush3.msra.mxu1 %v2953_v48  ;;  %v2698_v22 = vmul.f32 %v4897_v8, %v5978_v38 }
 0xd46   :  { %4627 = vmatprep.subr.mxu1 %v2951_v27  ;;  %v4899_v12 = vpop.eup %4898 }
 0xd47   :  { %4628 = vmatpush3.msra.mxu1 %v2951_v27  ;;  %4612 = vmatprep.mubr.msk.f32.mxu1 %vm253_vm1, %v2698_v22  ;;  %v2701_v26 = vmul.f32 %v4899_v12, %v5982_v60  ;;  %v4129_v27 = vld [vmem:[%s6460_s4 + $0x68] sm:$0xff] }
 0xd48   :  { %4613 = vmatmul.mubr.msk.f32.gmra.mxu1 %vm253_vm1, %v2699_v6 }
 0xd49   :  { %v4901_v44 = vpop.eup %4900 }
 0xd4a   :  { %v2700_v54 = vmul.f32 %v4901_v44, %v5988_v24 }
 0xd4c   :  { %4619 = vmatprep.mubr.msk.f32.mxu0 %vm253_vm1, %v2700_v54 }
 0xd4d   :  { %4620 = vmatmul.mubr.msk.f32.vlgmr.msra.gmra.mxu0 %vm253_vm1, %v2701_v26 }
 0xd5d   :  { %v2655_v7 = vpop.xlane.xlu1 %2654 }
 0xd5e   :  { %4902 = vrcp.f32 %v2655_v7 }
 0xd5f   :  { %v2652_v38 = vpop.xlane.xlu0 %2651 }
 0xd60   :  { %4904 = vrcp.f32 %v2652_v38 }
 0xd64   :  { %v2661_v35 = vpop.xlane.xlu1 %2660 }
 0xd65   :  { %4906 = vrcp.f32 %v2661_v35 }
 0xd66   :  { %v2658_v42 = vpop.xlane.xlu0 %2657 }
 0xd67   :  { %4908 = vrcp.f32 %v2658_v42 }
 0xd68   :  { %v2667_v28 = vpop.xlane.xlu1 %2666 }
 0xd69   :  { %4910 = vrcp.f32 %v2667_v28 }
 0xd6a   :  { %v2664_v18 = vpop.xlane.xlu0 %2663 }
 0xd6b   :  { %4912 = vrcp.f32 %v2664_v18  ;;  %v4903_v31 = vpop.eup %4902 }
 0xd6c   :  { %v2703_v14 = vmul.f32 %v4903_v31, %v5999_v11 }
 0xd6d   :  { %v4905_v24 = vpop.eup %4904 }
 0xd6e   :  { %v2670_v55 = vpop.xlane.xlu0 %2669  ;;  %v2702_v60 = vmul.f32 %v4905_v24, %v6004_v33 }
 0xd6f   :  { %4914 = vrcp.f32 %v2670_v55 }
 0xd70   :  { %4622 = vmatprep.mubr.msk.f32.mxu0 %vm253_vm1, %v2702_v60 }
 0xd71   :  { %4623 = vmatmul.mubr.msk.f32.gmra.mxu0 %vm253_vm1, %v2703_v14 }
 0xd72   :  { %v4907_v29 = vpop.eup %4906 }
 0xd73   :  { %v2705_v49 = vmul.f32 %v4907_v29, %v6008_v51  ;;  %v2673_v51 = vpop.xlane.xlu1 %2672 }
 0xd74   :  { %v4909_v9 = vpop.eup %4908  ;;  %4916 = vrcp.f32 %v2673_v51  ;;  %v4159_v51 = vld [vmem:[%s6462_s6 + $0x168] sm:$0xff] }
 0xd75   :  { %v2704_v32 = vmul.f32 %v4909_v9, %v6012_v36 }
 0xd76   :  { %v4911_v34 = vpop.eup %4910 }
 0xd77   :  { %4629 = vmatprep.mubr.msk.f32.mxu1 %vm253_vm1, %v2704_v32  ;;  %v2707_v11 = vmul.f32 %v4911_v34, %v6016_v39 }
 0xd78   :  { %v4913_v17 = vpop.eup %4912  ;;  %4630 = vmatmul.mubr.msk.f32.vlgmr.msra.gmra.mxu1 %vm253_vm1, %v2705_v49 }
 0xd79   :  { %v2706_v33 = vmul.f32 %v4913_v17, %v6020_v0 }
 0xd7b   :  { %4632 = vmatprep.mubr.msk.f32.mxu1 %vm253_vm1, %v2706_v33 }
 0xd7c   :  { %v4915_v1 = vpop.eup %4914  ;;  %4633 = vmatmul.mubr.msk.f32.gmra.mxu1 %vm253_vm1, %v2707_v11 }
 0xd7d   :  { %v2708_v47 = vmul.f32 %v4915_v1, %v6028_v50 }
 0xd7f   :  { %4639 = vmatprep.mubr.msk.f32.mxu0 %vm253_vm1, %v2708_v47 }
 0xd81   :  { %v4917_v40 = vpop.eup %4916 }
 0xd82   :  { %v2709_v39 = vmul.f32 %v4917_v40, %v6024_v41  ;;  %v4131_v41 = vld [vmem:[%s6460_s4 + $0x78] sm:$0xff]  ;;  %v4158_v40 = vld [vmem:[%s6462_s6 + $0x160] sm:$0xff] }
 0xd83   :  { %4645 = vmatprep.subr.mxu1 %v4131_v41 }
 0xd84   :  { %4646 = vmatpush3.msra.mxu1 %v4131_v41  ;;  %v4147_v41 = vld [vmem:[%s6462_s6 + $0x108] sm:$0xff] }
 0xd85   :  { %4647 = vmatprep.subr.mxu1 %v4130_v56 }
 0xd86   :  { %4648 = vmatpush3.msra.mxu1 %v4130_v56  ;;  %v4149_v56 = vld [vmem:[%s6462_s6 + $0x118] sm:$0xff] }
 0xd87   :  { %4649 = vmatprep.subr.mxu1 %v4129_v27 }
 0xd88   :  { %4650 = vmatpush3.msra.mxu1 %v4129_v27  ;;  %v4139_v27 = vld [vmem:[%s6462_s6 + $0xc8] sm:$0xff] }
 0xd89   :  { %4651 = vmatprep.subr.mxu1 %v4128_v19 }
 0xd8a   :  { %4652 = vmatpush3.msra.mxu1 %v4128_v19  ;;  %v4138_v19 = vld [vmem:[%s6462_s6 + $0xc0] sm:$0xff] }
 0xd8b   :  { %4653 = vmatprep.subr.mxu1 %v4127_v5 }
 0xd8c   :  { %4654 = vmatpush3.msra.mxu1 %v4127_v5  ;;  %v4140_v5 = vld [vmem:[%s6462_s6 + $0xd0] sm:$0xff] }
 0xd8d   :  { %4655 = vmatprep.subr.mxu1 %v4126_v15 }
 0xd8e   :  { %4656 = vmatpush3.msra.mxu1 %v4126_v15 }
 0xd8f   :  { %4657 = vmatprep.subr.mxu1 %v4125_v58 }
 0xd90   :  { %4658 = vmatpush3.msra.mxu1 %v4125_v58 }
 0xd91   :  { %4659 = vmatprep.subr.mxu1 %v4124_v13 }
 0xd92   :  { %4660 = vmatpush3.msra.mxu1 %v4124_v13 }
 0xd98   :  { %v2679_v36 = vpop.xlane.xlu1 %2678 }
 0xd99   :  { %4918 = vrcp.f32 %v2679_v36  ;;  %v4157_v36 = vld [vmem:[%s6462_s6 + $0x158] sm:$0xff] }
 0xd9a   :  { %v2676_v46 = vpop.xlane.xlu0 %2675 }
 0xd9b   :  { %4920 = vrcp.f32 %v2676_v46  ;;  %v4156_v46 = vld [vmem:[%s6462_s6 + $0x150] sm:$0xff] }
 0xd9c   :  { %v3066_v0 = vpop.permute.xlu1 %3065 }
 0xd9e   :  { %v3068_v43 = vpop.permute.xlu0 %3067 }
 0xd9f   :  { %4635 = vmatprep.subr.mxu0 %v3068_v43 }
 0xda0   :  { %4636 = vmatpush3.msra.mxu0 %v3068_v43  ;;  %v4154_v43 = vld [vmem:[%s6462_s6 + $0x140] sm:$0xff] }
 0xda1   :  { %4637 = vmatprep.subr.mxu0 %v3066_v0 }
 0xda2   :  { %4638 = vmatpush3.msra.mxu0 %v3066_v0  ;;  %v4153_v0 = vld [vmem:[%s6462_s6 + $0x138] sm:$0xff] }
 0xda3   :  { %4640 = vmatmul.mubr.msk.f32.vlgmr.msra.gmra.mxu0 %vm253_vm1, %v2709_v39  ;;  %v4155_v39 = vld [vmem:[%s6462_s6 + $0x148] sm:$0xff] }
 0xda6   :  { %v4919_v50 = vpop.eup %4918 }
 0xda7   :  { %v2711_v52 = vmul.f32 %v4919_v50, %v6034_v61  ;;  %v4151_v50 = vld [vmem:[%s6462_s6 + $0x128] sm:$0xff] }
 0xda8   :  { %v4921_v3 = vpop.eup %4920 }
 0xda9   :  { %v2710_v53 = vmul.f32 %v4921_v3, %v6038_v45  ;;  %v4150_v3 = vld [vmem:[%s6462_s6 + $0x120] sm:$0xff] }
 0xdab   :  { %4642 = vmatprep.mubr.msk.f32.mxu0 %vm253_vm1, %v2710_v53  ;;  %v4152_v53 = vld [vmem:[%s6462_s6 + $0x130] sm:$0xff] }
 0xdac   :  { %4643 = vmatmul.mubr.msk.f32.gmra.mxu0 %vm253_vm1, %v2711_v52  ;;  %v4148_v52 = vld [vmem:[%s6462_s6 + $0x110] sm:$0xff] }
 0xdad   :  { %3447 = vmatprep.mubr.f32.mxu0 %v5014_v57 }
 0xe04   :  { %v4611_v59 = vpop.f32.mrf.mxu1 }
 0xe05   :  { %2816 = vst.msk [vmem:[#allocation2 + $0x8] sm:$0xff] %vm253_vm1, %v4611_v59  ;;  %v4145_v59 = vld [vmem:[%s6462_s6 + $0xf8] sm:$0xff] }
 0xe06   :  { %v2796_v48 = vpop.f32.mrf.mxu1 }
 0xe07   :  { %2815 = vst.msk [vmem:[#allocation2] sm:$0xff] %vm253_vm1, %v2796_v48  ;;  %v4144_v48 = vld [vmem:[%s6462_s6 + $0xf0] sm:$0xff] }
 0xe08   :  { %v4614_v61 = vpop.f32.mrf.mxu1 }
 0xe09   :  { %2821 = vrot.lane.b32.xlu1 %v4614_v61, %s5013_s29  ;;  %v4146_v61 = vld [vmem:[%s6462_s6 + $0x100] sm:$0xff] }
 0xe0a   :  { %v2806_v4 = vpop.f32.mrf.mxu1 }
 0xe0b   :  { %2819 = vrot.lane.b32.xlu0 %v2806_v4, %s5013_s29  ;;  %v4142_v4 = vld [vmem:[%s6462_s6 + $0xe0] sm:$0xff] }
 0xe0d   :  { %v4621_v45 = vpop.f32.mrf.mxu0 }
 0xe0e   :  { %2934 = vrot.lane.b32.xlu1 %v4621_v45, %s5012_s28  ;;  %v4141_v45 = vld [vmem:[%s6462_s6 + $0xd8] sm:$0xff] }
 0xe0f   :  { %v2911_v21 = vpop.f32.mrf.mxu0 }
 0xe10   :  { %2932 = vrot.lane.b32.xlu0 %v2911_v21, %s5012_s28  ;;  %v4143_v21 = vld [vmem:[%s6462_s6 + $0xe8] sm:$0xff] }
 0xe31   :  { %v4624_v16 = vpop.f32.mrf.mxu0 }
 0xe32   :  { %2944 = vrot.lane.b32.xlu1 %v4624_v16, %s5009_s22 }
 0xe33   :  { %v2921_v62 = vpop.f32.mrf.mxu0 }
 0xe34   :  { %2942 = vrot.lane.b32.xlu0 %v2921_v62, %s5009_s22 }
 0xe38   :  { %v4631_v25 = vpop.f32.mrf.mxu1 }
 0xe39   :  { %3054 = vst.msk [vmem:[#allocation2 + $0x18] sm:$0xff] %vm253_vm1, %v4631_v25 }
 0xe3a   :  { %v3034_v63 = vpop.f32.mrf.mxu1 }
 0xe3b   :  { %3053 = vst.msk [vmem:[#allocation2 + $0x10] sm:$0xff] %vm253_vm1, %v3034_v63  ;;  %vm3982_vm1 = vcmask 254976  }
 0xe3c   :  { %v4634_v2 = vpop.f32.mrf.mxu1 }
 0xe3d   :  { %3059 = vrot.lane.b32.xlu1 %v4634_v2, %s5013_s29 }
 0xe3e   :  { %v3044_v10 = vpop.f32.mrf.mxu1 }
 0xe3f   :  { %3057 = vrot.lane.b32.xlu0 %v3044_v10, %s5013_s29 }
 0xe63   :  { %v4641_v8 = vpop.f32.mrf.mxu0 }
 0xe64   :  { %3172 = vrot.lane.b32.xlu1 %v4641_v8, %s5012_s28 }
 0xe65   :  { %v3149_v22 = vpop.f32.mrf.mxu0 }
 0xe66   :  { %3170 = vrot.lane.b32.xlu0 %v3149_v22, %s5012_s28 }
 0xe6c   :  { %v4644_v6 = vpop.f32.mrf.mxu0 }
 0xe6d   :  { %3182 = vrot.lane.b32.xlu1 %v4644_v6, %s5009_s22 }
 0xe6e   :  { %v3159_v12 = vpop.f32.mrf.mxu0 }
 0xe6f   :  { %3180 = vrot.lane.b32.xlu0 %v3159_v12, %s5009_s22 }
 0xe7b   :  { %v2822_v44 = vpop.permute.xlu1 %2821 }
 0xe7c   :  { %2826 = vst.msk [vmem:[#allocation2 + $0x8] sm:$0xff] %vm981_vm10, %v2822_v44 }
 0xe7d   :  { %v2820_v54 = vpop.permute.xlu0 %2819 }
 0xe7e   :  { %2825 = vst.msk [vmem:[#allocation2] sm:$0xff] %vm981_vm10, %v2820_v54 }
 0xe80   :  { %v2935_v26 = vpop.permute.xlu1 %2934 }
 0xe81   :  { %2939 = vst.msk [vmem:[#allocation2 + $0x8] sm:$0xff] %vm1095_vm11, %v2935_v26 }
 0xe82   :  { %v2933_v7 = vpop.permute.xlu0 %2932 }
 0xe83   :  { %2938 = vst.msk [vmem:[#allocation2] sm:$0xff] %vm1095_vm11, %v2933_v7  ;;  %v4137_v7 = vld [vmem:[%s6461_s5 + $0x1] ss:$0 sm:$0xff] }
 0xea4   :  { %v2945_v38 = vpop.permute.xlu1 %2944 }
 0xea5   :  { %2949 = vst.msk [vmem:[#allocation2 + $0x8] sm:$0xff] %vm1106_vm12, %v2945_v38 }
 0xea6   :  { %v2943_v35 = vpop.permute.xlu0 %2942 }
 0xea7   :  { %2948 = vst.msk [vmem:[#allocation2] sm:$0xff] %vm1106_vm12, %v2943_v35 }
 0xeac   :  { %v3189_v18 = vld [vmem:[#allocation2 + $0x8] sm:$0xff] }
 0xeae   :  { %v3188_v42 = vld [vmem:[#allocation2] sm:$0xff] }
 0xeaf   :  { %v3060_v28 = vpop.permute.xlu1 %3059  ;;  %4661 = vmatprep.mubr.msk.f32.mxu1 %vm98_vm0, %v3188_v42 }
 0xeb0   :  { %3064 = vst.msk [vmem:[#allocation2 + $0x18] sm:$0xff] %vm981_vm10, %v3060_v28  ;;  %4662 = vmatmul.mubr.msk.f32.vlgmr.msra.gmra.mxu1 %vm98_vm0, %v3189_v18 }
 0xeb1   :  { %v3058_v31 = vpop.permute.xlu0 %3057 }
 0xeb2   :  { %3063 = vst.msk [vmem:[#allocation2 + $0x10] sm:$0xff] %vm981_vm10, %v3058_v31 }
 0xed6   :  { %v3173_v24 = vpop.permute.xlu1 %3172 }
 0xed7   :  { %3177 = vst.msk [vmem:[#allocation2 + $0x18] sm:$0xff] %vm1095_vm11, %v3173_v24 }
 0xed8   :  { %v3171_v55 = vpop.permute.xlu0 %3170 }
 0xed9   :  { %3176 = vst.msk [vmem:[#allocation2 + $0x10] sm:$0xff] %vm1095_vm11, %v3171_v55 }
 0xedf   :  { %v3183_v60 = vpop.permute.xlu1 %3182 }
 0xee0   :  { %3187 = vst.msk [vmem:[#allocation2 + $0x18] sm:$0xff] %vm1106_vm12, %v3183_v60 }
 0xee1   :  { %v3181_v14 = vpop.permute.xlu0 %3180 }
 0xee2   :  { %3186 = vst.msk [vmem:[#allocation2 + $0x10] sm:$0xff] %vm1106_vm12, %v3181_v14 }
 0xee7   :  { %v3191_v9 = vld [vmem:[#allocation2 + $0x18] sm:$0xff] }
 0xee9   :  { %v3190_v29 = vld [vmem:[#allocation2 + $0x10] sm:$0xff] }
 0xeea   :  { %4664 = vmatprep.mubr.msk.f32.mxu1 %vm98_vm0, %v3190_v29 }
 0xeeb   :  { %4665 = vmatmul.mubr.msk.f32.gmra.mxu1 %vm98_vm0, %v3191_v9 }
 0xf70   :  { %v4663_v32 = vpop.f32.mrf.mxu1 }
 0xf71   :  { %v6136_v49 = vadd.f32 %v4663_v32, %v5756_v23  ;;  %v4160_v23 = vld [vmem:[%s6462_s6 + $0x170] sm:$0xff] }
 0xf72   :  { %v3279_v34 = vpop.f32.mrf.mxu1  ;;  %3399 = vmatprep.subr.mxu0 %v4160_v23  ;;  %v4188_v23 = vld [vmem:[%s6463_s7 + $0x110] sm:$0xff] }
 0xf73   :  { %v3305_v17 = vmul.f32 %v6136_v49, %v6136_v49  ;;  %v6141_v33 = vadd.f32 %v3279_v34, %v5750_v20  ;;  %v4161_v20 = vld [vmem:[%s6462_s6 + $0x178] sm:$0xff]  ;;  %3400 = vmatpush1.msra.mxu0 %v4159_v51  ;;  %v4187_v51 = vld [vmem:[%s6463_s7 + $0x108] sm:$0xff] }
 0xf74   :  { %4667 = vmatprep.subr.mxu1 %v4161_v20  ;;  %3401 = vmatprep.subr.mxu0 %v4157_v36  ;;  %v4193_v34 = vld [vmem:[%s6463_s7 + $0x138] sm:$0xff] }
 0xf75   :  { %v3311_v11 = vsel %vm98_vm0, %v3305_v17, 0.0  ;;  %v3304_v1 = vmul.f32 %v6141_v33, %v6141_v33  ;;  %4668 = vmatpush3.msra.mxu1 %v4161_v20  ;;  %3402 = vmatpush1.msra.mxu0 %v4156_v46  ;;  %v4192_v17 = vld [vmem:[%s6463_s7 + $0x130] sm:$0xff]  ;;  %v4186_v20 = vld [vmem:[%s6463_s7 + $0x100] sm:$0xff]  ;;  %v4185_v36 = vld [vmem:[%s6463_s7 + $0xf8] sm:$0xff] }
 0xf76   :  { %3312 = vadd.xlane.f32.xlu1 %v3311_v11  ;;  %4669 = vmatprep.subr.mxu1 %v4158_v40  ;;  %v4191_v11 = vld [vmem:[%s6463_s7 + $0x128] sm:$0xff]  ;;  %v4184_v46 = vld [vmem:[%s6463_s7 + $0xf0] sm:$0xff] }
 0xf77   :  { %v3308_v47 = vsel %vm98_vm0, %v3304_v1, 0.0  ;;  %3403 = vmatprep.subr.mxu0 %v4154_v43  ;;  %4670 = vmatpush3.msra.mxu1 %v4158_v40  ;;  %v4190_v1 = vld [vmem:[%s6463_s7 + $0x120] sm:$0xff]  ;;  %v4183_v40 = vld [vmem:[%s6463_s7 + $0xe8] sm:$0xff] }
 0xf78   :  { %3309 = vadd.xlane.f32.xlu0 %v3308_v47  ;;  %3404 = vmatpush1.msra.mxu0 %v4153_v0  ;;  %v4189_v47 = vld [vmem:[%s6463_s7 + $0x118] sm:$0xff]  ;;  %v4182_v43 = vld [vmem:[%s6463_s7 + $0xe0] sm:$0xff] }
 0xf79   :  { %4671 = vmatprep.subr.mxu1 %v4155_v39  ;;  %3405 = vmatprep.subr.mxu0 %v4151_v50  ;;  %v4181_v0 = vld [vmem:[%s6463_s7 + $0xd8] sm:$0xff]  ;;  %v4179_v50 = vld [vmem:[%s6463_s7 + $0xc8] sm:$0xff] }
 0xf7a   :  { %4672 = vmatpush3.msra.mxu1 %v4155_v39  ;;  %3406 = vmatpush1.msra.mxu0 %v4150_v3  ;;  %v4180_v39 = vld [vmem:[%s6463_s7 + $0xd0] sm:$0xff]  ;;  %v4178_v3 = vld [vmem:[%s6463_s7 + $0xc0] sm:$0xff] }
 0xf7b   :  { %4673 = vmatprep.subr.mxu1 %v4152_v53  ;;  %3407 = vmatprep.subr.mxu0 %v4148_v52  ;;  %v4200_v52 = vld [vmem:[%s6463_s7 + $0x170] sm:$0xff] }
 0xf7c   :  { %4674 = vmatpush3.msra.mxu1 %v4152_v53  ;;  %3408 = vmatpush1.msra.mxu0 %v4147_v41  ;;  %v4201_v53 = vld [vmem:[%s6463_s7 + $0x178] sm:$0xff]  ;;  %v4199_v41 = vld [vmem:[%s6463_s7 + $0x168] sm:$0xff] }
 0xf7d   :  { %4675 = vmatprep.subr.mxu1 %v4149_v56  ;;  %3409 = vmatprep.subr.mxu0 %v4145_v59  ;;  %v4197_v59 = vld [vmem:[%s6463_s7 + $0x158] sm:$0xff] }
 0xf7e   :  { %4676 = vmatpush3.msra.mxu1 %v4149_v56  ;;  %3410 = vmatpush1.msra.mxu0 %v4144_v48  ;;  %v4198_v56 = vld [vmem:[%s6463_s7 + $0x160] sm:$0xff]  ;;  %v4196_v48 = vld [vmem:[%s6463_s7 + $0x150] sm:$0xff] }
 0xf7f   :  { %4677 = vmatprep.subr.mxu1 %v4146_v61  ;;  %3411 = vmatprep.subr.mxu0 %v4142_v4  ;;  %v4194_v4 = vld [vmem:[%s6463_s7 + $0x140] sm:$0xff] }
 0xf80   :  { %4678 = vmatpush3.msra.mxu1 %v4146_v61  ;;  %3412 = vmatpush1.msra.mxu0 %v4141_v45  ;;  %v4195_v61 = vld [vmem:[%s6463_s7 + $0x148] sm:$0xff] }
 0xf81   :  { %4679 = vmatprep.subr.mxu1 %v4143_v21  ;;  %3413 = vmatprep.subr.mxu0 %v4139_v27 }
 0xf82   :  { %4680 = vmatpush3.msra.mxu1 %v4143_v21  ;;  %3414 = vmatpush1.msra.mxu0 %v4138_v19 }
 0xf83   :  { %4681 = vmatprep.subr.mxu1 %v4140_v5  ;;  %3694 = vmatprep.subr.mxu0 %v5014_v57 }
 0xf84   :  { %4682 = vmatpush3.msra.mxu1 %v4140_v5 }
 0xf85   :  { %4689 = vmatprep.subr.mxu1 %v5014_v57 }
 0xfab   :  { %v4666_v15 = vpop.f32.mrf.mxu1 }
 0xfac   :  { %v3301_v13 = vadd.f32 %v4666_v15, %v5791_v37 }
 0xfad   :  { %v3289_v58 = vpop.f32.mrf.mxu1 }
 0xfae   :  { %v6223_v16 = vadd.f32 %v3289_v58, %v5786_v30  ;;  %v3307_v25 = vmul.f32 %v3301_v13, %v3301_v13 }
 0xfb0   :  { %v3306_v62 = vmul.f32 %v6223_v16, %v6223_v16  ;;  %v3317_v2 = vsel %vm98_vm0, %v3307_v25, 0.0 }
 0xfb2   :  { %v3314_v63 = vsel %vm98_vm0, %v3306_v62, 0.0 }
 0xfb3   :  { %3315 = vadd.xlane.f32.xlu0 %v3314_v63 }
 0xfb7   :  { %3318 = vadd.xlane.f32.xlu0 %v3317_v2 }
 0xfff   :  { %v3313_v10 = vpop.xlane.xlu1 %3312 }
0x1000   :  { %v3321_v8 = vmul.f32 0.015625, %v3313_v10 }
0x1001   :  { %v3310_v22 = vpop.xlane.xlu0 %3309 }
0x1002   :  { %v3325_v6 = vadd.f32 1e-06, %v3321_v8  ;;  %v3320_v12 = vmul.f32 0.015625, %v3310_v22 }
0x1004   :  { %4922 = vrsqrt.f32 %v3325_v6  ;;  %v3324_v37 = vadd.f32 1e-06, %v3320_v12 }
0x1006   :  { %4924 = vrsqrt.f32 %v3324_v37 }
0x1011   :  { %v4923_v30 = vpop.eup %4922 }
0x1012   :  { %v3333_v54 = vmul.f32 %v4923_v30, %v6136_v49 }
0x1013   :  { %v4925_v44 = vpop.eup %4924 }
0x1014   :  { %v3332_v26 = vmul.f32 %v4925_v44, %v6141_v33  ;;  %v3343_v35 = vmul.f32 %v4137_v7, %v3333_v54 }
0x1016   :  { %v3342_v38 = vmul.f32 %v4137_v7, %v3332_v26 }
0x1018   :  { %4162 = vmatmul.mubr.msk.f32.vlgmr.msra.gmra.mxu0 %vm98_vm0, %v3342_v38  ;;  %4683 = vmatprep.mubr.msk.f32.mxu1 %vm98_vm0, %v3342_v38 }
0x1019   :  { %4684 = vmatmul.mubr.msk.f32.vlgmr.msra.gmra.mxu1 %vm98_vm0, %v3343_v35  ;;  %3453 = vmatprep.mubr.f32.mxu0 %v5014_v57 }
0x101a   :  { %3695 = vmatpush1.msra.mxu0 %v4193_v34 }
0x101b   :  { %3696 = vmatprep.subr.mxu0 %v5014_v57 }
0x101c   :  { %4163 = vmatmul.mubr.msk.f32.gmra.mxu0 %vm98_vm0, %v3343_v35 }
0x101d   :  { %3459 = vmatprep.mubr.f32.mxu0 %v5014_v57  ;;  %3697 = vmatpush1.msra.mxu0 %v4192_v17 }
0x101e   :  { %3698 = vmatprep.subr.mxu0 %v5014_v57 }
0x101f   :  { %3699 = vmatpush1.msra.mxu0 %v4191_v11 }
0x1020   :  { %3700 = vmatprep.subr.mxu0 %v5014_v57 }
0x1021   :  { %3701 = vmatpush1.msra.mxu0 %v4190_v1 }
0x1022   :  { %3702 = vmatprep.subr.mxu0 %v5014_v57 }
0x1023   :  { %3703 = vmatpush1.msra.mxu0 %v4189_v47 }
0x1024   :  { %3704 = vmatprep.subr.mxu0 %v5014_v57 }
0x1025   :  { %3705 = vmatpush1.msra.mxu0 %v4188_v23 }
0x1026   :  { %3706 = vmatprep.subr.mxu0 %v5014_v57 }
0x1027   :  { %3707 = vmatpush1.msra.mxu0 %v4187_v51 }
0x1028   :  { %3708 = vmatprep.subr.mxu0 %v5014_v57 }
0x1029   :  { %3709 = vmatpush1.msra.mxu0 %v4186_v20 }
0x102a   :  { %3710 = vmatprep.subr.mxu0 %v5014_v57 }
0x102b   :  { %3711 = vmatpush1.msra.mxu0 %v4185_v36 }
0x102c   :  { %3712 = vmatprep.subr.mxu0 %v5014_v57 }
0x102d   :  { %3713 = vmatpush1.msra.mxu0 %v4184_v46 }
0x102e   :  { %3714 = vmatprep.subr.mxu0 %v5014_v57 }
0x102f   :  { %3715 = vmatpush1.msra.mxu0 %v4183_v40 }
0x1030   :  { %3716 = vmatprep.subr.mxu0 %v5014_v57 }
0x1031   :  { %3717 = vmatpush1.msra.mxu0 %v4182_v43 }
0x1032   :  { %3718 = vmatprep.subr.mxu0 %v5014_v57 }
0x1033   :  { %3719 = vmatpush1.msra.mxu0 %v4181_v0 }
0x1034   :  { %3720 = vmatprep.subr.mxu0 %v5014_v57 }
0x1035   :  { %3721 = vmatpush1.msra.mxu0 %v4180_v39 }
0x1036   :  { %3722 = vmatprep.subr.mxu0 %v5014_v57 }
0x1037   :  { %3723 = vmatpush1.msra.mxu0 %v4179_v50 }
0x1038   :  { %3724 = vmatprep.subr.mxu0 %v5014_v57 }
0x1039   :  { %3725 = vmatpush1.msra.mxu0 %v4178_v3 }
0x103a   :  { %3742 = vmatprep.subr.mxu0 %v5014_v57 }
0x103b   :  { %3743 = vmatpush2.msra.mxu0 %v4201_v53 }
0x103c   :  { %v3316_v42 = vpop.xlane.xlu0 %3315  ;;  %3744 = vmatprep.subr.mxu0 %v5014_v57 }
0x103d   :  { %v3322_v28 = vmul.f32 0.015625, %v3316_v42  ;;  %3745 = vmatpush2.msra.mxu0 %v4200_v52 }
0x103e   :  { %3746 = vmatprep.subr.mxu0 %v5014_v57 }
0x103f   :  { %v3326_v18 = vadd.f32 1e-06, %v3322_v28  ;;  %3747 = vmatpush2.msra.mxu0 %v4199_v41 }
0x1040   :  { %v3319_v31 = vpop.xlane.xlu0 %3318  ;;  %3748 = vmatprep.subr.mxu0 %v5014_v57 }
0x1041   :  { %4926 = vrsqrt.f32 %v3326_v18  ;;  %v3323_v24 = vmul.f32 0.015625, %v3319_v31  ;;  %3749 = vmatpush2.msra.mxu0 %v4198_v56 }
0x1042   :  { %3750 = vmatprep.subr.mxu0 %v5014_v57 }
0x1043   :  { %v3327_v55 = vadd.f32 1e-06, %v3323_v24  ;;  %3751 = vmatpush2.msra.mxu0 %v4197_v59 }
0x1044   :  { %3752 = vmatprep.subr.mxu0 %v5014_v57 }
0x1045   :  { %4928 = vrsqrt.f32 %v3327_v55  ;;  %3753 = vmatpush2.msra.mxu0 %v4196_v48 }
0x1046   :  { %3754 = vmatprep.subr.mxu0 %v5014_v57 }
0x1047   :  { %3755 = vmatpush2.msra.mxu0 %v4195_v61 }
0x1048   :  { %3756 = vmatprep.subr.mxu0 %v5014_v57 }
0x1049   :  { %3757 = vmatpush2.msra.mxu0 %v4194_v4 }
0x104e   :  { %v4927_v60 = vpop.eup %4926 }
0x104f   :  { %v3334_v14 = vmul.f32 %v4927_v60, %v6223_v16 }
0x1051   :  { %v3344_v29 = vmul.f32 %v4137_v7, %v3334_v14 }
0x1052   :  { %v4929_v9 = vpop.eup %4928 }
0x1053   :  { %4164 = vmatmul.mubr.msk.f32.gmra.mxu0 %vm98_vm0, %v3344_v29  ;;  %4686 = vmatprep.mubr.msk.f32.mxu1 %vm98_vm0, %v3344_v29  ;;  %v3335_v32 = vmul.f32 %v4929_v9, %v3301_v13 }
0x1054   :  { %3465 = vmatprep.mubr.f32.mxu0 %v5014_v57 }
0x1055   :  { %v3345_v49 = vmul.f32 %v4137_v7, %v3335_v32 }
0x1057   :  { %4165 = vmatmul.mubr.msk.f32.gmra.mxu0 %vm98_vm0, %v3345_v49  ;;  %4687 = vmatmul.mubr.msk.f32.gmra.mxu1 %vm98_vm0, %v3345_v49 }
0x1058   :  { %4705 = vmatprep.mubr.msk.f32.mxu1 %vm5015_vm15, %v5014_v57 }
0x10d8   :  { %v3449_v45 = vpop.f32.mrf.mxu0 }
0x10d9   :  { %v4685_v21 = vpop.f32.mrf.mxu1  ;;  %v4170_v8 = vmul.f32 -1.442695, %v3449_v45 }
0x10da   :  { %3627 = vrot.lane.b32.xlu1 %v4685_v21, %s5008_s21  ;;  %v3451_v27 = vpop.f32.mrf.mxu0 }
0x10db   :  { %3621 = vrot.lane.b32.xlu0 %v3451_v27, %s5008_s21  ;;  %v3538_v19 = vpop.f32.mrf.mxu1  ;;  %v4171_v10 = vmul.f32 -1.442695, %v3451_v27 }
0x10dc   :  { %v3455_v5 = vpop.f32.mrf.mxu0 }
0x10dd   :  { %4930 = vpow2.f32 %v4171_v10  ;;  %v4172_v6 = vmul.f32 -1.442695, %v3455_v5 }
0x10de   :  { %3623 = vrot.lane.b32.xlu1 %v3538_v19, %s5008_s21  ;;  %v3457_v15 = vpop.f32.mrf.mxu0  ;;  %4932 = vpow2.f32 %v4170_v8 }
0x10df   :  { %v4173_v22 = vmul.f32 -1.442695, %v3457_v15 }
0x10e1   :  { %4934 = vpow2.f32 %v4173_v22 }
0x10e2   :  { %3625 = vrot.lane.b32.xlu1 %v3457_v15, %s5008_s21  ;;  %4936 = vpow2.f32 %v4172_v6 }
0x10ea   :  { %v4931_v12 = vpop.eup %4930 }
0x10eb   :  { %v4933_v37 = vpop.eup %4932  ;;  %v3582_v44 = vadd.f32 1.0, %v4931_v12 }
0x10ec   :  { %v3581_v54 = vadd.f32 1.0, %v4933_v37 }
0x10ed   :  { %4938 = vrcp.f32 %v3582_v44 }
0x10ee   :  { %v4935_v30 = vpop.eup %4934  ;;  %4940 = vrcp.f32 %v3581_v54 }
0x10ef   :  { %v4937_v26 = vpop.eup %4936  ;;  %v3584_v7 = vadd.f32 1.0, %v4935_v30 }
0x10f0   :  { %v3583_v38 = vadd.f32 1.0, %v4937_v26 }
0x10f1   :  { %4942 = vrcp.f32 %v3584_v7 }
0x10f2   :  { %4944 = vrcp.f32 %v3583_v38 }
0x10fa   :  { %v4939_v35 = vpop.eup %4938 }
0x10fb   :  { %v4941_v28 = vpop.eup %4940  ;;  %v3606_v31 = vmul.f32 %v4939_v35, %v3451_v27 }
0x10fc   :  { %v3605_v24 = vmul.f32 %v4941_v28, %v3449_v45  ;;  %v3805_v28 = vld [vmem:[%s6465_s9 + $0x20] sm:$0xff] }
0x10fe   :  { %v4943_v18 = vpop.eup %4942 }
0x10ff   :  { %v4945_v14 = vpop.eup %4944  ;;  %v3608_v29 = vmul.f32 %v4943_v18, %v3457_v15  ;;  %v3804_v18 = vld [vmem:[%s6465_s9 + $0x18] sm:$0xff] }
0x1100   :  { %v3607_v17 = vmul.f32 %v4945_v14, %v3455_v5 }
0x1113   :  { %v6345_v58 = vpop.f32.mrf.mxu0 }
0x1114   :  { %v4174_v51 = vmul.f32 -1.442695, %v6345_v58 }
0x1115   :  { %v6347_v13 = vpop.f32.mrf.mxu0 }
0x1116   :  { %3629 = vrot.lane.b32.xlu0 %v6347_v13, %s5008_s21  ;;  %v4175_v23 = vmul.f32 -1.442695, %v6347_v13 }
0x1117   :  { %v4688_v62 = vpop.f32.mrf.mxu1  ;;  %v6351_v25 = vpop.f32.mrf.mxu0 }
0x1118   :  { %4946 = vpow2.f32 %v4175_v23  ;;  %v4176_v36 = vmul.f32 -1.442695, %v6351_v25  ;;  %v3897_v23 = vld [vmem:[%s6467_s11 + $0x18] sm:$0xff] }
0x1119   :  { %v3548_v63 = vpop.f32.mrf.mxu1  ;;  %v6354_v2 = vpop.f32.mrf.mxu0  ;;  %4948 = vpow2.f32 %v4174_v51  ;;  %v3896_v51 = vld [vmem:[%s6467_s11 + $0x10] sm:$0xff] }
0x111a   :  { %3631 = vrot.lane.b32.xlu1 %v3548_v63, %s5008_s21  ;;  %v4177_v20 = vmul.f32 -1.442695, %v6354_v2 }
0x111c   :  { %4950 = vpow2.f32 %v4177_v20  ;;  %v3895_v20 = vld [vmem:[%s6467_s11 + $0x8] sm:$0xff] }
0x111d   :  { %4952 = vpow2.f32 %v4176_v36  ;;  %v3894_v36 = vld [vmem:[%s6467_s11] sm:$0xff] }
0x111e   :  { %3633 = vrot.lane.b32.xlu1 %v6354_v2, %s5008_s21 }
0x1122   :  { %3635 = vrot.lane.b32.xlu1 %v4688_v62, %s5008_s21 }
0x1125   :  { %v4947_v46 = vpop.eup %4946 }
0x1126   :  { %v4949_v40 = vpop.eup %4948  ;;  %v3586_v43 = vadd.f32 1.0, %v4947_v46  ;;  %v4207_v46 = vld [vmem:[%s6466_s10] ss:$0 sm:$0xff]  ;;  %s4982_s10 = scalar_lea.vmem %s3991_s26, 32 }
0x1127   :  { %v3585_v0 = vadd.f32 1.0, %v4949_v40  ;;  %p4983_p5 = scmp.ne.s32.totalorder %s3991_s26, %s4982_s10  ;;  %p4988_p7 = scmp.lt.s32.totalorder %s4982_s10, %s4982_s10 }
0x1128   :  { %4954 = vrcp.f32 %v3586_v43 }
0x1129   :  { %v4951_v39 = vpop.eup %4950  ;;  %4956 = vrcp.f32 %v3585_v0  ;;  %p4989_p8 = por %p4988_p7, %p4987_p6 }
0x112a   :  { %v4953_v50 = vpop.eup %4952  ;;  %v3588_v3 = vadd.f32 1.0, %v4951_v39 }
0x112b   :  { %v3587_v53 = vadd.f32 1.0, %v4953_v50  ;;  %p4990_p9 = pnand %p4989_p8, %p4983_p5 }
0x112c   :  { %4958 = vrcp.f32 %v3588_v3 }
0x112d   :  { %4960 = vrcp.f32 %v3587_v53 }
0x1135   :  { %v4955_v52 = vpop.eup %4954 }
0x1136   :  { %v4957_v41 = vpop.eup %4956  ;;  %v3610_v56 = vmul.f32 %v4955_v52, %v6347_v13 }
0x1137   :  { %v3609_v59 = vmul.f32 %v4957_v41, %v6345_v58 }
0x1139   :  { %v4959_v27 = vpop.eup %4958 }
0x113a   :  { %v4961_v5 = vpop.eup %4960  ;;  %v3612_v15 = vmul.f32 %v4959_v27, %v6354_v2 }
0x113b   :  { %v3611_v62 = vmul.f32 %v4961_v5, %v6351_v25 }
0x114c   :  { %v3628_v42 = vpop.permute.xlu1 %3627 }
0x114d   :  { %v3622_v55 = vpop.permute.xlu0 %3621  ;;  %v3652_v34 = vmul.f32 %v3628_v42, %v3608_v29 }
0x1150   :  { %v3624_v60 = vpop.permute.xlu1 %3623 }
0x1151   :  { %v3637_v9 = vsel %vm98_vm0, %v3622_v55, %v3624_v60  ;;  %v3650_v32 = vmul.f32 %v3624_v60, %v3606_v31  ;;  %v3803_v31 = vld [vmem:[%s6465_s9 + $0x10] sm:$0xff]  ;;  %v3801_v55 = vld [vmem:[%s6465_s9] sm:$0xff] }
0x1152   :  { %v3649_v49 = vmul.f32 %v3637_v9, %v3605_v24  ;;  %v3802_v24 = vld [vmem:[%s6465_s9 + $0x8] sm:$0xff] }
0x1153   :  { %4202 = vmatprep.mubr.msk.f32.mxu0 %vm98_vm0, %v3650_v32  ;;  %v4206_v32 = vld [vmem:[%s6464_s8] ss:$0 sm:$0xff] }
0x1154   :  { %v3626_v11 = vpop.permute.xlu1 %3625  ;;  %3759 = vmatmul.mubr.f32.vlgmr.msra.gmra.mxu0 %v3649_v49 }
0x1155   :  { %v3638_v1 = vsel %vm98_vm0, %v3626_v11, %v3628_v42  ;;  %4203 = vmatprep.mubr.msk.f32.mxu0 %vm98_vm0, %v3652_v34  ;;  %v3808_v42 = vld [vmem:[%s6465_s9 + $0x38] sm:$0xff]  ;;  %v3900_v11 = vld [vmem:[%s6467_s11 + $0x30] sm:$0xff] }
0x1156   :  { %v3651_v47 = vmul.f32 %v3638_v1, %v3607_v17  ;;  %4690 = vmatpush3.msra.mxu1 %v3808_v42  ;;  %v3901_v17 = vld [vmem:[%s6467_s11 + $0x38] sm:$0xff]  ;;  %v3899_v1 = vld [vmem:[%s6467_s11 + $0x28] sm:$0xff] }
0x1157   :  { %4691 = vmatprep.subr.mxu1 %v5014_v57 }
0x1158   :  { %3764 = vmatmul.mubr.f32.gmra.mxu0 %v3651_v47  ;;  %v3898_v47 = vld [vmem:[%s6467_s11 + $0x20] sm:$0xff] }
0x1188   :  { %v3630_v48 = vpop.permute.xlu0 %3629 }
0x118c   :  { %v3632_v61 = vpop.permute.xlu1 %3631 }
0x118d   :  { %v3639_v4 = vsel %vm98_vm0, %v3630_v48, %v3632_v61  ;;  %v3654_v45 = vmul.f32 %v3632_v61, %v3610_v56 }
0x118e   :  { %v3653_v21 = vmul.f32 %v3639_v4, %v3609_v59 }
0x118f   :  { %4204 = vmatprep.mubr.msk.f32.mxu0 %vm98_vm0, %v3654_v45 }
0x1190   :  { %v3634_v19 = vpop.permute.xlu1 %3633  ;;  %3768 = vmatmul.mubr.f32.gmra.mxu0 %v3653_v21 }
0x1194   :  { %v3636_v63 = vpop.permute.xlu1 %3635 }
0x1195   :  { %v3640_v13 = vsel %vm98_vm0, %v3634_v19, %v3636_v63  ;;  %v3656_v58 = vmul.f32 %v3636_v63, %v3612_v15 }
0x1196   :  { %v3655_v10 = vmul.f32 %v3640_v13, %v3611_v62 }
0x1197   :  { %4205 = vmatprep.mubr.msk.f32.mxu0 %vm98_vm0, %v3656_v58 }
0x1198   :  { %3773 = vmatmul.mubr.f32.gmra.mxu0 %v3655_v10 }
0x1214   :  { %v3760_v8 = vpop.f32.mrf.mxu0 }
0x1215   :  { %v3777_v37 = vadd.f32 %v3760_v8, %v6141_v33  ;;  %v3807_v33 = vld [vmem:[%s6465_s9 + $0x30] sm:$0xff] }
0x1216   :  { %v3762_v22 = vpop.f32.mrf.mxu0  ;;  %4692 = vmatpush3.msra.mxu1 %v3807_v33 }
0x1217   :  { %v3780_v44 = vrot.slane %v3777_v37, 1  ;;  %4693 = vmatprep.subr.mxu1 %v5014_v57 }
0x1218   :  { %v3765_v6 = vpop.f32.mrf.mxu0 }
0x121a   :  { %v3766_v12 = vpop.f32.mrf.mxu0 }
0x1250   :  { %v3769_v30 = vpop.f32.mrf.mxu0 }
0x1251   :  { %v3778_v2 = vadd.f32 %v3769_v30, %v6223_v16  ;;  %v3806_v16 = vld [vmem:[%s6465_s9 + $0x28] sm:$0xff] }
0x1252   :  { %v3771_v25 = vpop.f32.mrf.mxu0  ;;  %4694 = vmatpush3.msra.mxu1 %v3806_v16 }
0x1253   :  { %v3783_v54 = vsel %vm3782_vm13, %v3780_v44, %v3778_v2  ;;  %4695 = vmatprep.subr.mxu1 %v5014_v57 }
0x1254   :  { %v3785_v26 = vmul.f32 %v3783_v54, %v3783_v54  ;;  %4696 = vmatpush3.msra.mxu1 %v3805_v28 }
0x1255   :  { %4697 = vmatprep.subr.mxu1 %v5014_v57 }
0x1256   :  { %v3787_v7 = vsel %vm3786_vm14, %v3785_v26, 0.0  ;;  %4698 = vmatpush3.msra.mxu1 %v3804_v18 }
0x1257   :  { %3788 = vadd.xlane.f32.xlu0 %v3787_v7  ;;  %4699 = vmatprep.subr.mxu1 %v5014_v57 }
0x1258   :  { %v3774_v38 = vpop.f32.mrf.mxu0  ;;  %4700 = vmatpush3.msra.mxu1 %v3803_v31 }
0x1259   :  { %4701 = vmatprep.subr.mxu1 %v5014_v57 }
0x125a   :  { %v3775_v35 = vpop.f32.mrf.mxu0  ;;  %4702 = vmatpush3.msra.mxu1 %v3802_v24 }
0x125b   :  { %4703 = vmatprep.subr.mxu1 %v5014_v57 }
0x125c   :  { %4704 = vmatpush3.msra.mxu1 %v3801_v55 }
0x125d   :  { %4708 = vmatprep.subr.mxu1 %v5014_v57 }
0x12e0   :  { %v3789_v60 = vpop.xlane.xlu0 %3788 }
0x12e1   :  { %v3790_v14 = vmul.f32 0.015625, %v3789_v60 }
0x12e3   :  { %v3791_v29 = vadd.f32 1e-06, %v3790_v14 }
0x12e5   :  { %4962 = vrsqrt.f32 %v3791_v29 }
0x12f2   :  { %v4963_v9 = vpop.eup %4962 }
0x12f3   :  { %v3793_v49 = vmul.f32 %v4963_v9, %v3783_v54 }
0x12f5   :  { %v3800_v34 = vmul.f32 %v4206_v32, %v3793_v49 }
0x12f7   :  { %4706 = vmatmul.mubr.msk.f32.vlgmr.msra.gmra.mxu1 %vm98_vm0, %v3800_v34 }
0x12f8   :  { %4724 = vmatprep.mubr.msk.f32.mxu1 %vm5015_vm15, %v5014_v57  ;;  %4709 = vmatpush3.msra.mxu1 %v3901_v17 }
0x12f9   :  { %4710 = vmatprep.subr.mxu1 %v5014_v57 }
0x12fa   :  { %4711 = vmatpush3.msra.mxu1 %v3900_v11 }
0x12fb   :  { %4712 = vmatprep.subr.mxu1 %v5014_v57 }
0x12fc   :  { %4713 = vmatpush3.msra.mxu1 %v3899_v1 }
0x12fd   :  { %4714 = vmatprep.subr.mxu1 %v5014_v57 }
0x12fe   :  { %4715 = vmatpush3.msra.mxu1 %v3898_v47 }
0x12ff   :  { %4716 = vmatprep.subr.mxu1 %v5014_v57 }
0x1300   :  { %4717 = vmatpush3.msra.mxu1 %v3897_v23 }
0x1301   :  { %4718 = vmatprep.subr.mxu1 %v5014_v57 }
0x1302   :  { %4719 = vmatpush3.msra.mxu1 %v3896_v51 }
0x1303   :  { %4720 = vmatprep.subr.mxu1 %v5014_v57 }
0x1304   :  { %4721 = vmatpush3.msra.mxu1 %v3895_v20 }
0x1305   :  { %4722 = vmatprep.subr.mxu1 %v5014_v57  ;;  %v4209_v57 = vld [vmem:[%s6468_s12] ss:$0 sm:$0xff] }
0x1306   :  { %4723 = vmatpush3.msra.mxu1 %v3894_v36 }
0x13b7   :  { %v3885_v40 = vpop.f32.mrf.mxu1 }
0x13b8   :  { %v3886_v43 = vadd.f32 %v4207_v46, %v3885_v40 }
0x13b9   :  { %v4707_v0 = vpop.f32.mrf.mxu1 }
0x13ba   :  { %v3890_v39 = vmul.f32 0.70710677, %v3886_v43  ;;  %v3889_v3 = vmul.f32 0.5, %v3886_v43 }
0x13bc   :  { %4964 = verf.f32 %v3890_v39 }
0x13c9   :  { %v4965_v50 = vpop.eup %4964 }
0x13ca   :  { %v3892_v53 = vadd.f32 1.0, %v4965_v50 }
0x13cc   :  { %v3893_v52 = vmul.f32 %v3892_v53, %v3889_v3 }
0x13ce   :  { %4725 = vmatmul.mubr.msk.f32.vlgmr.msra.gmra.mxu1 %vm98_vm0, %v3893_v52 }
0x148e   :  { %v3978_v41 = vpop.f32.mrf.mxu1 }
0x148f   :  { %v3979_v56 = vadd.f32 %v4209_v57, %v3978_v41 }
0x1490   :  { %v4726_v59 = vpop.f32.mrf.mxu1 }
0x1491   :  { %3983 = vst.msk [vmem:[#allocation6] sm:$0x3] %vm3982_vm1, %v3979_v56 }
0x1492   :  { %4993 = shalt.err (!%p4990_p9)
}
0x1493   :  { %3993 = dma.vmem_to_hbm [thread:$0]  %s3991_s26, 32, %s6469_s13, [#allocation4]  }
0x1494   :  { %5004 = dma.done.wait [#allocation4], 32  }
0x1495   :  { %5005 = vsyncadd [#allocation4], 4294967264 }
0x1496   :  { %3997 = vsyncpa [#allocation4], 1 }
0x1497   :  { %3998 = vsyncpa [#allocation5], 1 }

</bundles_post_ra>
